<compile_context>
chip_gen: v5e
topology: v5e:2x2
jax: 0.10.0
libtpu: 0.0.40
codegen_flags: <defaults>
</compile_context>

<pallas_src>
import functools

import jax
import jax.numpy as jnp
from jax import lax
from jax.experimental import pallas as pl
from jax.experimental.pallas import tpu as pltpu

BN_EPS = 1e-5


def _round_up(x, m):
    return (x + m - 1) // m * m


def _leaky(x):
    return jnp.where(x > 0, x, 0.1 * x)


def _resblock_kernel(x_ref, w1_ref, b1_ref, w2_ref, b2_ref, o_ref, hpad_ref,
                     *, H, W, pad0, use_residual):
    """One (batch image, repeat) grid step.

    x_ref : (1, H*W, C)        input image (fetched once per image)
    w1_ref: (1, C, Cmid)       bf16 1x1 conv weight, BN scale folded in
    b1_ref: (1, 1, Cmid)       f32 folded bias for block 1
    w2_ref: (1, 9*Cmid, C)     bf16 3x3 conv weight (row-major taps), BN folded
    b2_ref: (1, 1, C)          f32 folded bias for block 2
    o_ref : (1, H*W, C)        output image; VMEM-resident accumulator across r
    hpad_ref: (rows, Cmid) f32 flattened-pixel hidden map with zero halo rows
                               (h stored at rows [pad0, pad0+H*W))
    """
    r = pl.program_id(1)
    HW = H * W
    Cmid = w1_ref.shape[-1]
    nrows = hpad_ref.shape[0]

    @pl.when(r == 0)
    def _init():
        # Seed the resident output block (the accumulator) with the input and
        # zero only the halo rows of the padded hidden map once per image.
        o_ref[0] = x_ref[0]
        hpad_ref[0:pad0, :] = jnp.zeros((pad0, Cmid), jnp.float32)
        hpad_ref[pad0 + HW:nrows, :] = jnp.zeros((nrows - pad0 - HW, Cmid),
                                                 jnp.float32)

    x = o_ref[0]                                         # (HW, C) f32, resident

    # --- CNNBlock #1: 1x1 conv (C -> C//2) + folded BN + LeakyReLU ----------
    z1 = jnp.dot(x.astype(jnp.bfloat16), w1_ref[0],
                 preferred_element_type=jnp.float32)     # (HW, Cmid)
    h = _leaky(z1 + b1_ref[0])

    # Sublane-aligned, full-width interior store (pad0 is a multiple of 8).
    hpad_ref[pad0:pad0 + HW, :] = h

    # --- CNNBlock #2: 3x3 conv pad=1 (C//2 -> C) -----------------------------
    # Taps are row-offset views of the flattened padded hidden map; the H
    # boundary is covered by the zero halo rows, the W boundary (left/right
    # columns) by per-row masks (hoisted out of the tap loop).
    j_idx = lax.broadcasted_iota(jnp.int32, (HW, 1), 0) % W
    mask_l = jnp.broadcast_to(j_idx > 0, (HW, Cmid))      # for dj == 0 taps
    mask_r = jnp.broadcast_to(j_idx < W - 1, (HW, Cmid))  # for dj == 2 taps

    z2 = None
    for di in range(3):
        taps = []
        for dj in range(3):
            start = pad0 + (di - 1) * W + (dj - 1)        # static Python int
            t = hpad_ref[start:start + HW, :]
            if dj == 0:
                t = jnp.where(mask_l, t, 0.0)
            elif dj == 2:
                t = jnp.where(mask_r, t, 0.0)
            taps.append(t)
        grp = jnp.concatenate(taps, axis=-1).astype(jnp.bfloat16)  # (HW, 3*Cmid)
        w2_grp = w2_ref[0, di * 3 * Cmid:(di + 1) * 3 * Cmid, :]   # (3*Cmid, C)
        part = jnp.dot(grp, w2_grp, preferred_element_type=jnp.float32)
        z2 = part if z2 is None else z2 + part
    y = _leaky(z2 + b2_ref[0])                            # (HW, C)

    o_ref[0] = x + y if use_residual else y


def residual_block_forward(x_nchw, packed, *, use_residual=True):
    """ResidualBlock.forward. Input/output: NCHW float32 (PyTorch convention)."""
    N, C, H, W = x_nchw.shape
    R, _, Cmid = packed["w1"].shape
    HW = H * W
    x = jnp.transpose(x_nchw, (0, 2, 3, 1)).reshape(N, HW, C).astype(jnp.float32)

    # Flattened-pixel padded hidden map: h lives at rows [pad0, pad0+H*W).
    # pad0 >= W+1 keeps every tap start non-negative; pad0 % 8 == 0 keeps the
    # interior store sublane-aligned.  Bottom halo covers the last tap rows.
    pad0 = _round_up(W + 1, 8)
    hpad_rows = _round_up(pad0 + HW + W + 1, 8)

    kernel = functools.partial(_resblock_kernel, H=H, W=W, pad0=pad0,
                               use_residual=use_residual)

    # Scoped-VMEM budget: double-buffered x/o blocks + weights + hpad scratch.
    blk = HW * C * 4
    wbytes = (C * Cmid + 9 * Cmid * C) * 2 + (Cmid + C) * 4
    est = 2 * 2 * blk + 2 * wbytes + hpad_rows * Cmid * 4
    vmem_limit = int(min(96 << 20, max(32 << 20, 2 * est + (4 << 20))))

    out = pl.pallas_call(
        kernel,
        out_shape=jax.ShapeDtypeStruct((N, HW, C), jnp.float32),
        grid_spec=pltpu.PrefetchScalarGridSpec(
            num_scalar_prefetch=0,
            grid=(N, R),                                  # batch x repeats
            in_specs=[
                pl.BlockSpec((1, HW, C), lambda n, r: (n, 0, 0)),
                pl.BlockSpec((1, C, Cmid), lambda n, r: (r, 0, 0)),
                pl.BlockSpec((1, 1, Cmid), lambda n, r: (r, 0, 0)),
                pl.BlockSpec((1, 9 * Cmid, C), lambda n, r: (r, 0, 0)),
                pl.BlockSpec((1, 1, C), lambda n, r: (r, 0, 0)),
            ],
            out_specs=pl.BlockSpec((1, HW, C), lambda n, r: (n, 0, 0)),
            scratch_shapes=[
                pltpu.VMEM((hpad_rows, Cmid), jnp.float32),   # padded hidden map
            ],
        ),
        compiler_params=pltpu.CompilerParams(
            dimension_semantics=("parallel", "arbitrary"),
            vmem_limit_bytes=vmem_limit),
    )(x, packed["w1"], packed["b1"], packed["w2"], packed["b2"])

    return jnp.transpose(out.reshape(N, H, W, C), (0, 3, 1, 2))


def init_params(key, channels, num_repeats):
    """Deterministic synthetic parameters in PyTorch convention."""
    cmid = channels // 2
    params = []
    for r in range(num_repeats):
        ks = jax.random.split(jax.random.fold_in(key, r), 12)
        # CNNBlock 1: Conv2d(C, C//2, k=1, bias=True) + BatchNorm2d(C//2)
        w1_oihw = 0.10 * jax.random.normal(ks[0], (cmid, channels, 1, 1), jnp.float32)
        cb1 = 0.10 * jax.random.normal(ks[1], (cmid,), jnp.float32)
        g1 = 1.0 + 0.10 * jax.random.normal(ks[2], (cmid,), jnp.float32)
        beta1 = 0.10 * jax.random.normal(ks[3], (cmid,), jnp.float32)
        mean1 = 0.10 * jax.random.normal(ks[4], (cmid,), jnp.float32)
        var1 = 1.0 + 0.10 * jnp.abs(jax.random.normal(ks[5], (cmid,), jnp.float32))
        # CNNBlock 2: Conv2d(C//2, C, k=3, pad=1, bias=True) + BatchNorm2d(C)
        w2_oihw = 0.05 * jax.random.normal(ks[6], (channels, cmid, 3, 3), jnp.float32)
        cb2 = 0.10 * jax.random.normal(ks[7], (channels,), jnp.float32)
        g2 = 1.0 + 0.10 * jax.random.normal(ks[8], (channels,), jnp.float32)
        beta2 = 0.10 * jax.random.normal(ks[9], (channels,), jnp.float32)
        mean2 = 0.10 * jax.random.normal(ks[10], (channels,), jnp.float32)
        var2 = 1.0 + 0.10 * jnp.abs(jax.random.normal(ks[11], (channels,), jnp.float32))
        params.append(dict(
            w1_oihw=w1_oihw, cb1=cb1, g1=g1, beta1=beta1, mean1=mean1, var1=var1,
            w2_oihw=w2_oihw, cb2=cb2, g2=g2, beta2=beta2, mean2=mean2, var2=var2))
    return params


def pack_params(params):
    """Fold conv bias + eval-mode BN into the conv weights / a per-channel
    bias, stack over repeats, and cast weights to bf16 for the MXU."""
    w1s, b1s, w2s, b2s = [], [], [], []
    for p in params:
        cmid, channels = p["w1_oihw"].shape[0], p["w1_oihw"].shape[1]
        s1 = p["g1"] / jnp.sqrt(p["var1"] + BN_EPS)
        b1 = (p["cb1"] - p["mean1"]) * s1 + p["beta1"]
        s2 = p["g2"] / jnp.sqrt(p["var2"] + BN_EPS)
        b2 = (p["cb2"] - p["mean2"]) * s2 + p["beta2"]
        # 1x1: (Cout, Cin, 1, 1) -> (Cin, Cout), BN scale folded per out column
        w1 = jnp.transpose(p["w1_oihw"][:, :, 0, 0], (1, 0)) * s1[None, :]
        # 3x3: OIHW -> (kh, kw, Cin, Cout), scale folded, rows tap-major
        # (row index = (kh*3 + kw)*Cmid + cin, matching the kernel's tap order)
        w2 = jnp.transpose(p["w2_oihw"], (2, 3, 1, 0)) * s2[None, None, None, :]
        w2 = w2.reshape(9 * cmid, channels)
        w1s.append(w1); b1s.append(b1[None, :])
        w2s.append(w2); b2s.append(b2[None, :])
    return dict(
        w1=jnp.stack(w1s).astype(jnp.bfloat16),   # (R, C, Cmid)
        b1=jnp.stack(b1s).astype(jnp.float32),    # (R, 1, Cmid)
        w2=jnp.stack(w2s).astype(jnp.bfloat16),   # (R, 9*Cmid, C)
        b2=jnp.stack(b2s).astype(jnp.float32),    # (R, 1, C)
    )


def _ref_forward(x_nchw, params, use_residual):
    """Pure-JAX f32 reference mirroring the PyTorch module (eval-mode BN)."""
    def cnnblock(inp, w_oihw, cb, g, beta, mean, var, pad):
        z = lax.conv_general_dilated(
            inp, w_oihw, window_strides=(1, 1),
            padding=[(pad, pad), (pad, pad)],
            dimension_numbers=("NCHW", "OIHW", "NCHW"),
            precision=lax.Precision.HIGHEST)
        z = z + cb[None, :, None, None]
        z = ((z - mean[None, :, None, None])
             / jnp.sqrt(var + BN_EPS)[None, :, None, None]
             * g[None, :, None, None] + beta[None, :, None, None])
        return jnp.where(z > 0, z, 0.1 * z)

    x = x_nchw
    for p in params:
        h = cnnblock(x, p["w1_oihw"], p["cb1"], p["g1"], p["beta1"],
                     p["mean1"], p["var1"], 0)
        y = cnnblock(h, p["w2_oihw"], p["cb2"], p["g2"], p["beta2"],
                     p["mean2"], p["var2"], 1)
        x = x + y if use_residual else y
    return x


if __name__ == "__main__":
    key = jax.random.PRNGKey(0)
    N, C, H, W = 2, 64, 16, 16          # channels must be even (C//2 hidden)
    num_repeats = 2
    use_residual = True

    x = jax.random.normal(jax.random.fold_in(key, 999), (N, C, H, W), jnp.float32)
    params = init_params(key, C, num_repeats)
    packed = pack_params(params)

    out = residual_block_forward(x, packed, use_residual=use_residual)
    out = jax.block_until_ready(out)
    assert out.shape == (N, C, H, W) and out.dtype == jnp.float32

    ref = _ref_forward(x, params, use_residual)
    # bf16 matmul operands vs. an f32 HIGHEST reference -> loosened tolerance
    # (error compounds across repeats through the residual chain).
    err = float(jnp.max(jnp.abs(out - ref)))
    assert jnp.allclose(out, ref, atol=3e-2, rtol=3e-2), err

    print("KERNEL_OK")
</pallas_src>

<mosaic_0001>
module attributes {stable_mosaic.version = 11 : i64} {
  func.func @_resblock_kernel(%arg0: i32, %arg1: i32, %arg2: memref<1x256x64xf32, #tpu.memory_space<vmem>>, %arg3: memref<1x64x32xbf16, #tpu.memory_space<vmem>>, %arg4: memref<1x1x32xf32, #tpu.memory_space<vmem>>, %arg5: memref<1x288x64xbf16, #tpu.memory_space<vmem>>, %arg6: memref<1x1x64xf32, #tpu.memory_space<vmem>>, %arg7: memref<1x256x64xf32, #tpu.memory_space<vmem>>, %arg8: memref<304x32xf32, #tpu.memory_space<vmem>>) attributes {dimension_semantics = [#tpu.dimension_semantics<parallel>, #tpu.dimension_semantics<arbitrary>], iteration_bounds = array<i64: 2, 2>, scalar_prefetch = 0 : i64, scratch_operands = 1 : i64, tpu.core_type = #tpu.core_type<tc>, window_params = [{transform_indices = @transform_0, window_bounds = array<i64: 1, 256, 64>}, {transform_indices = @transform_1, window_bounds = array<i64: 1, 64, 32>}, {transform_indices = @transform_2, window_bounds = array<i64: 1, 1, 32>}, {transform_indices = @transform_3, window_bounds = array<i64: 1, 288, 64>}, {transform_indices = @transform_4, window_bounds = array<i64: 1, 1, 64>}, {transform_indices = @transform_5, window_bounds = array<i64: 1, 256, 64>}]} {
    %c0_i32 = arith.constant 0 : i32
    %0 = arith.cmpi eq, %arg1, %c0_i32 : i32
    %1 = arith.extui %0 : i1 to i32
    %c0_i32_0 = arith.constant 0 : i32
    %2 = arith.cmpi ne, %1, %c0_i32_0 : i32
    scf.if %2 {
      %c0_51 = arith.constant 0 : index
      %c0_52 = arith.constant 0 : index
      %c0_53 = arith.constant 0 : index
      %95 = vector.load %arg2[%c0_51, %c0_52, %c0_53] : memref<1x256x64xf32, #tpu.memory_space<vmem>>, vector<1x256x64xf32>
      %96 = vector.shape_cast %95 : vector<1x256x64xf32> to vector<256x64xf32>
      %c0_54 = arith.constant 0 : index
      %c0_55 = arith.constant 0 : index
      %c0_56 = arith.constant 0 : index
      %97 = vector.load %arg7[%c0_54, %c0_55, %c0_56] : memref<1x256x64xf32, #tpu.memory_space<vmem>>, vector<1x256x64xf32>
      %98 = vector.shape_cast %97 : vector<1x256x64xf32> to vector<256x64xf32>
      %99 = vector.shape_cast %96 : vector<256x64xf32> to vector<1x256x64xf32>
      tpu.vector_store %arg7[%c0_54, %c0_55, %c0_56], %99 {strides = array<i32>} : memref<1x256x64xf32, #tpu.memory_space<vmem>>, vector<1x256x64xf32>,
      %cst_57 = arith.constant 0.000000e+00 : f32
      %100 = vector.broadcast %cst_57 : f32 to vector<24x32xf32>
      %c0_58 = arith.constant 0 : index
      %c0_59 = arith.constant 0 : index
      %101 = vector.load %arg8[%c0_58, %c0_59] : memref<304x32xf32, #tpu.memory_space<vmem>>, vector<24x32xf32>
      tpu.vector_store %arg8[%c0_58, %c0_59], %100 {strides = array<i32>} : memref<304x32xf32, #tpu.memory_space<vmem>>, vector<24x32xf32>,
      %cst_60 = arith.constant 0.000000e+00 : f32
      %102 = vector.broadcast %cst_60 : f32 to vector<24x32xf32>
      %c280 = arith.constant 280 : index
      %c0_61 = arith.constant 0 : index
      %103 = vector.load %arg8[%c280, %c0_61] : memref<304x32xf32, #tpu.memory_space<vmem>>, vector<24x32xf32>
      tpu.vector_store %arg8[%c280, %c0_61], %102 {strides = array<i32>} : memref<304x32xf32, #tpu.memory_space<vmem>>, vector<24x32xf32>,
    } else {
    }
    %c0 = arith.constant 0 : index
    %c0_1 = arith.constant 0 : index
    %c0_2 = arith.constant 0 : index
    %3 = vector.load %arg7[%c0, %c0_1, %c0_2] : memref<1x256x64xf32, #tpu.memory_space<vmem>>, vector<1x256x64xf32>
    %4 = vector.shape_cast %3 : vector<1x256x64xf32> to vector<256x64xf32>
    %5 = arith.truncf %4 : vector<256x64xf32> to vector<256x64xbf16>
    %c0_3 = arith.constant 0 : index
    %c0_4 = arith.constant 0 : index
    %c0_5 = arith.constant 0 : index
    %6 = vector.load %arg3[%c0_3, %c0_4, %c0_5] : memref<1x64x32xbf16, #tpu.memory_space<vmem>>, vector<1x64x32xbf16>
    %7 = vector.shape_cast %6 : vector<1x64x32xbf16> to vector<64x32xbf16>
    %cst = arith.constant dense<0.000000e+00> : vector<256x32xf32>
    %8 = tpu.matmul %5, %7, %cst {dimension_numbers = #tpu.dot_dimension_numbers<[1], [0], [0], [1], [0, 0, 1, 1], [], []>} : vector<256x64xbf16>, vector<64x32xbf16>, vector<256x32xf32> -> vector<256x32xf32>
    %c0_6 = arith.constant 0 : index
    %c0_7 = arith.constant 0 : index
    %c0_8 = arith.constant 0 : index
    %9 = vector.load %arg4[%c0_6, %c0_7, %c0_8] : memref<1x1x32xf32, #tpu.memory_space<vmem>>, vector<1x1x32xf32>
    %10 = vector.shape_cast %9 : vector<1x1x32xf32> to vector<1x32xf32>
    %11 = vector.broadcast %10 : vector<1x32xf32> to vector<256x32xf32>
    %12 = arith.addf %8, %11 : vector<256x32xf32>
    %cst_9 = arith.constant 0.000000e+00 : f32
    %13 = vector.broadcast %cst_9 : f32 to vector<256x32xf32>
    %14 = arith.cmpf ogt, %12, %13 : vector<256x32xf32>
    %cst_10 = arith.constant 1.000000e-01 : f32
    %15 = vector.broadcast %cst_10 : f32 to vector<256x32xf32>
    %16 = arith.mulf %15, %12 : vector<256x32xf32>
    %17 = arith.select %14, %12, %16 : vector<256x32xi1>, vector<256x32xf32>
    %c24 = arith.constant 24 : index
    %c0_11 = arith.constant 0 : index
    %18 = vector.load %arg8[%c24, %c0_11] : memref<304x32xf32, #tpu.memory_space<vmem>>, vector<256x32xf32>
    tpu.vector_store %arg8[%c24, %c0_11], %17 {strides = array<i32>} : memref<304x32xf32, #tpu.memory_space<vmem>>, vector<256x32xf32>,
    %19 = tpu.iota {dimensions = array<i32: 0>} : vector<256x1xi32>
    %c16_i32 = arith.constant 16 : i32
    %c0_i32_12 = arith.constant 0 : i32
    %20 = arith.cmpi eq, %c16_i32, %c0_i32_12 : i32
    %c1_i32 = arith.constant 1 : i32
    %21 = arith.select %20, %c1_i32, %c16_i32 : i32
    %22 = vector.broadcast %21 : i32 to vector<256x1xi32>
    %23 = arith.remsi %19, %22 : vector<256x1xi32>
    %c0_i32_13 = arith.constant 0 : i32
    %24 = vector.broadcast %c0_i32_13 : i32 to vector<256x1xi32>
    %25 = arith.cmpi ne, %23, %24 : vector<256x1xi32>
    %c0_i32_14 = arith.constant 0 : i32
    %26 = vector.broadcast %c0_i32_14 : i32 to vector<256x1xi32>
    %27 = arith.cmpi slt, %23, %26 : vector<256x1xi32>
    %c0_i32_15 = arith.constant 0 : i32
    %28 = arith.cmpi slt, %21, %c0_i32_15 : i32
    %29 = vector.broadcast %28 : i1 to vector<256x1xi1>
    %30 = vector.broadcast %29 : vector<256x1xi1> to vector<256x1xi1>
    %31 = arith.xori %27, %30 : vector<256x1xi1>
    %32 = arith.andi %31, %25 : vector<256x1xi1>
    %33 = vector.broadcast %21 : i32 to vector<256x1xi32>
    %34 = arith.addi %23, %33 : vector<256x1xi32>
    %35 = arith.select %32, %34, %23 : vector<256x1xi1>, vector<256x1xi32>
    %c0_i32_16 = arith.constant 0 : i32
    %36 = vector.broadcast %c0_i32_16 : i32 to vector<256x1xi32>
    %37 = arith.cmpi sgt, %35, %36 : vector<256x1xi32>
    %38 = vector.shape_cast %37 : vector<256x1xi1> to vector<256x1xi1>
    %39 = vector.broadcast %38 : vector<256x1xi1> to vector<256x32xi1>
    %c15_i32 = arith.constant 15 : i32
    %40 = vector.broadcast %c15_i32 : i32 to vector<256x1xi32>
    %41 = arith.cmpi slt, %35, %40 : vector<256x1xi32>
    %42 = vector.shape_cast %41 : vector<256x1xi1> to vector<256x1xi1>
    %43 = vector.broadcast %42 : vector<256x1xi1> to vector<256x32xi1>
    %c7 = arith.constant 7 : index
    %c0_17 = arith.constant 0 : index
    %44 = vector.load %arg8[%c7, %c0_17] : memref<304x32xf32, #tpu.memory_space<vmem>>, vector<256x32xf32>
    %cst_18 = arith.constant 0.000000e+00 : f32
    %45 = vector.broadcast %cst_18 : f32 to vector<256x32xf32>
    %46 = arith.select %39, %44, %45 : vector<256x32xi1>, vector<256x32xf32>
    %c8 = arith.constant 8 : index
    %c0_19 = arith.constant 0 : index
    %47 = vector.load %arg8[%c8, %c0_19] : memref<304x32xf32, #tpu.memory_space<vmem>>, vector<256x32xf32>
    %c9 = arith.constant 9 : index
    %c0_20 = arith.constant 0 : index
    %48 = vector.load %arg8[%c9, %c0_20] : memref<304x32xf32, #tpu.memory_space<vmem>>, vector<256x32xf32>
    %cst_21 = arith.constant 0.000000e+00 : f32
    %49 = vector.broadcast %cst_21 : f32 to vector<256x32xf32>
    %50 = arith.select %43, %48, %49 : vector<256x32xi1>, vector<256x32xf32>
    %51 = tpu.concatenate %46, %47, %50 in 1 : vector<256x32xf32>, vector<256x32xf32>, vector<256x32xf32> -> vector<256x96xf32>
    %52 = arith.truncf %51 : vector<256x96xf32> to vector<256x96xbf16>
    %c0_22 = arith.constant 0 : index
    %c0_23 = arith.constant 0 : index
    %c0_24 = arith.constant 0 : index
    %53 = vector.load %arg5[%c0_22, %c0_23, %c0_24] : memref<1x288x64xbf16, #tpu.memory_space<vmem>>, vector<1x96x64xbf16>
    %54 = vector.shape_cast %53 : vector<1x96x64xbf16> to vector<96x64xbf16>
    %cst_25 = arith.constant dense<0.000000e+00> : vector<256x64xf32>
    %55 = tpu.matmul %52, %54, %cst_25 {dimension_numbers = #tpu.dot_dimension_numbers<[1], [0], [0], [1], [0, 0, 1, 1], [], []>} : vector<256x96xbf16>, vector<96x64xbf16>, vector<256x64xf32> -> vector<256x64xf32>
    %c23 = arith.constant 23 : index
    %c0_26 = arith.constant 0 : index
    %56 = vector.load %arg8[%c23, %c0_26] : memref<304x32xf32, #tpu.memory_space<vmem>>, vector<256x32xf32>
    %cst_27 = arith.constant 0.000000e+00 : f32
    %57 = vector.broadcast %cst_27 : f32 to vector<256x32xf32>
    %58 = arith.select %39, %56, %57 : vector<256x32xi1>, vector<256x32xf32>
    %c24_28 = arith.constant 24 : index
    %c0_29 = arith.constant 0 : index
    %59 = vector.load %arg8[%c24_28, %c0_29] : memref<304x32xf32, #tpu.memory_space<vmem>>, vector<256x32xf32>
    %c25 = arith.constant 25 : index
    %c0_30 = arith.constant 0 : index
    %60 = vector.load %arg8[%c25, %c0_30] : memref<304x32xf32, #tpu.memory_space<vmem>>, vector<256x32xf32>
    %cst_31 = arith.constant 0.000000e+00 : f32
    %61 = vector.broadcast %cst_31 : f32 to vector<256x32xf32>
    %62 = arith.select %43, %60, %61 : vector<256x32xi1>, vector<256x32xf32>
    %63 = tpu.concatenate %58, %59, %62 in 1 : vector<256x32xf32>, vector<256x32xf32>, vector<256x32xf32> -> vector<256x96xf32>
    %64 = arith.truncf %63 : vector<256x96xf32> to vector<256x96xbf16>
    %c0_32 = arith.constant 0 : index
    %c96 = arith.constant 96 : index
    %c0_33 = arith.constant 0 : index
    %65 = vector.load %arg5[%c0_32, %c96, %c0_33] : memref<1x288x64xbf16, #tpu.memory_space<vmem>>, vector<1x96x64xbf16>
    %66 = vector.shape_cast %65 : vector<1x96x64xbf16> to vector<96x64xbf16>
    %cst_34 = arith.constant dense<0.000000e+00> : vector<256x64xf32>
    %67 = tpu.matmul %64, %66, %cst_34 {dimension_numbers = #tpu.dot_dimension_numbers<[1], [0], [0], [1], [0, 0, 1, 1], [], []>} : vector<256x96xbf16>, vector<96x64xbf16>, vector<256x64xf32> -> vector<256x64xf32>
    %68 = arith.addf %55, %67 : vector<256x64xf32>
    %c39 = arith.constant 39 : index
    %c0_35 = arith.constant 0 : index
    %69 = vector.load %arg8[%c39, %c0_35] : memref<304x32xf32, #tpu.memory_space<vmem>>, vector<256x32xf32>
    %cst_36 = arith.constant 0.000000e+00 : f32
    %70 = vector.broadcast %cst_36 : f32 to vector<256x32xf32>
    %71 = arith.select %39, %69, %70 : vector<256x32xi1>, vector<256x32xf32>
    %c40 = arith.constant 40 : index
    %c0_37 = arith.constant 0 : index
    %72 = vector.load %arg8[%c40, %c0_37] : memref<304x32xf32, #tpu.memory_space<vmem>>, vector<256x32xf32>
    %c41 = arith.constant 41 : index
    %c0_38 = arith.constant 0 : index
    %73 = vector.load %arg8[%c41, %c0_38] : memref<304x32xf32, #tpu.memory_space<vmem>>, vector<256x32xf32>
    %cst_39 = arith.constant 0.000000e+00 : f32
    %74 = vector.broadcast %cst_39 : f32 to vector<256x32xf32>
    %75 = arith.select %43, %73, %74 : vector<256x32xi1>, vector<256x32xf32>
    %76 = tpu.concatenate %71, %72, %75 in 1 : vector<256x32xf32>, vector<256x32xf32>, vector<256x32xf32> -> vector<256x96xf32>
    %77 = arith.truncf %76 : vector<256x96xf32> to vector<256x96xbf16>
    %c0_40 = arith.constant 0 : index
    %c192 = arith.constant 192 : index
    %c0_41 = arith.constant 0 : index
    %78 = vector.load %arg5[%c0_40, %c192, %c0_41] : memref<1x288x64xbf16, #tpu.memory_space<vmem>>, vector<1x96x64xbf16>
    %79 = vector.shape_cast %78 : vector<1x96x64xbf16> to vector<96x64xbf16>
    %cst_42 = arith.constant dense<0.000000e+00> : vector<256x64xf32>
    %80 = tpu.matmul %77, %79, %cst_42 {dimension_numbers = #tpu.dot_dimension_numbers<[1], [0], [0], [1], [0, 0, 1, 1], [], []>} : vector<256x96xbf16>, vector<96x64xbf16>, vector<256x64xf32> -> vector<256x64xf32>
    %81 = arith.addf %68, %80 : vector<256x64xf32>
    %c0_43 = arith.constant 0 : index
    %c0_44 = arith.constant 0 : index
    %c0_45 = arith.constant 0 : index
    %82 = vector.load %arg6[%c0_43, %c0_44, %c0_45] : memref<1x1x64xf32, #tpu.memory_space<vmem>>, vector<1x1x64xf32>
    %83 = vector.shape_cast %82 : vector<1x1x64xf32> to vector<1x64xf32>
    %84 = vector.broadcast %83 : vector<1x64xf32> to vector<256x64xf32>
    %85 = arith.addf %81, %84 : vector<256x64xf32>
    %cst_46 = arith.constant 0.000000e+00 : f32
    %86 = vector.broadcast %cst_46 : f32 to vector<256x64xf32>
    %87 = arith.cmpf ogt, %85, %86 : vector<256x64xf32>
    %cst_47 = arith.constant 1.000000e-01 : f32
    %88 = vector.broadcast %cst_47 : f32 to vector<256x64xf32>
    %89 = arith.mulf %88, %85 : vector<256x64xf32>
    %90 = arith.select %87, %85, %89 : vector<256x64xi1>, vector<256x64xf32>
    %91 = arith.addf %4, %90 : vector<256x64xf32>
    %c0_48 = arith.constant 0 : index
    %c0_49 = arith.constant 0 : index
    %c0_50 = arith.constant 0 : index
    %92 = vector.load %arg7[%c0_48, %c0_49, %c0_50] : memref<1x256x64xf32, #tpu.memory_space<vmem>>, vector<1x256x64xf32>
    %93 = vector.shape_cast %92 : vector<1x256x64xf32> to vector<256x64xf32>
    %94 = vector.shape_cast %91 : vector<256x64xf32> to vector<1x256x64xf32>
    tpu.vector_store %arg7[%c0_48, %c0_49, %c0_50], %94 {strides = array<i32>} : memref<1x256x64xf32, #tpu.memory_space<vmem>>, vector<1x256x64xf32>,
    return
  }
  func.func @transform_0(%arg0: i32, %arg1: i32) -> (i32, i32, i32) {
    %c0_i32 = arith.constant 0 : i32
    %c0_i32_0 = arith.constant 0 : i32
    %c0_i32_1 = arith.constant 0 : i32
    return %arg0, %c0_i32, %c0_i32_0 : i32, i32, i32
  }
  func.func @transform_1(%arg0: i32, %arg1: i32) -> (i32, i32, i32) {
    %c0_i32 = arith.constant 0 : i32
    %c0_i32_0 = arith.constant 0 : i32
    %c0_i32_1 = arith.constant 0 : i32
    return %arg1, %c0_i32, %c0_i32_0 : i32, i32, i32
  }
  func.func @transform_2(%arg0: i32, %arg1: i32) -> (i32, i32, i32) {
    %c0_i32 = arith.constant 0 : i32
    %c0_i32_0 = arith.constant 0 : i32
    %c0_i32_1 = arith.constant 0 : i32
    return %arg1, %c0_i32, %c0_i32_0 : i32, i32, i32
  }
  func.func @transform_3(%arg0: i32, %arg1: i32) -> (i32, i32, i32) {
    %c0_i32 = arith.constant 0 : i32
    %c0_i32_0 = arith.constant 0 : i32
    %c0_i32_1 = arith.constant 0 : i32
    return %arg1, %c0_i32, %c0_i32_0 : i32, i32, i32
  }
  func.func @transform_4(%arg0: i32, %arg1: i32) -> (i32, i32, i32) {
    %c0_i32 = arith.constant 0 : i32
    %c0_i32_0 = arith.constant 0 : i32
    %c0_i32_1 = arith.constant 0 : i32
    return %arg1, %c0_i32, %c0_i32_0 : i32, i32, i32
  }
  func.func @transform_5(%arg0: i32, %arg1: i32) -> (i32, i32, i32) {
    %c0_i32 = arith.constant 0 : i32
    %c0_i32_0 = arith.constant 0 : i32
    %c0_i32_1 = arith.constant 0 : i32
    return %arg0, %c0_i32, %c0_i32_0 : i32, i32, i32
  }
}

</mosaic_0001>

<bundles_post_ra>
// kernel: tpu_custom_call.1
= control target key start
LH: loop header
LB: loop body
LE: loop exit
PB: predicated region body
PF: predicated region fallthrough
CT: control target
= control target key end

     0   :  { %s4262_s18 = smov 0   ;;  %s4264_s19 = smov 0   ;;  %s5668_s0 = inlined_call_operand.vmem [shape: f32[2,256,64], index: 0, kind: input, shape index: {}]   ;;  %s5669_s1 = inlined_call_operand.vmem [shape: bf16[2,64,32], index: 1, kind: input, shape index: {}]   ;;  %s5670_s2 = inlined_call_operand.vmem [shape: f32[2,1,32], index: 2, kind: input, shape index: {}]   ;;  %s5671_s3 = inlined_call_operand.vmem [shape: bf16[2,288,64], index: 3, kind: input, shape index: {}]   ;;  %s5672_s4 = inlined_call_operand.vmem [shape: f32[2,1,64], index: 4, kind: input, shape index: {}]   ;;  %s5673_s5 = inlined_call_operand.vmem [shape: f32[2,256,64], index: 5, kind: output, shape index: {}]  }
   0x1   :  { %s4266_s20 = smov 0   ;;  %s4268_s21 = smov 0  }
   0x2   :  { %s4270_s22 = smov 0  }
   0x3 LB: > { %s24_s23 = sadd.s32 1, %s4219_s20  ;;  %s27_s24 = sadd.s32 1, %s4223_s21  ;;  %s4227_s22 = sphi %s4270_s22, %s15_s22   ;;  %s4223_s21 = sphi %s4268_s21, %s5741_s21   ;;  %s4219_s20 = sphi %s4266_s20, %s5740_s20   ;;  %s4215_s19 = sphi %s4264_s19, %s5739_s19   ;;  %s4211_s18 = sphi %s4262_s18, %s5738_s18  }
   0x4   : > { %p25_p0 = scmp.ge.s32.totalorder %s24_s23, 2  ;;  %p3516_p1 = scmp.ge.s32.totalorder %s4227_s22, 1 }
   0x5   : > { %p235_p2 = scmp.lt.s32.totalorder %s4227_s22, 5 }
   0x6   : > { %s5743_s23 = smov (%p25_p0, %s24_s23), 0  ;;  %s5745_s24 = smov (!%p25_p0, %s27_s24), %s4223_s21 }
   0x7   : > { %p236_p3 = pnand %p3516_p1, %p235_p2  ;;  %p29_p4 = scmp.ge.s32.totalorder %s5745_s24, 2 }
   0x8   : > { %p279_p5 = scmp.lt.s32.totalorder (!%p236_p3), %s4215_s19, 1  ;;  %p284_p6 = scmp.lt.s32.totalorder (!%p236_p3), %s4211_s18, 1 }
   0x9   : > { %s5747_s24 = smov (%p29_p4, %s5745_s24), 0  ;;  %239 = sbr.rel (%p236_p3) target bundleno = 768 (0x300), region = 40 }
   0xa   : > { %p3524_p7 = scmp.ne.s32.totalorder (!%p236_p3), %s4211_s18, 0 }
   0xe   : > { %s5749_s19 = smov (!%p279_p5, %s4215_s19), 1 }
   0xf   : > { %s285_s25 = scalar_select %p284_p6, %s4211_s18, 1 }
  0x10   : > { %s3679_s26 = sshll.u32 %s5749_s19, 8 }
  0x11   : > { %s4299_s29 = scalar_lea.vmem %s5668_s0, %s3679_s26  ;;  %s3680_s30 = sshll.u32 %s285_s25, 5 }
  0x12   : > { %s4304_s8 = scalar_lea.vmem %s5669_s1, %s3680_s30  ;;  %s4309_s11 = scalar_lea.vmem %s5670_s2, %s285_s25 }
  0x13   : > { %s3704_s12 = smul.u32 144, %s285_s25  ;;  %s4314_s15 = scalar_lea.vmem %s5672_s4, %s285_s25 }
  0x14   : > { %s4319_s19 = scalar_lea.vmem %s5673_s5, %s3679_s26  ;;  %309 = sbr.rel (%p3524_p7) target bundleno = 64 (0x40), region = 44 }
  0x15   : > { %s4324_s30 = scalar_lea.vmem %s5671_s3, %s3704_s12 }
  0x19   : > { %v310_v0 = vld [vmem:[%s4299_s29] sm:$0xff]  ;;  %vm342_vm0 = vcmask 523264   ;;  %v311_v1 = vld [vmem:[%s4299_s29 + $0x8] sm:$0xff]  ;;  %v312_v2 = vld [vmem:[%s4299_s29 + $0x10] sm:$0xff]  ;;  %vm375_vm1 = vcmask 261120   ;;  %v4229_v32 = vmov 0.0  }
  0x1a   : > { %343 = vst.msk [vmem:[%s4319_s19] sm:$0xff] %vm342_vm0, %v310_v0  ;;  %v313_v3 = vld [vmem:[%s4299_s29 + $0x18] sm:$0xff]  ;;  %v314_v4 = vld [vmem:[%s4299_s29 + $0x20] sm:$0xff]  ;;  %v315_v5 = vld [vmem:[%s4299_s29 + $0x28] sm:$0xff] }
  0x1b   : > { %344 = vst.msk [vmem:[%s4319_s19 + $0x8] sm:$0xff] %vm342_vm0, %v311_v1  ;;  %v316_v6 = vld [vmem:[%s4299_s29 + $0x30] sm:$0xff]  ;;  %v317_v7 = vld [vmem:[%s4299_s29 + $0x38] sm:$0xff]  ;;  %v318_v8 = vld [vmem:[%s4299_s29 + $0x40] sm:$0xff] }
  0x1c   : > { %345 = vst.msk [vmem:[%s4319_s19 + $0x10] sm:$0xff] %vm342_vm0, %v312_v2  ;;  %v319_v9 = vld [vmem:[%s4299_s29 + $0x48] sm:$0xff]  ;;  %v320_v10 = vld [vmem:[%s4299_s29 + $0x50] sm:$0xff]  ;;  %v321_v11 = vld [vmem:[%s4299_s29 + $0x58] sm:$0xff] }
  0x1d   : > { %346 = vst.msk [vmem:[%s4319_s19 + $0x18] sm:$0xff] %vm342_vm0, %v313_v3  ;;  %v322_v12 = vld [vmem:[%s4299_s29 + $0x60] sm:$0xff]  ;;  %v323_v13 = vld [vmem:[%s4299_s29 + $0x68] sm:$0xff]  ;;  %v324_v14 = vld [vmem:[%s4299_s29 + $0x70] sm:$0xff] }
  0x1e   : > { %347 = vst.msk [vmem:[%s4319_s19 + $0x20] sm:$0xff] %vm342_vm0, %v314_v4  ;;  %v325_v15 = vld [vmem:[%s4299_s29 + $0x78] sm:$0xff]  ;;  %v326_v16 = vld [vmem:[%s4299_s29 + $0x80] sm:$0xff]  ;;  %v327_v17 = vld [vmem:[%s4299_s29 + $0x88] sm:$0xff] }
  0x1f   : > { %348 = vst.msk [vmem:[%s4319_s19 + $0x28] sm:$0xff] %vm342_vm0, %v315_v5  ;;  %v328_v18 = vld [vmem:[%s4299_s29 + $0x90] sm:$0xff]  ;;  %v329_v19 = vld [vmem:[%s4299_s29 + $0x98] sm:$0xff]  ;;  %v330_v20 = vld [vmem:[%s4299_s29 + $0xa0] sm:$0xff] }
  0x20   : > { %349 = vst.msk [vmem:[%s4319_s19 + $0x30] sm:$0xff] %vm342_vm0, %v316_v6  ;;  %v331_v21 = vld [vmem:[%s4299_s29 + $0xa8] sm:$0xff]  ;;  %v332_v22 = vld [vmem:[%s4299_s29 + $0xb0] sm:$0xff]  ;;  %v333_v23 = vld [vmem:[%s4299_s29 + $0xb8] sm:$0xff] }
  0x21   : > { %350 = vst.msk [vmem:[%s4319_s19 + $0x38] sm:$0xff] %vm342_vm0, %v317_v7  ;;  %v334_v24 = vld [vmem:[%s4299_s29 + $0xc0] sm:$0xff]  ;;  %v335_v25 = vld [vmem:[%s4299_s29 + $0xc8] sm:$0xff]  ;;  %v336_v26 = vld [vmem:[%s4299_s29 + $0xd0] sm:$0xff] }
  0x22   : > { %351 = vst.msk [vmem:[%s4319_s19 + $0x40] sm:$0xff] %vm342_vm0, %v318_v8  ;;  %v337_v27 = vld [vmem:[%s4299_s29 + $0xd8] sm:$0xff]  ;;  %v338_v28 = vld [vmem:[%s4299_s29 + $0xe0] sm:$0xff]  ;;  %v339_v29 = vld [vmem:[%s4299_s29 + $0xe8] sm:$0xff] }
  0x23   : > { %352 = vst.msk [vmem:[%s4319_s19 + $0x48] sm:$0xff] %vm342_vm0, %v319_v9  ;;  %v340_v30 = vld [vmem:[%s4299_s29 + $0xf0] sm:$0xff]  ;;  %v341_v31 = vld [vmem:[%s4299_s29 + $0xf8] sm:$0xff] }
  0x24   : > { %353 = vst.msk [vmem:[%s4319_s19 + $0x50] sm:$0xff] %vm342_vm0, %v320_v10 }
  0x25   : > { %354 = vst.msk [vmem:[%s4319_s19 + $0x58] sm:$0xff] %vm342_vm0, %v321_v11 }
  0x26   : > { %355 = vst.msk [vmem:[%s4319_s19 + $0x60] sm:$0xff] %vm342_vm0, %v322_v12 }
  0x27   : > { %356 = vst.msk [vmem:[%s4319_s19 + $0x68] sm:$0xff] %vm342_vm0, %v323_v13 }
  0x28   : > { %357 = vst.msk [vmem:[%s4319_s19 + $0x70] sm:$0xff] %vm342_vm0, %v324_v14 }
  0x29   : > { %358 = vst.msk [vmem:[%s4319_s19 + $0x78] sm:$0xff] %vm342_vm0, %v325_v15 }
  0x2a   : > { %359 = vst.msk [vmem:[%s4319_s19 + $0x80] sm:$0xff] %vm342_vm0, %v326_v16 }
  0x2b   : > { %360 = vst.msk [vmem:[%s4319_s19 + $0x88] sm:$0xff] %vm342_vm0, %v327_v17 }
  0x2c   : > { %361 = vst.msk [vmem:[%s4319_s19 + $0x90] sm:$0xff] %vm342_vm0, %v328_v18 }
  0x2d   : > { %362 = vst.msk [vmem:[%s4319_s19 + $0x98] sm:$0xff] %vm342_vm0, %v329_v19 }
  0x2e   : > { %363 = vst.msk [vmem:[%s4319_s19 + $0xa0] sm:$0xff] %vm342_vm0, %v330_v20 }
  0x2f   : > { %364 = vst.msk [vmem:[%s4319_s19 + $0xa8] sm:$0xff] %vm342_vm0, %v331_v21 }
  0x30   : > { %365 = vst.msk [vmem:[%s4319_s19 + $0xb0] sm:$0xff] %vm342_vm0, %v332_v22 }
  0x31   : > { %366 = vst.msk [vmem:[%s4319_s19 + $0xb8] sm:$0xff] %vm342_vm0, %v333_v23 }
  0x32   : > { %367 = vst.msk [vmem:[%s4319_s19 + $0xc0] sm:$0xff] %vm342_vm0, %v334_v24 }
  0x33   : > { %368 = vst.msk [vmem:[%s4319_s19 + $0xc8] sm:$0xff] %vm342_vm0, %v335_v25 }
  0x34   : > { %369 = vst.msk [vmem:[%s4319_s19 + $0xd0] sm:$0xff] %vm342_vm0, %v336_v26 }
  0x35   : > { %370 = vst.msk [vmem:[%s4319_s19 + $0xd8] sm:$0xff] %vm342_vm0, %v337_v27 }
  0x36   : > { %371 = vst.msk [vmem:[%s4319_s19 + $0xe0] sm:$0xff] %vm342_vm0, %v338_v28 }
  0x37   : > { %372 = vst.msk [vmem:[%s4319_s19 + $0xe8] sm:$0xff] %vm342_vm0, %v339_v29 }
  0x38   : > { %373 = vst.msk [vmem:[%s4319_s19 + $0xf0] sm:$0xff] %vm342_vm0, %v340_v30 }
  0x39   : > { %374 = vst.msk [vmem:[%s4319_s19 + $0xf8] sm:$0xff] %vm342_vm0, %v341_v31 }
  0x3a   : > { %376 = vst.msk [vmem:[#allocation2] sm:$0xff] %vm375_vm1, %v4229_v32 }
  0x3b   : > { %377 = vst.msk [vmem:[#allocation2 + $0x8] sm:$0xff] %vm375_vm1, %v4229_v32 }
  0x3c   : > { %378 = vst.msk [vmem:[#allocation2 + $0x10] sm:$0xff] %vm375_vm1, %v4229_v32 }
  0x3d   : > { %379 = vst.msk [vmem:[#allocation2 + $0x118] sm:$0xff] %vm375_vm1, %v4229_v32 }
  0x3e   : > { %380 = vst.msk [vmem:[#allocation2 + $0x120] sm:$0xff] %vm375_vm1, %v4229_v32 }
  0x3f   : > { %381 = vst.msk [vmem:[#allocation2 + $0x128] sm:$0xff] %vm375_vm1, %v4229_v32 }
  0x40 PF: > { %v3685_v33 = vld [vmem:[%s4304_s8 + $0x18] sm:$0xff]  ;;  %v3684_v34 = vld [vmem:[%s4304_s8 + $0x10] sm:$0xff]  ;;  %v3683_v35 = vld [vmem:[%s4304_s8 + $0x8] sm:$0xff]  ;;  %vm466_vm2 = vcmask 523264   ;;  %s4230_s18 = smov 32   ;;  %v733_v0 = vlaneseq  ;;  %vm700_vm4 = vcmask 261120  }
  0x41   : > { %519 = vmatpush.bf16.msra.mxu0 %v3685_v33  ;;  %v3682_v36 = vld [vmem:[%s4304_s8] sm:$0xff]  ;;  %v383_v38 = vld [vmem:[%s4319_s19 + $0x8] sm:$0xff]  ;;  %v384_v40 = vld [vmem:[%s4319_s19 + $0x10] sm:$0xff]  ;;  %s4231_s25 = smov 64  }
  0x42   : > { %v382_v37 = vld [vmem:[%s4319_s19] sm:$0xff]  ;;  %v385_v41 = vld [vmem:[%s4319_s19 + $0x18] sm:$0xff]  ;;  %v387_v44 = vld [vmem:[%s4319_s19 + $0x28] sm:$0xff]  ;;  %v4457_v5 = vshrl.u32 %v733_v0, 7 }
  0x43   : > { %v414_v39 = vpack.c.bf16 %v383_v38, %v382_v37  ;;  %v415_v42 = vpack.c.bf16 %v385_v41, %v384_v40  ;;  %v386_v43 = vld [vmem:[%s4319_s19 + $0x20] sm:$0xff]  ;;  %v388_v46 = vld [vmem:[%s4319_s19 + $0x30] sm:$0xff]  ;;  %v389_v47 = vld [vmem:[%s4319_s19 + $0x38] sm:$0xff] }
  0x44   : > { %v416_v45 = vpack.c.bf16 %v387_v44, %v386_v43  ;;  %v417_v48 = vpack.c.bf16 %v389_v47, %v388_v46  ;;  %v390_v49 = vld [vmem:[%s4319_s19 + $0x40] sm:$0xff]  ;;  %v391_v50 = vld [vmem:[%s4319_s19 + $0x48] sm:$0xff]  ;;  %v392_v52 = vld [vmem:[%s4319_s19 + $0x50] sm:$0xff]  ;;  %v735_v9 = vadd.s32 8, %v4457_v5 }
  0x45   : > { %520 = vmatpush.bf16.msra.mxu0 %v3684_v34  ;;  %v418_v51 = vpack.c.bf16 %v391_v50, %v390_v49  ;;  %v393_v53 = vld [vmem:[%s4319_s19 + $0x58] sm:$0xff]  ;;  %v394_v55 = vld [vmem:[%s4319_s19 + $0x60] sm:$0xff]  ;;  %v395_v56 = vld [vmem:[%s4319_s19 + $0x68] sm:$0xff]  ;;  %v737_v50 = vadd.s32 24, %v4457_v5 }
  0x46   : > { %v419_v54 = vpack.c.bf16 %v393_v53, %v392_v52  ;;  %v420_v57 = vpack.c.bf16 %v395_v56, %v394_v55  ;;  %v1406_v58 = vld [vmem:[#allocation2 + $0x8] sm:$0xff]  ;;  %v1407_v59 = vld [vmem:[#allocation2 + $0x10] sm:$0xff]  ;;  %v397_v62 = vld [vmem:[%s4319_s19 + $0x78] sm:$0xff]  ;;  %v777_v11 = vand.u32 15, %v735_v9 }
  0x47   : > { %v3748_v60 = vpack.i.bf16 %v1407_v59, %v1406_v58  ;;  %v396_v61 = vld [vmem:[%s4319_s19 + $0x70] sm:$0xff]  ;;  %v398_v1 = vld [vmem:[%s4319_s19 + $0x80] sm:$0xff]  ;;  %v399_v2 = vld [vmem:[%s4319_s19 + $0x88] sm:$0xff]  ;;  %v791_v55 = vand.u32 15, %v737_v50 }
  0x48   : > { %v421_v63 = vpack.c.bf16 %v397_v62, %v396_v61  ;;  %v4455_v3 = vld [vmem:[%s4309_s11] ss:$0 sm:$0xff]  ;;  %v422_v4 = vpack.c.bf16 %v399_v2, %v398_v1  ;;  %vm4464_vm6 = vcmp.lt.s32.totalorder %v777_v11, 15  ;;  %v1438_v16 = vld [vmem:[#allocation2 + $0x9] sm:$0xff]  ;;  %v401_v18 = vld [vmem:[%s4319_s19 + $0x98] sm:$0xff]  ;;  %v739_v1 = vadd.s32 40, %v4457_v5 }
  0x49   : > { %521 = vmatpush.bf16.msra.mxu0 %v3683_v35  ;;  %3749 = vrot.lane.b32.xlu0 %v3748_v60, %s4230_s18  ;;  %v400_v17 = vld [vmem:[%s4319_s19 + $0x90] sm:$0xff]  ;;  %v402_v34 = vld [vmem:[%s4319_s19 + $0xa0] sm:$0xff]  ;;  %v403_v35 = vld [vmem:[%s4319_s19 + $0xa8] sm:$0xff]  ;;  %vm4497_vm11 = vcmp.lt.s32.totalorder %v791_v55, 15  ;;  %v743_v55 = vadd.s32 72, %v4457_v5 }
  0x4a   : > { %v423_v23 = vpack.c.bf16 %v401_v18, %v400_v17  ;;  %v424_v41 = vpack.c.bf16 %v403_v35, %v402_v34  ;;  %v404_v53 = vld [vmem:[%s4319_s19 + $0xb0] sm:$0xff]  ;;  %v805_v9 = vand.u32 15, %v739_v1  ;;  %v406_v17 = vld [vmem:[%s4319_s19 + $0xc0] sm:$0xff]  ;;  %v407_v18 = vld [vmem:[%s4319_s19 + $0xc8] sm:$0xff] }
  0x4c   : > { %vm4511_vm13 = vcmp.lt.s32.totalorder %v805_v9, 15 }
  0x4d   : > { %522 = vmatpush.bf16.msra.mxu0 %v3682_v36 }
  0x50   : > { %3541 = vmatmul.msk.bf16.vlgmr.msra.gmra.mxu0 %vm466_vm2, %v414_v39 }
  0x60   : > { %3542 = vmatmul.msk.bf16.gmra.mxu0 %vm466_vm2, %v415_v42 }
  0x70   : > { %3543 = vmatmul.msk.bf16.gmra.mxu0 %vm466_vm2, %v416_v45 }
  0x80   : > { %3544 = vmatmul.msk.bf16.gmra.mxu0 %vm466_vm2, %v417_v48 }
  0x90   : > { %3545 = vmatmul.msk.bf16.gmra.mxu0 %vm466_vm2, %v418_v51 }
  0xa0   : > { %3546 = vmatmul.msk.bf16.gmra.mxu0 %vm466_vm2, %v419_v54  ;;  %v405_v54 = vld [vmem:[%s4319_s19 + $0xb8] sm:$0xff] }
  0xa1   : > { %v425_v61 = vpack.c.bf16 %v405_v54, %v404_v53 }
  0xb0   : > { %3547 = vmatmul.msk.bf16.gmra.mxu0 %vm466_vm2, %v420_v57 }
  0xc0   : > { %3548 = vmatmul.msk.bf16.gmra.mxu0 %vm466_vm2, %v421_v63  ;;  %v3690_v63 = vld [vmem:[%s4324_s30 + $0x20] sm:$0xff] }
  0xcd   : > { %v524_v6 = vpop.f32.mrf.mxu0 }
  0xce   : > { %v525_v7 = vadd.f32 %v4455_v3, %v524_v6 }
  0xd0   : > { %vm604_vm3 = vcmp.gt.f32.partialorder %v525_v7, 0.0  ;;  %v636_v8 = vmul.f32 0.1, %v525_v7  ;;  %3549 = vmatmul.msk.bf16.gmra.mxu0 %vm466_vm2, %v422_v4 }
  0xd2   : > { %v668_v10 = vsel %vm604_vm3, %v525_v7, %v636_v8 }
  0xd3   : > { %701 = vst.msk [vmem:[#allocation2 + $0x18] sm:$0xff] %vm700_vm4, %v668_v10 }
  0xd5   : > { %v526_v12 = vpop.f32.mrf.mxu0 }
  0xd6   : > { %v527_v13 = vadd.f32 %v4455_v3, %v526_v12 }
  0xd8   : > { %vm605_vm5 = vcmp.gt.f32.partialorder %v527_v13, 0.0  ;;  %v637_v14 = vmul.f32 0.1, %v527_v13 }
  0xda   : > { %v669_v19 = vsel %vm605_vm5, %v527_v13, %v637_v14  ;;  %v1439_v20 = vld [vmem:[#allocation2 + $0x11] sm:$0xff] }
  0xdb   : > { %702 = vst.msk [vmem:[#allocation2 + $0x20] sm:$0xff] %vm700_vm4, %v669_v19  ;;  %v1471_v21 = vsel %vm4464_vm6, %v1439_v20, 0.0  ;;  %v1408_v28 = vld [vmem:[#allocation2 + $0x18] sm:$0xff]  ;;  %v3688_v14 = vld [vmem:[%s4324_s30 + $0x10] sm:$0xff] }
  0xdc   : > { %v3753_v22 = vpack.i.bf16 %v1471_v21, %v1438_v16 }
  0xdd   : > { %v529_v24 = vpop.f32.mrf.mxu0 }
  0xde   : > { %v530_v25 = vadd.f32 %v4455_v3, %v529_v24  ;;  %3754 = vrot.lane.b32.xlu0 %v3753_v22, %s4231_s25 }
  0xe0   : > { %vm606_vm7 = vcmp.gt.f32.partialorder %v530_v25, 0.0  ;;  %v638_v26 = vmul.f32 0.1, %v530_v25  ;;  %3550 = vmatmul.msk.bf16.gmra.mxu0 %vm466_vm2, %v423_v23 }
  0xe2   : > { %v670_v27 = vsel %vm606_vm7, %v530_v25, %v638_v26  ;;  %v1409_v29 = vld [vmem:[#allocation2 + $0x20] sm:$0xff]  ;;  %v426_v25 = vpack.c.bf16 %v407_v18, %v406_v17 }
  0xe3   : > { %703 = vst.msk [vmem:[#allocation2 + $0x28] sm:$0xff] %vm700_vm4, %v670_v27  ;;  %v3758_v30 = vpack.i.bf16 %v1409_v29, %v1408_v28  ;;  %v1440_v38 = vld [vmem:[#allocation2 + $0x19] sm:$0xff]  ;;  %v741_v28 = vadd.s32 56, %v4457_v5 }
  0xe5   : > { %v531_v31 = vpop.f32.mrf.mxu0 }
  0xe6   : > { %v532_v32 = vadd.f32 %v4455_v3, %v531_v31  ;;  %3759 = vrot.lane.b32.xlu0 %v3758_v30, %s4230_s18 }
  0xe8   : > { %vm607_vm8 = vcmp.gt.f32.partialorder %v532_v32, 0.0  ;;  %v639_v33 = vmul.f32 0.1, %v532_v32 }
  0xea   : > { %v671_v36 = vsel %vm607_vm8, %v532_v32, %v639_v33  ;;  %v1441_v37 = vld [vmem:[#allocation2 + $0x21] sm:$0xff] }
  0xeb   : > { %704 = vst.msk [vmem:[#allocation2 + $0x30] sm:$0xff] %vm700_vm4, %v671_v36  ;;  %v1889_v39 = vsel %vm4464_vm6, %v1441_v37, 0.0  ;;  %v1410_v46 = vld [vmem:[#allocation2 + $0x28] sm:$0xff]  ;;  %v1473_v4 = vsel %vm4497_vm11, %v1441_v37, 0.0  ;;  %v819_v36 = vand.u32 15, %v741_v28 }
  0xec   : > { %v3763_v40 = vpack.i.bf16 %v1889_v39, %v1440_v38  ;;  %v3778_v10 = vpack.i.bf16 %v1473_v4, %v1440_v38 }
  0xed   : > { %v534_v42 = vpop.f32.mrf.mxu0  ;;  %vm4535_vm0 = vcmp.lt.s32.totalorder %v819_v36, 15 }
  0xee   : > { %v535_v43 = vadd.f32 %v4455_v3, %v534_v42  ;;  %3764 = vrot.lane.b32.xlu0 %v3763_v40, %s4231_s25  ;;  %v408_v42 = vld [vmem:[%s4319_s19 + $0xd0] sm:$0xff] }
  0xf0   : > { %vm608_vm9 = vcmp.gt.f32.partialorder %v535_v43, 0.0  ;;  %v640_v44 = vmul.f32 0.1, %v535_v43  ;;  %3551 = vmatmul.msk.bf16.gmra.mxu0 %vm466_vm2, %v424_v41 }
  0xf2   : > { %v672_v45 = vsel %vm608_vm9, %v535_v43, %v640_v44  ;;  %v1411_v47 = vld [vmem:[#allocation2 + $0x30] sm:$0xff]  ;;  %v409_v43 = vld [vmem:[%s4319_s19 + $0xd8] sm:$0xff] }
  0xf3   : > { %705 = vst.msk [vmem:[#allocation2 + $0x38] sm:$0xff] %vm700_vm4, %v672_v45  ;;  %v3768_v48 = vpack.i.bf16 %v1411_v47, %v1410_v46  ;;  %v2591_v58 = vld [vmem:[#allocation2 + $0x29] sm:$0xff] }
  0xf5   : > { %v536_v49 = vpop.f32.mrf.mxu0  ;;  %3769 = vrot.lane.b32.xlu1 %v3768_v48, %s4230_s18 }
  0xf6   : > { %v537_v51 = vadd.f32 %v4455_v3, %v536_v49 }
  0xf8   : > { %vm609_vm10 = vcmp.gt.f32.partialorder %v537_v51, 0.0  ;;  %v641_v52 = vmul.f32 0.1, %v537_v51 }
  0xfa   : > { %v673_v56 = vsel %vm609_vm10, %v537_v51, %v641_v52  ;;  %v2592_v57 = vld [vmem:[#allocation2 + $0x31] sm:$0xff]  ;;  %v427_v51 = vpack.c.bf16 %v409_v43, %v408_v42 }
  0xfb   : > { %706 = vst.msk [vmem:[#allocation2 + $0x40] sm:$0xff] %vm700_vm4, %v673_v56  ;;  %v2624_v59 = vsel %vm4464_vm6, %v2592_v57, 0.0  ;;  %v2561_v7 = vld [vmem:[#allocation2 + $0x38] sm:$0xff]  ;;  %v1475_v16 = vsel %vm4511_vm13, %v2592_v57, 0.0  ;;  %v1891_v30 = vsel %vm4497_vm11, %v2592_v57, 0.0  ;;  %v3691_v56 = vld [vmem:[%s4324_s30 + $0x28] sm:$0xff] }
  0xfc   : > { %v3783_v60 = vpack.i.bf16 %v2624_v59, %v2591_v58  ;;  %v3808_v23 = vpack.i.bf16 %v1475_v16, %v2591_v58  ;;  %v3803_v34 = vpack.i.bf16 %v1891_v30, %v2591_v58  ;;  %2408 = vmatpush.bf16.msra.mxu2 %v3691_v56  ;;  %v413_v42 = vld [vmem:[%s4319_s19 + $0xf8] sm:$0xff] }
  0xfd   : > { %v539_v62 = vpop.f32.mrf.mxu0  ;;  %3774 = vrot.lane.b32.xlu1 %v3768_v48, %s4230_s18 }
  0xfe   : > { %v540_v0 = vadd.f32 %v4455_v3, %v539_v62  ;;  %3784 = vrot.lane.b32.xlu2 %v3783_v60, %s4231_s25  ;;  %v833_v62 = vand.u32 15, %v743_v55  ;;  %v3703_v55 = vld [vmem:[%s4324_s30 + $0x88] sm:$0xff] }
  0xff   : > { %3089 = vmatpush.bf16.msra.mxu3 %v3703_v55 }
 0x100   : > { %vm610_vm12 = vcmp.gt.f32.partialorder %v540_v0, 0.0  ;;  %v642_v2 = vmul.f32 0.1, %v540_v0  ;;  %3552 = vmatmul.msk.bf16.gmra.mxu0 %vm466_vm2, %v425_v61  ;;  %2409 = vmatpush.bf16.msra.mxu2 %v3690_v63  ;;  %vm4562_vm5 = vcmp.lt.s32.totalorder %v833_v62, 15  ;;  %v3692_v62 = vld [vmem:[%s4324_s30 + $0x30] sm:$0xff] }
 0x102   : > { %v674_v6 = vsel %vm610_vm12, %v540_v0, %v642_v2  ;;  %v2562_v8 = vld [vmem:[#allocation2 + $0x40] sm:$0xff] }
 0x103   : > { %707 = vst.msk [vmem:[#allocation2 + $0x48] sm:$0xff] %vm700_vm4, %v674_v6  ;;  %v3793_v11 = vpack.i.bf16 %v2562_v8, %v2561_v7  ;;  %v2593_v21 = vld [vmem:[#allocation2 + $0x39] sm:$0xff]  ;;  %v3750_v6 = vpop.permute.xlu0 %3749 }
 0x104   : > { %v3689_v7 = vld [vmem:[%s4324_s30 + $0x18] sm:$0xff] }
 0x105   : > { %v541_v12 = vpop.f32.mrf.mxu0  ;;  %3779 = vrot.lane.b32.xlu1 %v3778_v10, %s4231_s25  ;;  %2410 = vmatpush.bf16.msra.mxu2 %v3689_v7  ;;  %v410_v10 = vld [vmem:[%s4319_s19 + $0xe0] sm:$0xff] }
 0x106   : > { %v542_v13 = vadd.f32 %v4455_v3, %v541_v12  ;;  %3794 = vrot.lane.b32.xlu2 %v3793_v11, %s4230_s18 }
 0x108   : > { %vm611_vm14 = vcmp.gt.f32.partialorder %v542_v13, 0.0  ;;  %v643_v15 = vmul.f32 0.1, %v542_v13 }
 0x109   : > { %2411 = vmatpush.bf16.msra.mxu2 %v3688_v14 }
 0x10a   : > { %v675_v19 = vsel %vm611_vm14, %v542_v13, %v643_v15  ;;  %v2594_v20 = vld [vmem:[#allocation2 + $0x41] sm:$0xff] }
 0x10b   : > { %708 = vst.msk [vmem:[#allocation2 + $0x50] sm:$0xff] %vm700_vm4, %v675_v19  ;;  %v2626_v22 = vsel %vm4497_vm11, %v2594_v20, 0.0  ;;  %v1414_v32 = vld [vmem:[#allocation2 + $0x48] sm:$0xff]  ;;  %v1893_v41 = vsel %vm4511_vm13, %v2594_v20, 0.0  ;;  %v1477_v46 = vsel %vm4535_vm0, %v2594_v20, 0.0 }
 0x10c   : > { %v3798_v24 = vpack.i.bf16 %v2626_v22, %v2593_v21  ;;  %v3828_v49 = vpack.i.bf16 %v1893_v41, %v2593_v21  ;;  %v3833_v53 = vpack.i.bf16 %v1477_v46, %v2593_v21  ;;  %v745_v22 = vadd.s32 88, %v4457_v5  ;;  %v412_v41 = vld [vmem:[%s4319_s19 + $0xf0] sm:$0xff] }
 0x10d   : > { %v544_v26 = vpop.f32.mrf.mxu0  ;;  %3789 = vrot.lane.b32.xlu1 %v3793_v11, %s4230_s18  ;;  %v411_v11 = vld [vmem:[%s4319_s19 + $0xe8] sm:$0xff] }
 0x10e   : > { %v545_v27 = vadd.f32 %v4455_v3, %v544_v26  ;;  %3809 = vrot.lane.b32.xlu2 %v3808_v23, %s4231_s25  ;;  %3799 = vrot.lane.b32.xlu0 %v3798_v24, %s4231_s25  ;;  %v428_v19 = vpack.c.bf16 %v411_v11, %v410_v10  ;;  %v3697_v23 = vld [vmem:[%s4324_s30 + $0x58] sm:$0xff]  ;;  %v3687_v24 = vld [vmem:[%s4324_s30 + $0x8] sm:$0xff]  ;;  %v847_v30 = vand.u32 15, %v745_v22 }
 0x10f   : > { %2235 = vmatpush.bf16.msra.mxu1 %v3697_v23  ;;  %2412 = vmatpush.bf16.msra.mxu2 %v3687_v24  ;;  %v1343_v23 = vld [vmem:[#allocation2 + $0xf] sm:$0xff] }
 0x110   : > { %vm612_vm15 = vcmp.gt.f32.partialorder %v545_v27, 0.0  ;;  %v644_v29 = vmul.f32 0.1, %v545_v27  ;;  %3553 = vmatmul.msk.bf16.gmra.mxu0 %vm466_vm2, %v426_v25  ;;  %vm4592_vm8 = vcmp.lt.s32.totalorder %v847_v30, 15 }
 0x112   : > { %v676_v31 = vsel %vm612_vm15, %v545_v27, %v644_v29  ;;  %v1415_v33 = vld [vmem:[#allocation2 + $0x50] sm:$0xff]  ;;  %vm2184_vm15 = vcmask 785408  }
 0x113   : > { %709 = vst.msk [vmem:[#allocation2 + $0x58] sm:$0xff] %vm700_vm4, %v676_v31  ;;  %v3813_v35 = vpack.i.bf16 %v1415_v33, %v1414_v32  ;;  %v2595_v47 = vld [vmem:[#allocation2 + $0x49] sm:$0xff]  ;;  %v3686_v33 = vld [vmem:[%s4324_s30] sm:$0xff] }
 0x114   : > { %v3696_v31 = vld [vmem:[%s4324_s30 + $0x50] sm:$0xff]  ;;  %2413 = vmatpush.bf16.msra.mxu2 %v3686_v33 }
 0x115   : > { %v546_v37 = vpop.f32.mrf.mxu0  ;;  %3804 = vrot.lane.b32.xlu1 %v3803_v34, %s4231_s25  ;;  %2236 = vmatpush.bf16.msra.mxu1 %v3696_v31 }
 0x116   : > { %v547_v38 = vadd.f32 %v4455_v3, %v546_v37  ;;  %3814 = vrot.lane.b32.xlu2 %v3813_v35, %s4230_s18  ;;  %3819 = vrot.lane.b32.xlu0 %v3813_v35, %s4230_s18 }
 0x118   : > { %vm613_vm1 = vcmp.gt.f32.partialorder %v547_v38, 0.0  ;;  %v645_v40 = vmul.f32 0.1, %v547_v38 }
 0x11a   : > { %v677_v44 = vsel %vm613_vm1, %v547_v38, %v645_v40  ;;  %v2596_v45 = vld [vmem:[#allocation2 + $0x51] sm:$0xff]  ;;  %v3695_v38 = vld [vmem:[%s4324_s30 + $0x48] sm:$0xff] }
 0x11b   : > { %710 = vst.msk [vmem:[#allocation2 + $0x60] sm:$0xff] %vm700_vm4, %v677_v44  ;;  %v2628_v48 = vsel %vm4511_vm13, %v2596_v45, 0.0  ;;  %v1416_v59 = vld [vmem:[#allocation2 + $0x58] sm:$0xff]  ;;  %v1895_v61 = vsel %vm4535_vm0, %v2596_v45, 0.0  ;;  %v1479_v9 = vsel %vm4562_vm5, %v2596_v45, 0.0  ;;  %2237 = vmatpush.bf16.msra.mxu1 %v3695_v38  ;;  %v3694_v45 = vld [vmem:[%s4324_s30 + $0x40] sm:$0xff] }
 0x11c   : > { %v3823_v50 = vpack.i.bf16 %v2628_v48, %v2595_v47  ;;  %v3853_v2 = vpack.i.bf16 %v1895_v61, %v2595_v47  ;;  %v3858_v18 = vpack.i.bf16 %v1479_v9, %v2595_v47  ;;  %v770_v9 = vand.u32 15, %v4457_v5 }
 0x11d   : > { %v549_v52 = vpop.f32.mrf.mxu0 }
 0x11e   : > { %v550_v54 = vadd.f32 %v4455_v3, %v549_v52  ;;  %3829 = vrot.lane.b32.xlu2 %v3828_v49, %s4231_s25  ;;  %3824 = vrot.lane.b32.xlu1 %v3823_v50, %s4231_s25  ;;  %v429_v50 = vpack.c.bf16 %v413_v42, %v412_v41  ;;  %vm4631_vm13 = vcmp.gt.s32.totalorder %v770_v9, 0  ;;  %v1345_v9 = vld [vmem:[#allocation2 + $0x1f] sm:$0xff] }
 0x11f   : > { %3834 = vrot.lane.b32.xlu0 %v3833_v53, %s4231_s25  ;;  %2238 = vmatpush.bf16.msra.mxu1 %v3694_v45  ;;  %v747_v53 = vadd.s32 104, %v4457_v5 }
 0x120   : > { %vm614_vm3 = vcmp.gt.f32.partialorder %v550_v54, 0.0  ;;  %v646_v57 = vmul.f32 0.1, %v550_v54  ;;  %3554 = vmatmul.msk.bf16.gmra.mxu0 %vm466_vm2, %v427_v51 }
 0x121   : > { %v861_v61 = vand.u32 15, %v747_v53 }
 0x122   : > { %v678_v58 = vsel %vm614_vm3, %v550_v54, %v646_v57  ;;  %v1417_v60 = vld [vmem:[#allocation2 + $0x60] sm:$0xff]  ;;  %v3693_v54 = vld [vmem:[%s4324_s30 + $0x38] sm:$0xff] }
 0x123   : > { %711 = vst.msk [vmem:[#allocation2 + $0x68] sm:$0xff] %vm700_vm4, %v678_v58  ;;  %v3838_v0 = vpack.i.bf16 %v1417_v60, %v1416_v59  ;;  %v2597_v15 = vld [vmem:[#allocation2 + $0x59] sm:$0xff]  ;;  %2239 = vmatpush.bf16.msra.mxu1 %v3693_v54  ;;  %vm4621_vm11 = vcmp.lt.s32.totalorder %v861_v61, 15 }
 0x125   : > { %v551_v1 = vpop.f32.mrf.mxu0 }
 0x126   : > { %v552_v4 = vadd.f32 %v4455_v3, %v551_v1  ;;  %3839 = vrot.lane.b32.xlu2 %v3838_v0, %s4230_s18  ;;  %3844 = vrot.lane.b32.xlu1 %v3838_v0, %s4230_s18  ;;  %v3702_v0 = vld [vmem:[%s4324_s30 + $0x80] sm:$0xff] }
 0x127   : > { %3854 = vrot.lane.b32.xlu0 %v3853_v2, %s4231_s25  ;;  %2240 = vmatpush.bf16.msra.mxu1 %v3692_v62  ;;  %v751_v62 = vadd.s32 136, %v4457_v5 }
 0x128   : > { %vm615_vm6 = vcmp.gt.f32.partialorder %v552_v4, 0.0  ;;  %v647_v8 = vmul.f32 0.1, %v552_v4  ;;  %3090 = vmatpush.bf16.msra.mxu3 %v3702_v0 }
 0x12a   : > { %v679_v12 = vsel %vm615_vm6, %v552_v4, %v647_v8  ;;  %v2598_v13 = vld [vmem:[#allocation2 + $0x61] sm:$0xff]  ;;  %v3701_v8 = vld [vmem:[%s4324_s30 + $0x78] sm:$0xff] }
 0x12b   : > { %712 = vst.msk [vmem:[#allocation2 + $0x70] sm:$0xff] %vm700_vm4, %v679_v12  ;;  %v2630_v16 = vsel %vm4535_vm0, %v2598_v13, 0.0  ;;  %v1897_v26 = vsel %vm4562_vm5, %v2598_v13, 0.0  ;;  %v1418_v28 = vld [vmem:[#allocation2 + $0x68] sm:$0xff]  ;;  %v1481_v40 = vsel %vm4592_vm8, %v2598_v13, 0.0 }
 0x12c   : > { %v3848_v17 = vpack.i.bf16 %v2630_v16, %v2597_v15  ;;  %v3878_v34 = vpack.i.bf16 %v1897_v26, %v2597_v15  ;;  %v3883_v48 = vpack.i.bf16 %v1481_v40, %v2597_v15  ;;  %3091 = vmatpush.bf16.msra.mxu3 %v3701_v8  ;;  %v1342_v13 = vld [vmem:[#allocation2 + $0x7] sm:$0xff]  ;;  %v3700_v15 = vld [vmem:[%s4324_s30 + $0x70] sm:$0xff] }
 0x12d   : > { %v554_v20 = vpop.f32.mrf.mxu0  ;;  %v1374_v24 = vsel %vm4631_vm13, %v1342_v13, 0.0 }
 0x12e   : > { %v555_v21 = vadd.f32 %v4455_v3, %v554_v20  ;;  %3849 = vrot.lane.b32.xlu2 %v3848_v17, %s4231_s25  ;;  %3859 = vrot.lane.b32.xlu1 %v3858_v18, %s4231_s25  ;;  %v3751_v20 = vunpack.i.l.bf16 %v3750_v6 }
 0x130   : > { %vm616_vm7 = vcmp.gt.f32.partialorder %v555_v21, 0.0  ;;  %v648_v25 = vmul.f32 0.1, %v555_v21  ;;  %3555 = vmatmul.msk.bf16.gmra.mxu0 %vm466_vm2, %v428_v19  ;;  %v3752_v19 = vunpack.i.h.bf16 %v3750_v6  ;;  %3092 = vmatpush.bf16.msra.mxu3 %v3700_v15 }
 0x132   : > { %v680_v27 = vsel %vm616_vm7, %v555_v21, %v648_v25  ;;  %v1419_v29 = vld [vmem:[#allocation2 + $0x70] sm:$0xff]  ;;  %v1759_v30 = vsel %vm700_vm4, %v1343_v23, %v3752_v19 }
 0x133   : > { %713 = vst.msk [vmem:[#allocation2 + $0x78] sm:$0xff] %vm700_vm4, %v680_v27  ;;  %v3863_v32 = vpack.i.bf16 %v1419_v29, %v1418_v28  ;;  %v2599_v46 = vld [vmem:[#allocation2 + $0x69] sm:$0xff]  ;;  %v749_v27 = vadd.s32 120, %v4457_v5  ;;  %v1758_v29 = vsel %vm700_vm4, %v1374_v24, %v3751_v20 }
 0x134   : > { %v3699_v28 = vld [vmem:[%s4324_s30 + $0x68] sm:$0xff] }
 0x135   : > { %v556_v35 = vpop.f32.mrf.mxu0  ;;  %3864 = vrot.lane.b32.xlu0 %v3863_v32, %s4230_s18  ;;  %3093 = vmatpush.bf16.msra.mxu3 %v3699_v28 }
 0x136   : > { %v557_v36 = vadd.f32 %v4455_v3, %v556_v35  ;;  %3869 = vrot.lane.b32.xlu2 %v3863_v32, %s4230_s18  ;;  %3879 = vrot.lane.b32.xlu1 %v3878_v34, %s4231_s25 }
 0x138   : > { %vm617_vm9 = vcmp.gt.f32.partialorder %v557_v36, 0.0  ;;  %v649_v39 = vmul.f32 0.1, %v557_v36 }
 0x13a   : > { %v681_v43 = vsel %vm617_vm9, %v557_v36, %v649_v39  ;;  %v2600_v44 = vld [vmem:[#allocation2 + $0x71] sm:$0xff]  ;;  %v875_v39 = vand.u32 15, %v749_v27 }
 0x13b   : > { %714 = vst.msk [vmem:[#allocation2 + $0x80] sm:$0xff] %vm700_vm4, %v681_v43  ;;  %v2632_v47 = vsel %vm4562_vm5, %v2600_v44, 0.0  ;;  %v1899_v57 = vsel %vm4592_vm8, %v2600_v44, 0.0  ;;  %v1420_v59 = vld [vmem:[#allocation2 + $0x78] sm:$0xff]  ;;  %v1483_v11 = vsel %vm4621_vm11, %v2600_v44, 0.0  ;;  %v3698_v43 = vld [vmem:[%s4324_s30 + $0x60] sm:$0xff] }
 0x13c   : > { %v3873_v49 = vpack.i.bf16 %v2632_v47, %v2599_v46  ;;  %v3903_v1 = vpack.i.bf16 %v1899_v57, %v2599_v46  ;;  %v3908_v22 = vpack.i.bf16 %v1483_v11, %v2599_v46  ;;  %3094 = vmatpush.bf16.msra.mxu3 %v3698_v43  ;;  %vm4656_vm0 = vcmp.lt.s32.totalorder %v875_v39, 15 }
 0x13d   : > { %v559_v51 = vpop.f32.mrf.mxu0 }
 0x13e   : > { %v560_v52 = vadd.f32 %v4455_v3, %v559_v51  ;;  %3884 = vrot.lane.b32.xlu2 %v3883_v48, %s4231_s25  ;;  %3874 = vrot.lane.b32.xlu0 %v3873_v49, %s4231_s25 }
 0x140   : > { %vm618_vm10 = vcmp.gt.f32.partialorder %v560_v52, 0.0  ;;  %v650_v56 = vmul.f32 0.1, %v560_v52  ;;  %3556 = vmatmul.msk.bf16.gmra.mxu0 %vm466_vm2, %v429_v50 }
 0x142   : > { %v682_v58 = vsel %vm618_vm10, %v560_v52, %v650_v56  ;;  %v1421_v60 = vld [vmem:[#allocation2 + $0x80] sm:$0xff] }
 0x143   : > { %715 = vst.msk [vmem:[#allocation2 + $0x88] sm:$0xff] %vm700_vm4, %v682_v58  ;;  %v3888_v63 = vpack.i.bf16 %v1421_v60, %v1420_v59  ;;  %v2601_v17 = vld [vmem:[#allocation2 + $0x79] sm:$0xff] }
 0x144   : > { %v4669_v60 = vld [vmem:[#allocation2 + $0x17] sm:$0xff] }
 0x145   : > { %v561_v2 = vpop.f32.mrf.mxu0  ;;  %3889 = vrot.lane.b32.xlu1 %v3888_v63, %s4230_s18 }
 0x146   : > { %v562_v4 = vadd.f32 %v4455_v3, %v561_v2  ;;  %3904 = vrot.lane.b32.xlu2 %v3903_v1, %s4231_s25  ;;  %3894 = vrot.lane.b32.xlu0 %v3888_v63, %s4230_s18 }
 0x148   : > { %vm619_vm12 = vcmp.gt.f32.partialorder %v562_v4, 0.0  ;;  %v651_v10 = vmul.f32 0.1, %v562_v4 }
 0x14a   : > { %v683_v12 = vsel %vm619_vm12, %v562_v4, %v651_v10  ;;  %v2602_v14 = vld [vmem:[#allocation2 + $0x81] sm:$0xff]  ;;  %v1852_v4 = vsel %vm4631_vm13, %v4669_v60, 0.0 }
 0x14b   : > { %716 = vst.msk [vmem:[#allocation2 + $0x90] sm:$0xff] %vm700_vm4, %v683_v12  ;;  %v2634_v18 = vsel %vm4592_vm8, %v2602_v14, 0.0  ;;  %v1422_v36 = vld [vmem:[#allocation2 + $0x88] sm:$0xff]  ;;  %v1901_v38 = vsel %vm4621_vm11, %v2602_v14, 0.0  ;;  %v1485_v51 = vsel %vm4656_vm0, %v2602_v14, 0.0  ;;  %v889_v14 = vand.u32 15, %v751_v62 }
 0x14c   : > { %v3898_v21 = vpack.i.bf16 %v2634_v18, %v2601_v17  ;;  %v3928_v46 = vpack.i.bf16 %v1901_v38, %v2601_v17  ;;  %v3933_v57 = vpack.i.bf16 %v1485_v51, %v2601_v17 }
 0x14d   : > { %v564_v25 = vpop.f32.mrf.mxu0  ;;  %vm4694_vm5 = vcmp.lt.s32.totalorder %v889_v14, 15 }
 0x14e   : > { %v565_v26 = vadd.f32 %v4455_v3, %v564_v25  ;;  %3899 = vrot.lane.b32.xlu1 %v3898_v21, %s4231_s25  ;;  %3909 = vrot.lane.b32.xlu0 %v3908_v22, %s4231_s25 }
 0x150   : > { %vm620_vm14 = vcmp.gt.f32.partialorder %v565_v26, 0.0  ;;  %v652_v31 = vmul.f32 0.1, %v565_v26  ;;  %v3755_v32 = vpop.permute.xlu0 %3754 }
 0x151   : > { %v3757_v33 = vunpack.i.h.bf16 %v3755_v32  ;;  %v3756_v34 = vunpack.i.l.bf16 %v3755_v32 }
 0x152   : > { %v684_v35 = vsel %vm620_vm14, %v565_v26, %v652_v31  ;;  %v1423_v37 = vld [vmem:[#allocation2 + $0x90] sm:$0xff] }
 0x153   : > { %717 = vst.msk [vmem:[#allocation2 + $0x98] sm:$0xff] %vm700_vm4, %v684_v35  ;;  %v3913_v40 = vpack.i.bf16 %v1423_v37, %v1422_v36  ;;  %v1790_v41 = vsel %vm466_vm2, %v1758_v29, %v3756_v34  ;;  %v1791_v42 = vsel %vm466_vm2, %v1759_v30, %v3757_v33  ;;  %v2603_v54 = vld [vmem:[#allocation2 + $0x89] sm:$0xff]  ;;  %v736_v30 = vadd.s32 16, %v4457_v5 }
 0x154   : > { %v1822_v44 = vpack.c.bf16 %v1791_v42, %v1790_v41  ;;  %v4715_v37 = vld [vmem:[#allocation2 + $0x27] sm:$0xff] }
 0x155   : > { %v566_v45 = vpop.f32.mrf.mxu0  ;;  %3914 = vrot.lane.b32.xlu2 %v3913_v40, %s4230_s18  ;;  %v784_v39 = vand.u32 15, %v736_v30 }
 0x156   : > { %v567_v47 = vadd.f32 %v4455_v3, %v566_v45  ;;  %3919 = vrot.lane.b32.xlu1 %v3913_v40, %s4230_s18  ;;  %3621 = vmatmul.msk.bf16.vlgmr.msra.gmra.mxu2 %vm2184_vm15, %v1822_v44  ;;  %v4720_v45 = vld [vmem:[#allocation2 + $0x2f] sm:$0xff] }
 0x157   : > { %3929 = vrot.lane.b32.xlu0 %v3928_v46, %s4231_s25  ;;  %v2527_v46 = vsel %vm4631_vm13, %v4715_v37, 0.0  ;;  %vm4730_vm8 = vcmp.gt.s32.totalorder %v784_v39, 0 }
 0x158   : > { %vm621_vm1 = vcmp.gt.f32.partialorder %v567_v47, 0.0  ;;  %v653_v49 = vmul.f32 0.1, %v567_v47  ;;  %v4661_v50 = vpop.permute.xlu0 %3759  ;;  %v3785_v2 = vpop.permute.xlu2 %3784 }
 0x159   : > { %v3761_v59 = vunpack.i.l.bf16 %v4661_v50  ;;  %v3762_v63 = vunpack.i.h.bf16 %v4661_v50  ;;  %v3786_v44 = vunpack.i.l.bf16 %v3785_v2 }
 0x15a   : > { %v685_v52 = vsel %vm621_vm1, %v567_v47, %v653_v49  ;;  %v2604_v53 = vld [vmem:[#allocation2 + $0x91] sm:$0xff]  ;;  %v3787_v47 = vunpack.i.h.bf16 %v3785_v2 }
 0x15b   : > { %718 = vst.msk [vmem:[#allocation2 + $0xa0] sm:$0xff] %vm700_vm4, %v685_v52  ;;  %v2636_v55 = vsel %vm4621_vm11, %v2604_v53, 0.0  ;;  %v1903_v8 = vsel %vm4656_vm0, %v2604_v53, 0.0  ;;  %v2056_v10 = vsel %vm700_vm4, %v1852_v4, %v3761_v59  ;;  %v2573_v12 = vld [vmem:[#allocation2 + $0x98] sm:$0xff]  ;;  %v4685_v15 = vsel %vm700_vm4, %v1345_v9, %v3762_v63 }
 0x15c   : > { %v3923_v56 = vpack.i.bf16 %v2636_v55, %v2603_v54  ;;  %v3948_v19 = vpack.i.bf16 %v1903_v8, %v2603_v54  ;;  %v1487_v27 = vsel %vm4694_vm5, %v2604_v53, 0.0  ;;  %v753_v63 = vadd.s32 152, %v4457_v5 }
 0x15d   : > { %v569_v58 = vpop.f32.mrf.mxu0  ;;  %v3953_v34 = vpack.i.bf16 %v1487_v27, %v2603_v54  ;;  %v738_v8 = vadd.s32 32, %v4457_v5 }
 0x15e   : > { %v570_v61 = vadd.f32 %v4455_v3, %v569_v58  ;;  %3924 = vrot.lane.b32.xlu2 %v3923_v56, %s4231_s25  ;;  %3934 = vrot.lane.b32.xlu1 %v3933_v57, %s4231_s25 }
 0x160   : > { %vm622_vm3 = vcmp.gt.f32.partialorder %v570_v61, 0.0  ;;  %v654_v0 = vmul.f32 0.1, %v570_v61  ;;  %v3765_v1 = vpop.permute.xlu0 %3764  ;;  %v4706_v31 = vpop.permute.xlu2 %3794 }
 0x161   : > { %v3767_v6 = vunpack.i.h.bf16 %v3765_v1  ;;  %v3766_v7 = vunpack.i.l.bf16 %v3765_v1  ;;  %v3796_v24 = vunpack.i.l.bf16 %v4706_v31 }
 0x162   : > { %v686_v11 = vsel %vm622_vm3, %v570_v61, %v654_v0  ;;  %v2574_v13 = vld [vmem:[#allocation2 + $0xa0] sm:$0xff]  ;;  %v1376_v0 = vsel %vm4730_vm8, %v4669_v60, 0.0 }
 0x163   : > { %719 = vst.msk [vmem:[#allocation2 + $0xa8] sm:$0xff] %vm700_vm4, %v686_v11  ;;  %v3938_v17 = vpack.i.bf16 %v2574_v13, %v2573_v12  ;;  %v2088_v18 = vsel %vm466_vm2, %v2056_v10, %v3766_v7  ;;  %v2089_v20 = vsel %vm466_vm2, %v4685_v15, %v3767_v6  ;;  %v4709_v32 = vld [vmem:[#allocation2 + $0x99] sm:$0xff]  ;;  %v1760_v7 = vsel %vm700_vm4, %v1376_v0, %v3761_v59 }
 0x164   : > { %v2120_v22 = vpack.c.bf16 %v2089_v20, %v2088_v18  ;;  %v903_v13 = vand.u32 15, %v753_v63 }
 0x165   : > { %v571_v21 = vpop.f32.mrf.mxu0 }
 0x166   : > { %v572_v23 = vadd.f32 %v4455_v3, %v571_v21  ;;  %3939 = vrot.lane.b32.xlu2 %v3938_v17, %s4230_s18  ;;  %3949 = vrot.lane.b32.xlu1 %v3948_v19, %s4231_s25  ;;  %v798_v19 = vand.u32 15, %v738_v8  ;;  %vm4772_vm10 = vcmp.lt.s32.totalorder %v903_v13, 15 }
 0x167   : > { %3581 = vmatmul.msk.bf16.vlgmr.msra.gmra.mxu1 %vm2184_vm15, %v2120_v22  ;;  %v4699_v25 = vpop.permute.xlu1 %3769  ;;  %v4776_v22 = vld [vmem:[#allocation2 + $0x37] sm:$0xff] }
 0x168   : > { %vm623_vm6 = vcmp.gt.f32.partialorder %v572_v23, 0.0  ;;  %v655_v26 = vmul.f32 0.1, %v572_v23  ;;  %v4737_v57 = vpop.permute.xlu2 %3809  ;;  %vm4784_vm12 = vcmp.gt.s32.totalorder %v798_v19, 0  ;;  %v3772_v39 = vunpack.i.h.bf16 %v4699_v25 }
 0x16a   : > { %v687_v28 = vsel %vm623_vm6, %v572_v23, %v655_v26  ;;  %v4703_v29 = vld [vmem:[#allocation2 + $0xa1] sm:$0xff]  ;;  %v3797_v23 = vunpack.i.h.bf16 %v4706_v31  ;;  %v2529_v31 = vsel %vm4730_vm8, %v4776_v22, 0.0 }
 0x16b   : > { %720 = vst.msk [vmem:[#allocation2 + $0xb0] sm:$0xff] %vm700_vm4, %v687_v28  ;;  %v2638_v33 = vsel %vm4656_vm0, %v4703_v29, 0.0  ;;  %v2575_v54 = vld [vmem:[#allocation2 + $0xa8] sm:$0xff]  ;;  %v1905_v9 = vsel %vm4694_vm5, %v4703_v29, 0.0 }
 0x16c   : > { %v3943_v35 = vpack.i.bf16 %v2638_v33, %v4709_v32  ;;  %v3973_v18 = vpack.i.bf16 %v1905_v9, %v4709_v32 }
 0x16d   : > { %v574_v36 = vpop.f32.mrf.mxu0 }
 0x16e   : > { %v575_v38 = vadd.f32 %v4455_v3, %v574_v36  ;;  %3954 = vrot.lane.b32.xlu2 %v3953_v34, %s4231_s25  ;;  %3944 = vrot.lane.b32.xlu0 %v3943_v35, %s4231_s25  ;;  %v1489_v36 = vsel %vm4772_vm10, %v4703_v29, 0.0 }
 0x16f   : > { %v3775_v40 = vpop.permute.xlu1 %3774 }
 0x170   : > { %vm624_vm7 = vcmp.gt.f32.partialorder %v575_v38, 0.0  ;;  %v656_v41 = vmul.f32 0.1, %v575_v38  ;;  %v3777_v42 = vunpack.i.h.bf16 %v3775_v40  ;;  %v3776_v43 = vunpack.i.l.bf16 %v3775_v40  ;;  %v4780_v26 = vpop.permute.xlu2 %3814 }
 0x171   : > { %v3771_v40 = vunpack.i.l.bf16 %v4699_v25  ;;  %v1378_v25 = vsel %vm4784_vm12, %v4715_v37, 0.0 }
 0x172   : > { %v688_v48 = vsel %vm624_vm7, %v575_v38, %v656_v41  ;;  %v2912_v49 = vsel %vm700_vm4, %v4720_v45, %v3777_v42  ;;  %v2911_v51 = vsel %vm700_vm4, %v2527_v46, %v3776_v43  ;;  %v2576_v52 = vld [vmem:[#allocation2 + $0xb0] sm:$0xff]  ;;  %v4791_v38 = vld [vmem:[#allocation2 + $0x3f] sm:$0xff]  ;;  %v2913_v46 = vsel %vm700_vm4, %v2529_v31, %v3796_v24 }
 0x173   : > { %721 = vst.msk [vmem:[#allocation2 + $0xb8] sm:$0xff] %vm700_vm4, %v688_v48  ;;  %v2943_v53 = vsel %vm466_vm2, %v2911_v51, %v3786_v44  ;;  %v2944_v16 = vsel %vm466_vm2, %v2912_v49, %v3787_v47  ;;  %v4735_v56 = vpack.i.bf16 %v2576_v52, %v2575_v54  ;;  %v4761_v14 = vld [vmem:[#allocation2 + $0xa9] sm:$0xff]  ;;  %v2914_v44 = vsel %vm700_vm4, %v4791_v38, %v3797_v23  ;;  %v4850_v24 = vld [vmem:[%s4309_s11] ss:$0 sm:$0xff] }
 0x174   : > { %v2975_v61 = vpack.c.bf16 %v2944_v16, %v2943_v53  ;;  %v3978_v47 = vpack.i.bf16 %v1489_v36, %v4709_v32  ;;  %v3812_v51 = vunpack.i.h.bf16 %v4737_v57  ;;  %v3811_v52 = vunpack.i.l.bf16 %v4737_v57 }
 0x175   : > { %v576_v58 = vpop.f32.mrf.mxu0  ;;  %v1762_v16 = vsel %vm700_vm4, %v1378_v25, %v3771_v40  ;;  %v1763_v32 = vsel %vm700_vm4, %v4720_v45, %v3772_v39  ;;  %v1854_v57 = vsel %vm4730_vm8, %v4715_v37, 0.0 }
 0x176   : > { %v577_v62 = vadd.f32 %v4455_v3, %v576_v58  ;;  %3969 = vrot.lane.b32.xlu2 %v3938_v17, %s4230_s18  ;;  %3959 = vrot.lane.b32.xlu0 %v4735_v56, %s4230_s18  ;;  %v1794_v37 = vsel %vm466_vm2, %v1762_v16, %v3811_v52  ;;  %v1795_v55 = vsel %vm466_vm2, %v1763_v32, %v3812_v51 }
 0x177   : > { %3661 = vmatmul.msk.bf16.vlgmr.msra.gmra.mxu3 %vm2184_vm15, %v2975_v61  ;;  %v3780_v1 = vpop.permute.xlu1 %3779  ;;  %v755_v61 = vadd.s32 168, %v4457_v5 }
 0x178   : > { %vm625_vm9 = vcmp.gt.f32.partialorder %v577_v62, 0.0  ;;  %v657_v2 = vmul.f32 0.1, %v577_v62  ;;  %v3782_v4 = vunpack.i.h.bf16 %v3780_v1  ;;  %v3781_v6 = vunpack.i.l.bf16 %v3780_v1 }
 0x17a   : > { %v689_v10 = vsel %vm625_vm9, %v577_v62, %v657_v2  ;;  %v1792_v60 = vsel %vm466_vm2, %v1760_v7, %v3781_v6  ;;  %v1793_v11 = vsel %vm466_vm2, %v4685_v15, %v3782_v4  ;;  %v4758_v12 = vld [vmem:[#allocation2 + $0xb1] sm:$0xff]  ;;  %v740_v62 = vadd.s32 48, %v4457_v5  ;;  %v4829_v6 = vpop.permute.xlu2 %3829 }
 0x17b   : > { %722 = vst.msk [vmem:[#allocation2 + $0xc0] sm:$0xff] %vm700_vm4, %v689_v10  ;;  %v1823_v50 = vpack.c.bf16 %v1793_v11, %v1792_v60  ;;  %v2640_v59 = vsel %vm4694_vm5, %v4758_v12, 0.0  ;;  %v2577_v42 = vld [vmem:[#allocation2 + $0xb8] sm:$0xff]  ;;  %v1907_v0 = vsel %vm4772_vm10, %v4758_v12, 0.0  ;;  %v2058_v4 = vsel %vm700_vm4, %v1854_v57, %v3771_v40 }
 0x17c   : > { %v3963_v17 = vpack.i.bf16 %v2640_v59, %v4761_v14  ;;  %v917_v60 = vand.u32 15, %v755_v61  ;;  %v812_v11 = vand.u32 15, %v740_v62  ;;  %v3998_v13 = vpack.i.bf16 %v1907_v0, %v4761_v14 }
 0x17d   : > { %v579_v20 = vpop.f32.mrf.mxu0  ;;  %3622 = vmatmul.msk.bf16.gmra.mxu2 %vm2184_vm15, %v1823_v50  ;;  %v3832_v0 = vunpack.i.h.bf16 %v4829_v6 }
 0x17e   : > { %v580_v15 = vadd.f32 %v4455_v3, %v579_v20  ;;  %3964 = vrot.lane.b32.xlu1 %v3963_v17, %s4231_s25  ;;  %3974 = vrot.lane.b32.xlu0 %v3973_v18, %s4231_s25  ;;  %v1824_v18 = vpack.c.bf16 %v1795_v55, %v1794_v37  ;;  %v4845_v20 = vld [vmem:[#allocation2 + $0x47] sm:$0xff]  ;;  %vm4856_vm14 = vcmp.lt.s32.totalorder %v917_v60, 15  ;;  %vm4860_vm0 = vcmp.gt.s32.totalorder %v812_v11, 0  ;;  %v4914_v60 = vld [vmem:[#allocation2 + $0x57] sm:$0xff] }
 0x17f   : > { %v4782_v27 = vpop.permute.xlu1 %3789  ;;  %v2531_v36 = vsel %vm4784_vm12, %v4845_v20, 0.0  ;;  %v1380_v25 = vsel %vm4860_vm0, %v4776_v22, 0.0  ;;  %v742_v37 = vadd.s32 64, %v4457_v5 }
 0x180   : > { %vm626_vm11 = vcmp.gt.f32.partialorder %v580_v15, 0.0  ;;  %v658_v28 = vmul.f32 0.1, %v580_v15  ;;  %v3800_v30 = vpop.permute.xlu0 %3799  ;;  %v3791_v39 = vunpack.i.l.bf16 %v4782_v27 }
 0x181   : > { %v3802_v34 = vunpack.i.h.bf16 %v3800_v30  ;;  %v3801_v35 = vunpack.i.l.bf16 %v3800_v30 }
 0x182   : > { %v690_v41 = vsel %vm626_vm11, %v580_v15, %v658_v28  ;;  %v2578_v43 = vld [vmem:[#allocation2 + $0xc0] sm:$0xff]  ;;  %v4879_v51 = vpop.permute.xlu2 %3839 }
 0x183   : > { %723 = vst.msk [vmem:[#allocation2 + $0xc8] sm:$0xff] %vm700_vm4, %v690_v41  ;;  %v4802_v29 = vpack.i.bf16 %v2578_v43, %v2577_v42  ;;  %v2945_v48 = vsel %vm466_vm2, %v2913_v46, %v3801_v35  ;;  %v2946_v49 = vsel %vm466_vm2, %v2914_v44, %v3802_v34  ;;  %v4839_v59 = vld [vmem:[#allocation2 + $0xb9] sm:$0xff]  ;;  %v3792_v35 = vunpack.i.h.bf16 %v4782_v27  ;;  %v4873_v43 = vld [vmem:[#allocation2 + $0x4f] sm:$0xff] }
 0x184   : > { %v2976_v54 = vpack.c.bf16 %v2946_v49, %v2945_v48  ;;  %v1491_v42 = vsel %vm4856_vm14, %v4758_v12, 0.0 }
 0x185   : > { %v581_v53 = vpop.f32.mrf.mxu0  ;;  %3984 = vrot.lane.b32.xlu2 %v4802_v29, %s4230_s18  ;;  %v4003_v16 = vpack.i.bf16 %v1491_v42, %v4761_v14  ;;  %v1764_v14 = vsel %vm700_vm4, %v1380_v25, %v3791_v39 }
 0x186   : > { %v582_v58 = vadd.f32 %v4455_v3, %v581_v53  ;;  %3979 = vrot.lane.b32.xlu1 %v3978_v47, %s4231_s25  ;;  %v1856_v53 = vsel %vm4784_vm12, %v4776_v22, 0.0  ;;  %v757_v22 = vadd.s32 184, %v4457_v5 }
 0x187   : > { %3662 = vmatmul.msk.bf16.gmra.mxu3 %vm2184_vm15, %v2976_v54  ;;  %v3805_v63 = vpop.permute.xlu1 %3804  ;;  %v1765_v54 = vsel %vm700_vm4, %v4791_v38, %v3792_v35  ;;  %v4925_v35 = vld [vmem:[#allocation2 + $0x5f] sm:$0xff] }
 0x188   : > { %vm627_vm13 = vcmp.gt.f32.partialorder %v582_v58, 0.0  ;;  %v659_v45 = vmul.f32 0.1, %v582_v58  ;;  %v3807_v3 = vunpack.i.h.bf16 %v3805_v63  ;;  %v3806_v1 = vunpack.i.l.bf16 %v3805_v63  ;;  %v3820_v2 = vpop.permute.xlu0 %3819 }
 0x189   : > { %v3821_v23 = vunpack.i.l.bf16 %v3820_v2  ;;  %v3822_v34 = vunpack.i.h.bf16 %v3820_v2  ;;  %v2093_v2 = vsel %vm466_vm2, %v1765_v54, %v3832_v0 }
 0x18a   : > { %v691_v7 = vsel %vm627_vm13, %v582_v58, %v659_v45  ;;  %v2090_v8 = vsel %vm466_vm2, %v2058_v4, %v3806_v1  ;;  %v2091_v9 = vsel %vm466_vm2, %v1763_v32, %v3807_v3  ;;  %v4835_v10 = vld [vmem:[#allocation2 + $0xc1] sm:$0xff]  ;;  %v2060_v58 = vsel %vm700_vm4, %v1856_v53, %v3791_v39 }
 0x18b   : > { %724 = vst.msk [vmem:[#allocation2 + $0xd0] sm:$0xff] %vm700_vm4, %v691_v7  ;;  %v2121_v50 = vpack.c.bf16 %v2091_v9, %v2090_v8  ;;  %v2642_v17 = vsel %vm4772_vm10, %v4835_v10, 0.0  ;;  %v2915_v44 = vsel %vm700_vm4, %v2531_v36, %v3821_v23  ;;  %v2579_v48 = vld [vmem:[#allocation2 + $0xc8] sm:$0xff]  ;;  %v2916_v27 = vsel %vm700_vm4, %v4873_v43, %v3822_v34  ;;  %v3850_v23 = vpop.permute.xlu2 %3849 }
 0x18c   : > { %v3988_v19 = vpack.i.bf16 %v2642_v17, %v4839_v59  ;;  %v3831_v45 = vunpack.i.l.bf16 %v4829_v6  ;;  %v1909_v8 = vsel %vm4856_vm14, %v4835_v10, 0.0  ;;  %v931_v9 = vand.u32 15, %v757_v22 }
 0x18d   : > { %v584_v15 = vpop.f32.mrf.mxu0  ;;  %3999 = vrot.lane.b32.xlu2 %v3998_v13, %s4231_s25  ;;  %3582 = vmatmul.msk.bf16.gmra.mxu1 %vm2184_vm15, %v2121_v50  ;;  %v4023_v34 = vpack.i.bf16 %v1909_v8, %v4839_v59  ;;  %v2533_v36 = vsel %vm4860_vm0, %v4914_v60, 0.0  ;;  %v3852_v42 = vunpack.i.h.bf16 %v3850_v23 }
 0x18e   : > { %v585_v28 = vadd.f32 %v4850_v24, %v584_v15  ;;  %3623 = vmatmul.msk.bf16.gmra.mxu2 %vm2184_vm15, %v1824_v18  ;;  %3994 = vrot.lane.b32.xlu1 %v4735_v56, %s4230_s18  ;;  %v2092_v1 = vsel %vm466_vm2, %v2060_v58, %v3831_v45  ;;  %vm4933_vm5 = vcmp.lt.s32.totalorder %v931_v9, 15 }
 0x18f   : > { %3989 = vrot.lane.b32.xlu0 %v3988_v19, %s4231_s25  ;;  %v2122_v50 = vpack.c.bf16 %v2093_v2, %v2092_v1 }
 0x190   : > { %vm628_vm1 = vcmp.gt.f32.partialorder %v585_v28, 0.0  ;;  %v660_v31 = vmul.f32 0.1, %v585_v28  ;;  %v3825_v56 = vpop.permute.xlu1 %3824 }
 0x191   : > { %v3827_v40 = vunpack.i.h.bf16 %v3825_v56  ;;  %v3826_v41 = vunpack.i.l.bf16 %v3825_v56  ;;  %v3835_v47 = vpop.permute.xlu0 %3834  ;;  %v826_v56 = vand.u32 15, %v742_v37 }
 0x192   : > { %v692_v46 = vsel %vm628_vm1, %v585_v28, %v660_v31  ;;  %v2580_v49 = vld [vmem:[#allocation2 + $0xd0] sm:$0xff]  ;;  %v3837_v61 = vunpack.i.h.bf16 %v3835_v47  ;;  %v3836_v57 = vunpack.i.l.bf16 %v3835_v47  ;;  %v1493_v47 = vsel %vm4933_vm5, %v4835_v10, 0.0 }
 0x193   : > { %725 = vst.msk [vmem:[#allocation2 + $0xd8] sm:$0xff] %vm700_vm4, %v692_v46  ;;  %v4884_v12 = vpack.i.bf16 %v2580_v49, %v2579_v48  ;;  %v2947_v52 = vsel %vm466_vm2, %v2915_v44, %v3826_v41  ;;  %v2948_v32 = vsel %vm466_vm2, %v2916_v27, %v3827_v40  ;;  %v4917_v17 = vld [vmem:[#allocation2 + $0xc9] sm:$0xff]  ;;  %v3851_v44 = vunpack.i.l.bf16 %v3850_v23 }
 0x194   : > { %v2977_v63 = vpack.c.bf16 %v2948_v32, %v2947_v52  ;;  %v1796_v4 = vsel %vm466_vm2, %v1764_v14, %v3836_v57  ;;  %v1797_v6 = vsel %vm466_vm2, %v1765_v54, %v3837_v61  ;;  %vm4948_vm7 = vcmp.gt.s32.totalorder %v826_v56, 0 }
 0x195   : > { %v586_v62 = vpop.f32.mrf.mxu0  ;;  %v1825_v19 = vpack.c.bf16 %v1797_v6, %v1796_v4  ;;  %v4028_v61 = vpack.i.bf16 %v1493_v47, %v4839_v59  ;;  %v1382_v45 = vsel %vm4948_vm7, %v4845_v20, 0.0 }
 0x196   : > { %v587_v33 = vadd.f32 %v4850_v24, %v586_v62  ;;  %4009 = vrot.lane.b32.xlu1 %v4884_v12, %s4230_s18 }
 0x197   : > { %4004 = vrot.lane.b32.xlu0 %v4003_v16, %s4231_s25  ;;  %3663 = vmatmul.msk.bf16.gmra.mxu3 %vm2184_vm15, %v2977_v63  ;;  %v3816_v16 = vunpack.i.l.bf16 %v4780_v26 }
 0x198   : > { %vm629_vm3 = vcmp.gt.f32.partialorder %v587_v33, 0.0  ;;  %v661_v38 = vmul.f32 0.1, %v587_v33  ;;  %v3845_v3 = vpop.permute.xlu1 %3844 }
 0x199   : > { %v3847_v11 = vunpack.i.h.bf16 %v3845_v3  ;;  %v3846_v13 = vunpack.i.l.bf16 %v3845_v3  ;;  %v3855_v41 = vpop.permute.xlu0 %3854  ;;  %v1766_v14 = vsel %vm700_vm4, %v1382_v45, %v3816_v16  ;;  %v3870_v3 = vpop.permute.xlu2 %3869 }
 0x19a   : > { %v693_v55 = vsel %vm629_vm3, %v587_v33, %v661_v38  ;;  %v4909_v7 = vld [vmem:[#allocation2 + $0xd1] sm:$0xff]  ;;  %v3857_v10 = vunpack.i.h.bf16 %v3855_v41  ;;  %v3856_v58 = vunpack.i.l.bf16 %v3855_v41  ;;  %v744_v33 = vadd.s32 80, %v4457_v5 }
 0x19b   : > { %726 = vst.msk [vmem:[#allocation2 + $0xe0] sm:$0xff] %vm700_vm4, %v693_v55  ;;  %v2644_v18 = vsel %vm4856_vm14, %v4909_v7, 0.0  ;;  %v2918_v39 = vsel %vm700_vm4, %v4925_v35, %v3847_v11  ;;  %v2917_v40 = vsel %vm700_vm4, %v2533_v36, %v3846_v13  ;;  %v2581_v25 = vld [vmem:[#allocation2 + $0xd8] sm:$0xff]  ;;  %v1911_v8 = vsel %vm4933_vm5, %v4909_v7, 0.0 }
 0x19c   : > { %v4013_v15 = vpack.i.bf16 %v2644_v18, %v4917_v17  ;;  %v2949_v52 = vsel %vm466_vm2, %v2917_v40, %v3851_v44  ;;  %v2950_v53 = vsel %vm466_vm2, %v2918_v39, %v3852_v42  ;;  %v840_v18 = vand.u32 15, %v744_v33 }
 0x19d   : > { %v589_v28 = vpop.f32.mrf.mxu0  ;;  %3583 = vmatmul.msk.bf16.gmra.mxu1 %vm2184_vm15, %v2122_v50  ;;  %v2978_v0 = vpack.c.bf16 %v2950_v53, %v2949_v52  ;;  %v3872_v36 = vunpack.i.h.bf16 %v3870_v3  ;;  %v3842_v44 = vunpack.i.h.bf16 %v4879_v51  ;;  %v763_v40 = vadd.s32 232, %v4457_v5 }
 0x19e   : > { %v590_v31 = vadd.f32 %v4850_v24, %v589_v28  ;;  %3624 = vmatmul.msk.bf16.gmra.mxu2 %vm2184_vm15, %v1825_v19  ;;  %4014 = vrot.lane.b32.xlu2 %v4013_v15, %s4231_s25  ;;  %v4048_v28 = vpack.i.bf16 %v1911_v8, %v4917_v17  ;;  %vm5007_vm10 = vcmp.gt.s32.totalorder %v840_v18, 0 }
 0x19f   : > { %4024 = vrot.lane.b32.xlu1 %v4023_v34, %s4231_s25  ;;  %4019 = vrot.lane.b32.xlu0 %v4802_v29, %s4230_s18  ;;  %v3817_v29 = vunpack.i.h.bf16 %v4780_v26  ;;  %v1858_v26 = vsel %vm4860_vm0, %v4845_v20, 0.0  ;;  %v759_v20 = vadd.s32 200, %v4457_v5  ;;  %v4995_v34 = vld [vmem:[#allocation2 + $0x67] sm:$0xff] }
 0x1a0   : > { %vm630_vm6 = vcmp.gt.f32.partialorder %v590_v31, 0.0  ;;  %v662_v46 = vmul.f32 0.1, %v590_v31  ;;  %v3860_v49 = vpop.permute.xlu1 %3859  ;;  %v2062_v38 = vsel %vm700_vm4, %v1858_v26, %v3816_v16 }
 0x1a1   : > { %v3862_v57 = vunpack.i.h.bf16 %v3860_v49  ;;  %v3861_v62 = vunpack.i.l.bf16 %v3860_v49  ;;  %v1767_v59 = vsel %vm700_vm4, %v4873_v43, %v3817_v29  ;;  %v2094_v2 = vsel %vm466_vm2, %v2062_v38, %v3856_v58 }
 0x1a2   : > { %v694_v48 = vsel %vm630_vm6, %v590_v31, %v662_v46  ;;  %v2582_v27 = vld [vmem:[#allocation2 + $0xe0] sm:$0xff]  ;;  %v2095_v43 = vsel %vm466_vm2, %v1767_v59, %v3857_v10  ;;  %v945_v50 = vand.u32 15, %v759_v20  ;;  %v3871_v31 = vunpack.i.l.bf16 %v3870_v3  ;;  %v5012_v46 = vld [vmem:[#allocation2 + $0x6f] sm:$0xff] }
 0x1a3   : > { %727 = vst.msk [vmem:[#allocation2 + $0xe8] sm:$0xff] %vm700_vm4, %v694_v48  ;;  %v4955_v32 = vpack.i.bf16 %v2582_v27, %v2581_v25  ;;  %v1798_v4 = vsel %vm466_vm2, %v1766_v14, %v3861_v62  ;;  %v1799_v6 = vsel %vm466_vm2, %v1767_v59, %v3862_v57  ;;  %v2123_v9 = vpack.c.bf16 %v2095_v43, %v2094_v2  ;;  %v4987_v11 = vld [vmem:[#allocation2 + $0xd9] sm:$0xff]  ;;  %v3885_v27 = vpop.permute.xlu2 %3884 }
 0x1a4   : > { %v1826_v19 = vpack.c.bf16 %v1799_v6, %v1798_v4  ;;  %vm5003_vm9 = vcmp.lt.s32.totalorder %v945_v50, 15  ;;  %v2920_v49 = vsel %vm700_vm4, %v5012_v46, %v3872_v36  ;;  %v3841_v10 = vunpack.i.l.bf16 %v4879_v51 }
 0x1a5   : > { %v591_v63 = vpop.f32.mrf.mxu0  ;;  %v1495_v16 = vsel %vm5003_vm9, %v4909_v7, 0.0  ;;  %v3887_v45 = vunpack.i.h.bf16 %v3885_v27  ;;  %v3886_v26 = vunpack.i.l.bf16 %v3885_v27  ;;  %v1384_v51 = vsel %vm5007_vm10, %v4914_v60, 0.0 }
 0x1a6   : > { %v592_v22 = vadd.f32 %v4850_v24, %v591_v63  ;;  %4029 = vrot.lane.b32.xlu2 %v4028_v61, %s4231_s25  ;;  %v1860_v7 = vsel %vm4948_vm7, %v4914_v60, 0.0  ;;  %v1769_v14 = vsel %vm700_vm4, %v4925_v35, %v3842_v44  ;;  %v1768_v38 = vsel %vm700_vm4, %v1384_v51, %v3841_v10 }
 0x1a7   : > { %4034 = vrot.lane.b32.xlu0 %v4955_v32, %s4230_s18  ;;  %3664 = vmatmul.msk.bf16.gmra.mxu3 %vm2184_vm15, %v2978_v0  ;;  %v4974_v30 = vpop.permute.xlu0 %3864  ;;  %v761_v60 = vadd.s32 216, %v4457_v5  ;;  %v1800_v35 = vsel %vm466_vm2, %v1768_v38, %v3886_v26  ;;  %v1801_v43 = vsel %vm466_vm2, %v1769_v14, %v3887_v45  ;;  %v746_v6 = vadd.s32 96, %v4457_v5 }
 0x1a8   : > { %vm631_vm8 = vcmp.gt.f32.partialorder %v592_v22, 0.0  ;;  %v663_v1 = vmul.f32 0.1, %v592_v22  ;;  %v3880_v21 = vpop.permute.xlu1 %3879  ;;  %v3867_v44 = vunpack.i.h.bf16 %v4974_v30 }
 0x1a9   : > { %v3882_v62 = vunpack.i.h.bf16 %v3880_v21  ;;  %v3881_v63 = vunpack.i.l.bf16 %v3880_v21  ;;  %v959_v18 = vand.u32 15, %v761_v60 }
 0x1aa   : > { %v695_v37 = vsel %vm631_vm8, %v592_v22, %v663_v1  ;;  %v4981_v55 = vld [vmem:[#allocation2 + $0xe1] sm:$0xff]  ;;  %v4053_v22 = vpack.i.bf16 %v1495_v16, %v4917_v17  ;;  %v2064_v17 = vsel %vm700_vm4, %v1860_v7, %v3841_v10  ;;  %v1771_v45 = vsel %vm700_vm4, %v5012_v46, %v3867_v44  ;;  %v5148_v44 = vld [vmem:[#allocation2 + $0x8f] sm:$0xff] }
 0x1ab   : > { %728 = vst.msk [vmem:[#allocation2 + $0xf0] sm:$0xff] %vm700_vm4, %v695_v37  ;;  %v2646_v13 = vsel %vm4933_vm5, %v4981_v55, 0.0  ;;  %v2583_v53 = vld [vmem:[#allocation2 + $0xe8] sm:$0xff]  ;;  %v2096_v1 = vsel %vm466_vm2, %v2064_v17, %v3881_v63  ;;  %v2097_v2 = vsel %vm466_vm2, %v1769_v14, %v3882_v62  ;;  %v1913_v4 = vsel %vm5003_vm9, %v4981_v55, 0.0 }
 0x1ac   : > { %v4038_v15 = vpack.i.bf16 %v2646_v13, %v4987_v11  ;;  %vm5075_vm13 = vcmp.lt.s32.totalorder %v959_v18, 15 }
 0x1ad   : > { %v594_v23 = vpop.f32.mrf.mxu0  ;;  %3584 = vmatmul.msk.bf16.gmra.mxu1 %vm2184_vm15, %v2123_v9  ;;  %v2124_v9 = vpack.c.bf16 %v2097_v2, %v2096_v1 }
 0x1ae   : > { %v595_v56 = vadd.f32 %v4850_v24, %v594_v23  ;;  %3625 = vmatmul.msk.bf16.gmra.mxu2 %vm2184_vm15, %v1826_v19  ;;  %4044 = vrot.lane.b32.xlu2 %v4884_v12, %s4230_s18  ;;  %v2535_v12 = vsel %vm4948_vm7, %v4995_v34, 0.0  ;;  %v3905_v19 = vpop.permute.xlu2 %3904  ;;  %v4073_v23 = vpack.i.bf16 %v1913_v4, %v4987_v11 }
 0x1af   : > { %4039 = vrot.lane.b32.xlu1 %v4038_v15, %s4231_s25  ;;  %4049 = vrot.lane.b32.xlu0 %v4048_v28, %s4231_s25  ;;  %v2919_v25 = vsel %vm700_vm4, %v2535_v12, %v3871_v31  ;;  %v1827_v15 = vpack.c.bf16 %v1801_v43, %v1800_v35  ;;  %v854_v31 = vand.u32 15, %v746_v6  ;;  %v3866_v12 = vunpack.i.l.bf16 %v4974_v30 }
 0x1b0   : > { %vm632_vm11 = vcmp.gt.f32.partialorder %v595_v56, 0.0  ;;  %v664_v41 = vmul.f32 0.1, %v595_v56  ;;  %v3875_v42 = vpop.permute.xlu0 %3874  ;;  %v3907_v38 = vunpack.i.h.bf16 %v3905_v19  ;;  %v3906_v17 = vunpack.i.l.bf16 %v3905_v19  ;;  %v5136_v19 = vld [vmem:[#allocation2 + $0x87] sm:$0xff] }
 0x1b1   : > { %v3877_v47 = vunpack.i.h.bf16 %v3875_v42  ;;  %v3876_v48 = vunpack.i.l.bf16 %v3875_v42  ;;  %vm5084_vm0 = vcmp.gt.s32.totalorder %v854_v31, 0  ;;  %v973_v35 = vand.u32 15, %v763_v40 }
 0x1b2   : > { %v696_v52 = vsel %vm632_vm11, %v595_v56, %v664_v41  ;;  %v2584_v29 = vld [vmem:[#allocation2 + $0xf0] sm:$0xff]  ;;  %v1386_v46 = vsel %vm5084_vm0, %v4995_v34, 0.0  ;;  %v2099_v2 = vsel %vm466_vm2, %v1771_v45, %v3907_v38  ;;  %v748_v43 = vadd.s32 112, %v4457_v5 }
 0x1b3   : > { %729 = vst.msk [vmem:[#allocation2 + $0xf8] sm:$0xff] %vm700_vm4, %v696_v52  ;;  %v5025_v58 = vpack.i.bf16 %v2584_v29, %v2583_v53  ;;  %v2951_v61 = vsel %vm466_vm2, %v2919_v25, %v3876_v48  ;;  %v2952_v57 = vsel %vm466_vm2, %v2920_v49, %v3877_v47  ;;  %v5059_v13 = vld [vmem:[#allocation2 + $0xe9] sm:$0xff]  ;;  %v5067_v56 = vld [vmem:[#allocation2 + $0x77] sm:$0xff]  ;;  %v5088_v52 = vld [vmem:[#allocation2 + $0x7f] sm:$0xff]  ;;  %vm5141_vm3 = vcmp.lt.s32.totalorder %v973_v35, 15 }
 0x1b4   : > { %v2979_v0 = vpack.c.bf16 %v2952_v57, %v2951_v61  ;;  %v2537_v49 = vsel %vm5007_vm10, %v5067_v56, 0.0  ;;  %v1497_v61 = vsel %vm5075_vm13, %v4981_v55, 0.0  ;;  %v1862_v57 = vsel %vm5007_vm10, %v4995_v34, 0.0 }
 0x1b5   : > { %v596_v33 = vpop.f32.mrf.mxu0  ;;  %v2066_v26 = vsel %vm700_vm4, %v1862_v57, %v3866_v12  ;;  %v765_v42 = vadd.s32 248, %v4457_v5 }
 0x1b6   : > { %v597_v59 = vadd.f32 %v4850_v24, %v596_v33  ;;  %4059 = vrot.lane.b32.xlu2 %v5025_v58, %s4230_s18  ;;  %v5106_v33 = vpop.permute.xlu2 %3914  ;;  %v2098_v1 = vsel %vm466_vm2, %v2066_v26, %v3906_v17 }
 0x1b7   : > { %4054 = vrot.lane.b32.xlu1 %v4053_v22, %s4231_s25  ;;  %3665 = vmatmul.msk.bf16.gmra.mxu3 %vm2184_vm15, %v2979_v0  ;;  %v5045_v20 = vpop.permute.xlu1 %3889 }
 0x1b8   : > { %vm633_vm12 = vcmp.gt.f32.partialorder %v597_v59, 0.0  ;;  %v665_v54 = vmul.f32 0.1, %v597_v59  ;;  %v3895_v3 = vpop.permute.xlu0 %3894 }
 0x1b9   : > { %v3896_v21 = vunpack.i.l.bf16 %v3895_v3  ;;  %v3897_v39 = vunpack.i.h.bf16 %v3895_v3 }
 0x1ba   : > { %v697_v37 = vsel %vm633_vm12, %v597_v59, %v665_v54  ;;  %v5056_v8 = vld [vmem:[#allocation2 + $0xf1] sm:$0xff]  ;;  %v4078_v59 = vpack.i.bf16 %v1497_v61, %v4987_v11  ;;  %v1770_v54 = vsel %vm700_vm4, %v1386_v46, %v3866_v12  ;;  %v2539_v12 = vsel %vm5084_vm0, %v5136_v19, 0.0 }
 0x1bb   : > { %730 = vst.msk [vmem:[#allocation2 + $0x100] sm:$0xff] %vm700_vm4, %v697_v37  ;;  %v2648_v50 = vsel %vm5003_vm9, %v5056_v8, 0.0  ;;  %v2921_v53 = vsel %vm700_vm4, %v2537_v49, %v3896_v21  ;;  %v2585_v30 = vld [vmem:[#allocation2 + $0xf8] sm:$0xff]  ;;  %v2922_v62 = vsel %vm700_vm4, %v5088_v52, %v3897_v39  ;;  %v1915_v37 = vsel %vm5075_vm13, %v5056_v8, 0.0 }
 0x1bc   : > { %v4063_v28 = vpack.i.bf16 %v2648_v50, %v5059_v13  ;;  %v4098_v31 = vpack.i.bf16 %v1915_v37, %v5059_v13  ;;  %v1499_v49 = vsel %vm5141_vm3, %v5056_v8, 0.0  ;;  %v2622_v37 = vld [vmem:[#allocation2 + $0x121] sm:$0xff] }
 0x1bd   : > { %v599_v36 = vpop.f32.mrf.mxu0  ;;  %3585 = vmatmul.msk.bf16.gmra.mxu1 %vm2184_vm15, %v2124_v9  ;;  %v2125_v9 = vpack.c.bf16 %v2099_v2, %v2098_v1  ;;  %v4103_v8 = vpack.i.bf16 %v1499_v49, %v5059_v13  ;;  %v1864_v13 = vsel %vm5084_vm0, %v5067_v56, 0.0  ;;  %v5223_v21 = vld [vmem:[#allocation2 + $0x9f] sm:$0xff] }
 0x1be   : > { %v600_v41 = vadd.f32 %v4850_v24, %v599_v36  ;;  %3626 = vmatmul.msk.bf16.gmra.mxu2 %vm2184_vm15, %v1827_v15  ;;  %4074 = vrot.lane.b32.xlu2 %v4073_v23, %s4231_s25  ;;  %v3925_v39 = vpop.permute.xlu2 %3924 }
 0x1bf   : > { %4069 = vrot.lane.b32.xlu1 %v4955_v32, %s4230_s18  ;;  %4064 = vrot.lane.b32.xlu0 %v4063_v28, %s4231_s25 }
 0x1c0   : > { %vm634_vm14 = vcmp.gt.f32.partialorder %v600_v41, 0.0  ;;  %v666_v47 = vmul.f32 0.1, %v600_v41  ;;  %v3900_v48 = vpop.permute.xlu1 %3899  ;;  %v3910_v16 = vpop.permute.xlu0 %3909 }
 0x1c1   : > { %v3902_v25 = vunpack.i.h.bf16 %v3900_v48  ;;  %v3901_v27 = vunpack.i.l.bf16 %v3900_v48  ;;  %v3912_v22 = vunpack.i.h.bf16 %v3910_v16  ;;  %v3911_v51 = vunpack.i.l.bf16 %v3910_v16 }
 0x1c2   : > { %v698_v29 = vsel %vm634_vm14, %v600_v41, %v666_v47  ;;  %v2586_v10 = vld [vmem:[#allocation2 + $0x100] sm:$0xff]  ;;  %v868_v41 = vand.u32 15, %v748_v43  ;;  %v3892_v16 = vunpack.i.h.bf16 %v5045_v20 }
 0x1c3   : > { %731 = vst.msk [vmem:[#allocation2 + $0x108] sm:$0xff] %vm700_vm4, %v698_v29  ;;  %v5100_v63 = vpack.i.bf16 %v2586_v10, %v2585_v30  ;;  %v2953_v0 = vsel %vm466_vm2, %v2921_v53, %v3901_v27  ;;  %v2954_v55 = vsel %vm466_vm2, %v2922_v62, %v3902_v25  ;;  %v1802_v34 = vsel %vm466_vm2, %v1770_v54, %v3911_v51  ;;  %v5131_v50 = vld [vmem:[#allocation2 + $0xf9] sm:$0xff] }
 0x1c4   : > { %v2980_v14 = vpack.c.bf16 %v2954_v55, %v2953_v0  ;;  %v3927_v25 = vunpack.i.h.bf16 %v3925_v39  ;;  %v3926_v27 = vunpack.i.l.bf16 %v3925_v39  ;;  %vm5162_vm5 = vcmp.gt.s32.totalorder %v868_v41, 0 }
 0x1c5   : > { %v601_v7 = vpop.f32.mrf.mxu0  ;;  %v987_v62 = vand.u32 15, %v765_v42  ;;  %v1388_v38 = vsel %vm5162_vm5, %v5067_v56, 0.0  ;;  %v1773_v17 = vsel %vm700_vm4, %v5088_v52, %v3892_v16 }
 0x1c6   : > { %v602_v60 = vadd.f32 %v4850_v24, %v601_v7  ;;  %v1803_v24 = vsel %vm466_vm2, %v1771_v45, %v3912_v22  ;;  %v3940_v54 = vpop.permute.xlu2 %3939 }
 0x1c7   : > { %4084 = vrot.lane.b32.xlu1 %v5100_v63, %s4230_s18  ;;  %4079 = vrot.lane.b32.xlu0 %v4078_v59, %s4231_s25  ;;  %v1828_v28 = vpack.c.bf16 %v1803_v24, %v1802_v34  ;;  %vm5194_vm6 = vcmp.lt.s32.totalorder %v987_v62, 15  ;;  %v750_v24 = vadd.s32 128, %v4457_v5 }
 0x1c8   : > { %vm635_vm1 = vcmp.gt.f32.partialorder %v602_v60, 0.0  ;;  %v667_v3 = vmul.f32 0.1, %v602_v60  ;;  %3666 = vmatmul.msk.bf16.gmra.mxu3 %vm2184_vm15, %v2980_v14  ;;  %v3920_v11 = vpop.permute.xlu1 %3919 }
 0x1c9   : > { %v3922_v15 = vunpack.i.h.bf16 %v3920_v11  ;;  %v3921_v23 = vunpack.i.l.bf16 %v3920_v11  ;;  %v3930_v53 = vpop.permute.xlu0 %3929 }
 0x1ca   : > { %v699_v4 = vsel %vm635_vm1, %v602_v60, %v667_v3  ;;  %v5125_v6 = vld [vmem:[#allocation2 + $0x101] sm:$0xff]  ;;  %v3932_v40 = vunpack.i.h.bf16 %v3930_v53 }
 0x1cb   : > { %732 = vst.msk [vmem:[#allocation2 + $0x110] sm:$0xff] %vm700_vm4, %v699_v4  ;;  %v2650_v18 = vsel %vm5075_vm13, %v5125_v6, 0.0  ;;  %v2924_v47 = vsel %vm700_vm4, %v5148_v44, %v3922_v15  ;;  %v2923_v48 = vsel %vm700_vm4, %v2539_v12, %v3921_v23  ;;  %v2587_v45 = vld [vmem:[#allocation2 + $0x108] sm:$0xff]  ;;  %v1501_v1 = vsel %vm5194_vm6, %v5125_v6, 0.0  ;;  %v2590_v23 = vld [vmem:[#allocation2 + $0x120] sm:$0xff] }
 0x1cc   : > { %v4088_v36 = vpack.i.bf16 %v2650_v18, %v5131_v50  ;;  %v2955_v26 = vsel %vm466_vm2, %v2923_v48, %v3926_v27  ;;  %v2956_v55 = vsel %vm466_vm2, %v2924_v47, %v3927_v25  ;;  %v2101_v52 = vsel %vm466_vm2, %v1773_v17, %v3932_v40 }
 0x1cd   : > { %3586 = vmatmul.msk.bf16.gmra.mxu1 %vm2184_vm15, %v2125_v9  ;;  %v2981_v14 = vpack.c.bf16 %v2956_v55, %v2955_v26  ;;  %v1917_v2 = vsel %vm5141_vm3, %v5125_v6, 0.0  ;;  %v4128_v43 = vpack.i.bf16 %v1501_v1, %v5131_v50  ;;  %v5214_v9 = vld [vmem:[#allocation2 + $0x97] sm:$0xff]  ;;  %v3942_v18 = vunpack.i.h.bf16 %v3940_v54 }
 0x1ce   : > { %3627 = vmatmul.msk.bf16.gmra.mxu2 %vm2184_vm15, %v1828_v28  ;;  %4089 = vrot.lane.b32.xlu2 %v4088_v36, %s4231_s25  ;;  %v4123_v4 = vpack.i.bf16 %v1917_v2, %v5131_v50  ;;  %v3941_v15 = vunpack.i.l.bf16 %v3940_v54  ;;  %v2589_v6 = vld [vmem:[#allocation2 + $0x118] sm:$0xff]  ;;  %v882_v28 = vand.u32 15, %v750_v24  ;;  %v2654_v50 = vsel %vm5194_vm6, %v2622_v37, 0.0  ;;  %v3955_v49 = vpop.permute.xlu2 %3954 }
 0x1cf   : > { %4099 = vrot.lane.b32.xlu1 %v4098_v31, %s4231_s25  ;;  %4094 = vrot.lane.b32.xlu0 %v5025_v58, %s4230_s18  ;;  %v3891_v58 = vunpack.i.l.bf16 %v5045_v20  ;;  %v3931_v20 = vunpack.i.l.bf16 %v3930_v53  ;;  %v2621_v31 = vld [vmem:[#allocation2 + $0x119] sm:$0xff]  ;;  %v2541_v41 = vsel %vm5162_vm5, %v5214_v9, 0.0  ;;  %v3917_v12 = vunpack.i.h.bf16 %v5106_v33 }
 0x1d0   : > { %v3935_v30 = vpop.permute.xlu1 %3934  ;;  %v2926_v47 = vsel %vm700_vm4, %v5223_v21, %v3942_v18  ;;  %v2925_v48 = vsel %vm700_vm4, %v2541_v41, %v3941_v15  ;;  %v4133_v25 = vpack.i.bf16 %v2590_v23, %v2589_v6  ;;  %v3916_v27 = vunpack.i.l.bf16 %v5106_v33 }
 0x1d1   : > { %v3937_v7 = vunpack.i.h.bf16 %v3935_v30  ;;  %v3936_v59 = vunpack.i.l.bf16 %v3935_v30  ;;  %v2068_v46 = vsel %vm700_vm4, %v1864_v13, %v3891_v58  ;;  %v1772_v60 = vsel %vm700_vm4, %v1388_v38, %v3891_v58 }
 0x1d2   : > { %v5168_v10 = vld [vmem:[#allocation2 + $0x109] sm:$0xff]  ;;  %v5170_v61 = vld [vmem:[#allocation2 + $0x111] sm:$0xff]  ;;  %v2100_v56 = vsel %vm466_vm2, %v2068_v46, %v3931_v20  ;;  %v4138_v53 = vpack.i.bf16 %v2654_v50, %v2621_v31  ;;  %vm5235_vm7 = vcmp.gt.s32.totalorder %v882_v28, 0  ;;  %v1866_v26 = vsel %vm5162_vm5, %v5136_v19, 0.0 }
 0x1d3   : > { %v2588_v57 = vld [vmem:[#allocation2 + $0x110] sm:$0xff]  ;;  %v2652_v0 = vsel %vm5141_vm3, %v5170_v61, 0.0  ;;  %v1804_v3 = vsel %vm466_vm2, %v1772_v60, %v3936_v59  ;;  %v1805_v11 = vsel %vm466_vm2, %v1773_v17, %v3937_v7  ;;  %v2126_v34 = vpack.c.bf16 %v2101_v52, %v2100_v56  ;;  %v5264_v46 = vld [vmem:[#allocation2 + $0xa7] sm:$0xff] }
 0x1d4   : > { %v4113_v22 = vpack.i.bf16 %v2652_v0, %v5168_v10  ;;  %v5179_v51 = vpack.i.bf16 %v2588_v57, %v2587_v45  ;;  %v1829_v35 = vpack.c.bf16 %v1805_v11, %v1804_v3  ;;  %v3957_v0 = vunpack.i.h.bf16 %v3955_v49 }
 0x1d5   : > { %v3956_v45 = vunpack.i.l.bf16 %v3955_v49  ;;  %v1390_v33 = vsel %vm5235_vm7, %v5136_v19, 0.0  ;;  %v1775_v55 = vsel %vm700_vm4, %v5148_v44, %v3917_v12  ;;  %v2070_v40 = vsel %vm700_vm4, %v1866_v26, %v3916_v27 }
 0x1d6   : > { %4104 = vrot.lane.b32.xlu2 %v4103_v8, %s4231_s25  ;;  %v1774_v20 = vsel %vm700_vm4, %v1390_v33, %v3916_v27  ;;  %v1807_v44 = vsel %vm466_vm2, %v1775_v55, %v3957_v0  ;;  %v1919_v59 = vsel %vm5194_vm6, %v5170_v61, 0.0  ;;  %v3970_v13 = vpop.permute.xlu2 %3969  ;;  %v752_v17 = vadd.s32 144, %v4457_v5  ;;  %v5268_v61 = vld [vmem:[#allocation2 + $0xaf] sm:$0xff] }
 0x1d7   : > { %4114 = vrot.lane.b32.xlu1 %v4113_v22, %s4231_s25  ;;  %4109 = vrot.lane.b32.xlu0 %v5179_v51, %s4230_s18  ;;  %v1806_v19 = vsel %vm466_vm2, %v1774_v20, %v3956_v45  ;;  %v4148_v38 = vpack.i.bf16 %v1919_v59, %v5168_v10  ;;  %v2543_v10 = vsel %vm5235_vm7, %v5264_v46, 0.0  ;;  %v3972_v24 = vunpack.i.h.bf16 %v3970_v13  ;;  %v5309_v59 = vld [vmem:[#allocation2 + $0xbf] sm:$0xff] }
 0x1d8   : > { %3667 = vmatmul.msk.bf16.gmra.mxu3 %vm2184_vm15, %v2981_v14  ;;  %v3950_v39 = vpop.permute.xlu1 %3949  ;;  %v1830_v14 = vpack.c.bf16 %v1807_v44, %v1806_v19  ;;  %v896_v1 = vand.u32 15, %v752_v17  ;;  %v754_v45 = vadd.s32 160, %v4457_v5  ;;  %v756_v28 = vadd.s32 176, %v4457_v5 }
 0x1d9   : > { %v3952_v57 = vunpack.i.h.bf16 %v3950_v39  ;;  %v3951_v62 = vunpack.i.l.bf16 %v3950_v39  ;;  %v2415_v56 = vpop.f32.mrf.mxu2  ;;  %v1777_v31 = vsel %vm700_vm4, %v5223_v21, %v3972_v24 }
 0x1da   : > { %vm5278_vm8 = vcmp.gt.s32.totalorder %v896_v1, 0 }
 0x1db   : > { %v2102_v22 = vsel %vm466_vm2, %v2070_v40, %v3951_v62  ;;  %v2103_v7 = vsel %vm466_vm2, %v1775_v55, %v3952_v57 }
 0x1dd   : > { %3587 = vmatmul.msk.bf16.gmra.mxu1 %vm2184_vm15, %v2126_v34 }
 0x1de   : > { %3628 = vmatmul.msk.bf16.gmra.mxu2 %vm2184_vm15, %v1829_v35  ;;  %4119 = vrot.lane.b32.xlu2 %v5100_v63, %s4230_s18  ;;  %v3971_v35 = vunpack.i.l.bf16 %v3970_v13 }
 0x1df   : > { %4129 = vrot.lane.b32.xlu1 %v4128_v43, %s4231_s25  ;;  %4124 = vrot.lane.b32.xlu0 %v4123_v4, %s4231_s25  ;;  %v3985_v37 = vpop.permute.xlu2 %3984 }
 0x1e0   : > { %v3945_v36 = vpop.permute.xlu0 %3944  ;;  %v3987_v26 = vunpack.i.h.bf16 %v3985_v37  ;;  %v3986_v33 = vunpack.i.l.bf16 %v3985_v37 }
 0x1e1   : > { %v3947_v63 = vunpack.i.h.bf16 %v3945_v36  ;;  %v3946_v42 = vunpack.i.l.bf16 %v3945_v36  ;;  %v1868_v36 = vsel %vm5235_vm7, %v5214_v9, 0.0  ;;  %v2417_v12 = vpop.f32.mrf.mxu2 }
 0x1e2   : > { %v2072_v50 = vsel %vm700_vm4, %v1868_v36, %v3971_v35 }
 0x1e3   : > { %v2957_v16 = vsel %vm466_vm2, %v2925_v48, %v3946_v42  ;;  %v2958_v58 = vsel %vm466_vm2, %v2926_v47, %v3947_v63  ;;  %v1392_v42 = vsel %vm5278_vm8, %v5214_v9, 0.0  ;;  %v5302_v9 = vld [vmem:[#allocation2 + $0xb7] sm:$0xff] }
 0x1e4   : > { %v2982_v8 = vpack.c.bf16 %v2958_v58, %v2957_v16  ;;  %v2242_v18 = vpop.f32.mrf.mxu1  ;;  %v1776_v21 = vsel %vm700_vm4, %v1392_v42, %v3971_v35  ;;  %v2545_v20 = vsel %vm5278_vm8, %v5302_v9, 0.0 }
 0x1e5   : > { %v2416_v47 = vadd.f32 %v2415_v56, %v2242_v18  ;;  %v2929_v56 = vsel %vm700_vm4, %v2545_v20, %v3986_v33 }
 0x1e6   : > { %4134 = vrot.lane.b32.xlu2 %v4133_v25, %s4230_s18  ;;  %v5295_v25 = vld [vmem:[%s4314_s15] ss:$0 sm:$0xff] }
 0x1e7   : > { %4144 = vrot.lane.b32.xlu1 %v5179_v51, %s4230_s18  ;;  %4139 = vrot.lane.b32.xlu0 %v4138_v53, %s4231_s25  ;;  %v2127_v51 = vpack.c.bf16 %v2103_v7, %v2102_v22 }
 0x1e8   : > { %3668 = vmatmul.msk.bf16.gmra.mxu3 %vm2184_vm15, %v2982_v8  ;;  %v3960_v29 = vpop.permute.xlu0 %3959  ;;  %v4000_v8 = vpop.permute.xlu2 %3999 }
 0x1e9   : > { %v3962_v60 = vunpack.i.h.bf16 %v3960_v29  ;;  %v3961_v54 = vunpack.i.l.bf16 %v3960_v29  ;;  %v4002_v35 = vunpack.i.h.bf16 %v4000_v8 }
 0x1eb   : > { %v2928_v2 = vsel %vm700_vm4, %v5268_v61, %v3962_v60  ;;  %v2927_v34 = vsel %vm700_vm4, %v2543_v10, %v3961_v54  ;;  %v2930_v54 = vsel %vm700_vm4, %v5309_v59, %v3987_v26 }
 0x1ec   : > { %v2244_v0 = vpop.f32.mrf.mxu1 }
 0x1ed   : > { %3588 = vmatmul.msk.bf16.gmra.mxu1 %vm2184_vm15, %v2127_v51  ;;  %v2418_v29 = vadd.f32 %v2417_v12, %v2244_v0  ;;  %v4156_v51 = vld [vmem:[%s4319_s19] sm:$0xff] }
 0x1ee   : > { %3629 = vmatmul.msk.bf16.gmra.mxu2 %vm2184_vm15, %v1830_v14  ;;  %4149 = vrot.lane.b32.xlu2 %v4148_v38, %s4231_s25 }
 0x1f0   : > { %v3965_v32 = vpop.permute.xlu1 %3964  ;;  %v3975_v11 = vpop.permute.xlu0 %3974 }
 0x1f1   : > { %v3967_v52 = vunpack.i.h.bf16 %v3965_v32  ;;  %v3966_v3 = vunpack.i.l.bf16 %v3965_v32  ;;  %v3977_v15 = vunpack.i.h.bf16 %v3975_v11  ;;  %v3976_v6 = vunpack.i.l.bf16 %v3975_v11 }
 0x1f2   : > { %v910_v32 = vand.u32 15, %v754_v45 }
 0x1f3   : > { %v2959_v43 = vsel %vm466_vm2, %v2927_v34, %v3966_v3  ;;  %v2960_v4 = vsel %vm466_vm2, %v2928_v2, %v3967_v52  ;;  %v2104_v39 = vsel %vm466_vm2, %v2072_v50, %v3976_v6  ;;  %v2105_v63 = vsel %vm466_vm2, %v1777_v31, %v3977_v15 }
 0x1f4   : > { %v2983_v23 = vpack.c.bf16 %v2960_v4, %v2959_v43  ;;  %v2128_v16 = vpack.c.bf16 %v2105_v63, %v2104_v39  ;;  %v1870_v52 = vsel %vm5278_vm8, %v5264_v46, 0.0  ;;  %v4001_v43 = vunpack.i.l.bf16 %v4000_v8  ;;  %v5346_v8 = vld [vmem:[#allocation2 + $0xcf] sm:$0xff] }
 0x1f5   : > { %vm5326_vm10 = vcmp.gt.s32.totalorder %v910_v32, 0 }
 0x1f6   : > { %v1394_v50 = vsel %vm5326_vm10, %v5264_v46, 0.0 }
 0x1f8   : > { %3669 = vmatmul.msk.bf16.gmra.mxu3 %vm2184_vm15, %v2983_v23  ;;  %v3980_v41 = vpop.permute.xlu1 %3979  ;;  %v4015_v4 = vpop.permute.xlu2 %4014 }
 0x1f9   : > { %v3982_v48 = vunpack.i.h.bf16 %v3980_v41  ;;  %v3981_v49 = vunpack.i.l.bf16 %v3980_v41  ;;  %v4157_v41 = vld [vmem:[%s4319_s19 + $0x8] sm:$0xff]  ;;  %v4016_v20 = vunpack.i.l.bf16 %v4015_v4 }
 0x1fa   : > { %v3096_v27 = vpop.f32.mrf.mxu3 }
 0x1fb   : > { %v3176_v53 = vadd.f32 %v3096_v27, %v2416_v47  ;;  %v1808_v58 = vsel %vm466_vm2, %v1776_v21, %v3981_v49  ;;  %v1809_v30 = vsel %vm466_vm2, %v1777_v31, %v3982_v48  ;;  %v5341_v27 = vld [vmem:[#allocation2 + $0xc7] sm:$0xff] }
 0x1fc   : > { %v1831_v57 = vpack.c.bf16 %v1809_v30, %v1808_v58  ;;  %v2547_v0 = vsel %vm5326_vm10, %v5341_v27, 0.0 }
 0x1fd   : > { %v3212_v62 = vadd.f32 %v5295_v25, %v3176_v53  ;;  %3589 = vmatmul.msk.bf16.gmra.mxu1 %vm2184_vm15, %v2128_v16 }
 0x1fe   : > { %3630 = vmatmul.msk.bf16.gmra.mxu2 %vm2184_vm15, %v1831_v57  ;;  %v924_v57 = vand.u32 15, %v756_v28 }
 0x1ff   : > { %vm3244_vm9 = vcmp.gt.f32.partialorder %v3212_v62, 0.0  ;;  %v3276_v55 = vmul.f32 0.1, %v3212_v62 }
 0x200   : > { %v3995_v40 = vpop.permute.xlu1 %3994  ;;  %v2420_v44 = vpop.f32.mrf.mxu2  ;;  %vm5356_vm12 = vcmp.gt.s32.totalorder %v924_v57, 0 }
 0x201   : > { %v3308_v22 = vsel %vm3244_vm9, %v3212_v62, %v3276_v55  ;;  %v3997_v7 = vunpack.i.h.bf16 %v3995_v40  ;;  %v3990_v19 = vpop.permute.xlu0 %3989  ;;  %v3996_v14 = vunpack.i.l.bf16 %v3995_v40  ;;  %v4030_v45 = vpop.permute.xlu2 %4029  ;;  %v4017_v40 = vunpack.i.h.bf16 %v4015_v4 }
 0x202   : > { %v3340_v13 = vadd.f32 %v4156_v51, %v3308_v22  ;;  %v3992_v38 = vunpack.i.h.bf16 %v3990_v19  ;;  %v3991_v17 = vunpack.i.l.bf16 %v3990_v19  ;;  %v3098_v60 = vpop.f32.mrf.mxu3  ;;  %v4031_v37 = vunpack.i.l.bf16 %v4030_v45 }
 0x203   : > { %v3177_v10 = vadd.f32 %v3098_v60, %v2418_v29  ;;  %v1779_v1 = vsel %vm700_vm4, %v5268_v61, %v3997_v7  ;;  %v2074_v2 = vsel %vm700_vm4, %v1870_v52, %v3996_v14  ;;  %v1778_v48 = vsel %vm700_vm4, %v1394_v50, %v3996_v14 }
 0x204   : > { %3372 = vst.msk [vmem:[%s4319_s19] sm:$0xff] %vm466_vm2, %v3340_v13  ;;  %v2961_v3 = vsel %vm466_vm2, %v2929_v56, %v3991_v17  ;;  %v2962_v11 = vsel %vm466_vm2, %v2930_v54, %v3992_v38  ;;  %v2106_v61 = vsel %vm466_vm2, %v2074_v2, %v4001_v43  ;;  %v2107_v6 = vsel %vm466_vm2, %v1779_v1, %v4002_v35 }
 0x205   : > { %v3213_v34 = vadd.f32 %v5295_v25, %v3177_v10  ;;  %v2984_v24 = vpack.c.bf16 %v2962_v11, %v2961_v3  ;;  %v2129_v21 = vpack.c.bf16 %v2107_v6, %v2106_v61  ;;  %v4158_v3 = vld [vmem:[%s4319_s19 + $0x10] sm:$0xff]  ;;  %v4032_v43 = vunpack.i.h.bf16 %v4030_v45 }
 0x207   : > { %vm3245_vm11 = vcmp.gt.f32.partialorder %v3213_v34, 0.0  ;;  %v3277_v18 = vmul.f32 0.1, %v3213_v34 }
 0x208   : > { %3670 = vmatmul.msk.bf16.gmra.mxu3 %vm2184_vm15, %v2984_v24  ;;  %v4010_v15 = vpop.permute.xlu1 %4009  ;;  %v2422_v31 = vpop.f32.mrf.mxu2 }
 0x209   : > { %v3309_v23 = vsel %vm3245_vm11, %v3213_v34, %v3277_v18  ;;  %v4005_v36 = vpop.permute.xlu0 %4004  ;;  %v4012_v49 = vunpack.i.h.bf16 %v4010_v15  ;;  %v4011_v53 = vunpack.i.l.bf16 %v4010_v15  ;;  %v1396_v34 = vsel %vm5356_vm12, %v5302_v9, 0.0 }
 0x20a   : > { %v3341_v39 = vadd.f32 %v4157_v41, %v3309_v23  ;;  %v4007_v63 = vunpack.i.h.bf16 %v4005_v36  ;;  %v4006_v42 = vunpack.i.l.bf16 %v4005_v36  ;;  %v3101_v12 = vpop.f32.mrf.mxu3  ;;  %v2247_v47 = vpop.f32.mrf.mxu1 }
 0x20b   : > { %v2421_v16 = vadd.f32 %v2420_v44, %v2247_v47  ;;  %v2932_v26 = vsel %vm700_vm4, %v5346_v8, %v4012_v49  ;;  %v2931_v33 = vsel %vm700_vm4, %v2547_v0, %v4011_v53  ;;  %v1872_v44 = vsel %vm5326_vm10, %v5302_v9, 0.0  ;;  %v4045_v41 = vpop.permute.xlu2 %4044  ;;  %v5384_v49 = vld [vmem:[#allocation2 + $0xd7] sm:$0xff] }
 0x20c   : > { %3373 = vst.msk [vmem:[%s4319_s19 + $0x8] sm:$0xff] %vm466_vm2, %v3341_v39  ;;  %v1810_v58 = vsel %vm466_vm2, %v1778_v48, %v4006_v42  ;;  %v1811_v46 = vsel %vm466_vm2, %v1779_v1, %v4007_v63  ;;  %v2963_v60 = vsel %vm466_vm2, %v2931_v33, %v4016_v20  ;;  %v2964_v54 = vsel %vm466_vm2, %v2932_v26, %v4017_v40  ;;  %v5393_v26 = vld [vmem:[#allocation2 + $0xdf] sm:$0xff] }
 0x20d   : > { %3590 = vmatmul.msk.bf16.gmra.mxu1 %vm2184_vm15, %v2129_v21  ;;  %v1832_v30 = vpack.c.bf16 %v1811_v46, %v1810_v58  ;;  %v3178_v62 = vadd.f32 %v3101_v12, %v2421_v16  ;;  %v2985_v35 = vpack.c.bf16 %v2964_v54, %v2963_v60  ;;  %v758_v42 = vadd.s32 192, %v4457_v5  ;;  %v4159_v12 = vld [vmem:[%s4319_s19 + $0x18] sm:$0xff]  ;;  %v4160_v54 = vld [vmem:[%s4319_s19 + $0x20] sm:$0xff] }
 0x20e   : > { %v4046_v57 = vunpack.i.l.bf16 %v4045_v41 }
 0x20f   : > { %3631 = vmatmul.msk.bf16.gmra.mxu2 %vm2184_vm15, %v1832_v30  ;;  %v3214_v55 = vadd.f32 %v5295_v25, %v3178_v62  ;;  %v938_v46 = vand.u32 15, %v758_v42  ;;  %v4047_v30 = vunpack.i.h.bf16 %v4045_v41  ;;  %v2549_v62 = vsel %vm5356_vm12, %v5384_v49, 0.0  ;;  %v5429_v42 = vld [vmem:[#allocation2 + $0xe7] sm:$0xff] }
 0x210   : > { %v760_v41 = vadd.s32 208, %v4457_v5 }
 0x211   : > { %v4025_v29 = vpop.permute.xlu1 %4024  ;;  %v4020_v22 = vpop.permute.xlu0 %4019  ;;  %vm3246_vm13 = vcmp.gt.f32.partialorder %v3214_v55, 0.0  ;;  %v3278_v19 = vmul.f32 0.1, %v3214_v55  ;;  %vm5401_vm1 = vcmp.gt.s32.totalorder %v938_v46, 0  ;;  %v5435_v46 = vld [vmem:[#allocation2 + $0xef] sm:$0xff] }
 0x212   : > { %v2425_v51 = vpop.f32.mrf.mxu2  ;;  %v3103_v13 = vpop.f32.mrf.mxu3  ;;  %v4022_v14 = vunpack.i.h.bf16 %v4020_v22  ;;  %v4021_v38 = vunpack.i.l.bf16 %v4020_v22  ;;  %v4027_v32 = vunpack.i.h.bf16 %v4025_v29  ;;  %v4026_v10 = vunpack.i.l.bf16 %v4025_v29 }
 0x213   : > { %v2249_v17 = vpop.f32.mrf.mxu1  ;;  %v3310_v56 = vsel %vm3246_vm13, %v3214_v55, %v3278_v19  ;;  %v1398_v7 = vsel %vm5401_vm1, %v5341_v27, 0.0 }
 0x214   : > { %v2423_v52 = vadd.f32 %v2422_v31, %v2249_v17  ;;  %v3342_v11 = vadd.f32 %v4158_v3, %v3310_v56  ;;  %v1781_v1 = vsel %vm700_vm4, %v5309_v59, %v4022_v14  ;;  %v2076_v2 = vsel %vm700_vm4, %v1872_v44, %v4021_v38  ;;  %v4060_v3 = vpop.permute.xlu2 %4059 }
 0x215   : > { %v1780_v4 = vsel %vm700_vm4, %v1396_v34, %v4021_v38  ;;  %v2108_v59 = vsel %vm466_vm2, %v2076_v2, %v4026_v10  ;;  %v2109_v15 = vsel %vm466_vm2, %v1781_v1, %v4027_v32  ;;  %v1813_v36 = vsel %vm466_vm2, %v1781_v1, %v4032_v43 }
 0x216   : > { %v3179_v24 = vadd.f32 %v3103_v13, %v2423_v52  ;;  %3374 = vst.msk [vmem:[%s4319_s19 + $0x10] sm:$0xff] %vm466_vm2, %v3342_v11  ;;  %v1812_v28 = vsel %vm466_vm2, %v1780_v4, %v4031_v37  ;;  %v2130_v50 = vpack.c.bf16 %v2109_v15, %v2108_v59  ;;  %v1874_v52 = vsel %vm5356_vm12, %v5341_v27, 0.0 }
 0x217   : > { %v1833_v48 = vpack.c.bf16 %v1813_v36, %v1812_v28  ;;  %v1783_v1 = vsel %vm700_vm4, %v5346_v8, %v4047_v30  ;;  %v2078_v2 = vsel %vm700_vm4, %v1874_v52, %v4046_v57  ;;  %v1782_v15 = vsel %vm700_vm4, %v1398_v7, %v4046_v57 }
 0x218   : > { %v3215_v18 = vadd.f32 %v5295_v25, %v3179_v24  ;;  %3671 = vmatmul.msk.bf16.gmra.mxu3 %vm2184_vm15, %v2985_v35 }
 0x219   : > { %v4035_v61 = vpop.permute.xlu0 %4034 }
 0x21a   : > { %vm3247_vm14 = vcmp.gt.f32.partialorder %v3215_v18, 0.0  ;;  %v3279_v9 = vmul.f32 0.1, %v3215_v18  ;;  %v2427_v6 = vpop.f32.mrf.mxu2  ;;  %v3106_v23 = vpop.f32.mrf.mxu3  ;;  %v4037_v53 = vunpack.i.h.bf16 %v4035_v61  ;;  %v4036_v16 = vunpack.i.l.bf16 %v4035_v61 }
 0x21b   : > { %v2252_v31 = vpop.f32.mrf.mxu1 }
 0x21c   : > { %v3311_v39 = vsel %vm3247_vm14, %v3215_v18, %v3279_v9  ;;  %v2426_v63 = vadd.f32 %v2425_v51, %v2252_v31  ;;  %v2934_v22 = vsel %vm700_vm4, %v5393_v26, %v4037_v53  ;;  %v2933_v19 = vsel %vm700_vm4, %v2549_v62, %v4036_v16  ;;  %v4161_v31 = vld [vmem:[%s4319_s19 + $0x28] sm:$0xff] }
 0x21d   : > { %v3343_v47 = vadd.f32 %v4159_v12, %v3311_v39  ;;  %3591 = vmatmul.msk.bf16.gmra.mxu1 %vm2184_vm15, %v2130_v50  ;;  %v4061_v12 = vunpack.i.l.bf16 %v4060_v3  ;;  %v1876_v53 = vsel %vm5401_vm1, %v5384_v49, 0.0 }
 0x21e   : > { %v3180_v21 = vadd.f32 %v3106_v23, %v2426_v63  ;;  %v4062_v63 = vunpack.i.h.bf16 %v4060_v3 }
 0x21f   : > { %3375 = vst.msk [vmem:[%s4319_s19 + $0x18] sm:$0xff] %vm466_vm2, %v3343_v47  ;;  %3632 = vmatmul.msk.bf16.gmra.mxu2 %vm2184_vm15, %v1833_v48  ;;  %v4075_v47 = vpop.permute.xlu2 %4074 }
 0x220   : > { %v3216_v58 = vadd.f32 %v5295_v25, %v3180_v21  ;;  %v952_v21 = vand.u32 15, %v760_v41 }
 0x221   : > { %v4040_v0 = vpop.permute.xlu1 %4039  ;;  %v4050_v45 = vpop.permute.xlu0 %4049 }
 0x222   : > { %vm3248_vm0 = vcmp.gt.f32.partialorder %v3216_v58, 0.0  ;;  %v3280_v33 = vmul.f32 0.1, %v3216_v58  ;;  %v4042_v55 = vunpack.i.h.bf16 %v4040_v0  ;;  %v4041_v40 = vunpack.i.l.bf16 %v4040_v0  ;;  %v2430_v20 = vpop.f32.mrf.mxu2  ;;  %v3108_v29 = vpop.f32.mrf.mxu3 }
 0x223   : > { %v4052_v44 = vunpack.i.h.bf16 %v4050_v45  ;;  %v4051_v51 = vunpack.i.l.bf16 %v4050_v45  ;;  %v2254_v13 = vpop.f32.mrf.mxu1  ;;  %vm5451_vm6 = vcmp.gt.s32.totalorder %v952_v21, 0 }
 0x224   : > { %v3312_v14 = vsel %vm3248_vm0, %v3216_v58, %v3280_v33  ;;  %v2428_v38 = vadd.f32 %v2427_v6, %v2254_v13  ;;  %v2965_v17 = vsel %vm466_vm2, %v2933_v19, %v4041_v40  ;;  %v2966_v60 = vsel %vm466_vm2, %v2934_v22, %v4042_v55  ;;  %v4162_v13 = vld [vmem:[%s4319_s19 + $0x30] sm:$0xff] }
 0x225   : > { %v3344_v56 = vadd.f32 %v4160_v54, %v3312_v14  ;;  %v2986_v32 = vpack.c.bf16 %v2966_v60, %v2965_v17  ;;  %v2110_v24 = vsel %vm466_vm2, %v2078_v2, %v4051_v51  ;;  %v2111_v35 = vsel %vm466_vm2, %v1783_v1, %v4052_v44 }
 0x226   : > { %v3181_v11 = vadd.f32 %v3108_v29, %v2428_v38  ;;  %v2131_v9 = vpack.c.bf16 %v2111_v35, %v2110_v24  ;;  %v2551_v33 = vsel %vm5401_vm1, %v5429_v42, 0.0  ;;  %v2936_v55 = vsel %vm700_vm4, %v5435_v46, %v4062_v63 }
 0x227   : > { %3376 = vst.msk [vmem:[%s4319_s19 + $0x20] sm:$0xff] %vm466_vm2, %v3344_v56  ;;  %v2935_v22 = vsel %vm700_vm4, %v2551_v33, %v4061_v12  ;;  %v4077_v54 = vunpack.i.h.bf16 %v4075_v47  ;;  %v4076_v56 = vunpack.i.l.bf16 %v4075_v47  ;;  %v762_v24 = vadd.s32 224, %v4457_v5 }
 0x228   : > { %v3217_v34 = vadd.f32 %v5295_v25, %v3181_v11  ;;  %3672 = vmatmul.msk.bf16.gmra.mxu3 %vm2184_vm15, %v2986_v32  ;;  %v4090_v52 = vpop.permute.xlu2 %4089 }
 0x229   : > { %v4055_v43 = vpop.permute.xlu1 %4054  ;;  %v4092_v21 = vunpack.i.h.bf16 %v4090_v52 }
 0x22a   : > { %vm3249_vm3 = vcmp.gt.f32.partialorder %v3217_v34, 0.0  ;;  %v3281_v8 = vmul.f32 0.1, %v3217_v34  ;;  %v4057_v4 = vunpack.i.h.bf16 %v4055_v43  ;;  %v4056_v37 = vunpack.i.l.bf16 %v4055_v43  ;;  %v2432_v18 = vpop.f32.mrf.mxu2  ;;  %v3111_v59 = vpop.f32.mrf.mxu3 }
 0x22b   : > { %v2257_v61 = vpop.f32.mrf.mxu1 }
 0x22c   : > { %v3313_v6 = vsel %vm3249_vm3, %v3217_v34, %v3281_v8  ;;  %v1815_v23 = vsel %vm466_vm2, %v1783_v1, %v4057_v4  ;;  %v1814_v28 = vsel %vm466_vm2, %v1782_v15, %v4056_v37  ;;  %v2431_v36 = vadd.f32 %v2430_v20, %v2257_v61  ;;  %v5464_v61 = vld [vmem:[#allocation2 + $0xf7] sm:$0xff] }
 0x22d   : > { %v3345_v27 = vadd.f32 %v4161_v31, %v3313_v6  ;;  %v1834_v50 = vpack.c.bf16 %v1815_v23, %v1814_v28  ;;  %3592 = vmatmul.msk.bf16.gmra.mxu1 %vm2184_vm15, %v2131_v9  ;;  %v1400_v4 = vsel %vm5451_vm6, %v5384_v49, 0.0  ;;  %v4163_v49 = vld [vmem:[%s4319_s19 + $0x38] sm:$0xff]  ;;  %v2553_v63 = vsel %vm5451_vm6, %v5464_v61, 0.0 }
 0x22e   : > { %v3182_v39 = vadd.f32 %v3111_v59, %v2431_v36 }
 0x22f   : > { %3377 = vst.msk [vmem:[%s4319_s19 + $0x28] sm:$0xff] %vm466_vm2, %v3345_v27  ;;  %3633 = vmatmul.msk.bf16.gmra.mxu2 %vm2184_vm15, %v1834_v50  ;;  %v966_v50 = vand.u32 15, %v762_v24 }
 0x230   : > { %v3218_v48 = vadd.f32 %v5295_v25, %v3182_v39  ;;  %v5470_v39 = vld [vmem:[#allocation2 + $0xff] sm:$0xff] }
 0x231   : > { %v4070_v16 = vpop.permute.xlu1 %4069  ;;  %v4065_v58 = vpop.permute.xlu0 %4064  ;;  %vm5482_vm8 = vcmp.gt.s32.totalorder %v966_v50, 0 }
 0x232   : > { %vm3250_vm5 = vcmp.gt.f32.partialorder %v3218_v48, 0.0  ;;  %v3282_v30 = vmul.f32 0.1, %v3218_v48  ;;  %v4072_v57 = vunpack.i.h.bf16 %v4070_v16  ;;  %v4071_v62 = vunpack.i.l.bf16 %v4070_v16  ;;  %v2435_v0 = vpop.f32.mrf.mxu2  ;;  %v3113_v45 = vpop.f32.mrf.mxu3 }
 0x233   : > { %v4067_v40 = vunpack.i.h.bf16 %v4065_v58  ;;  %v4066_v20 = vunpack.i.l.bf16 %v4065_v58  ;;  %v2259_v29 = vpop.f32.mrf.mxu1 }
 0x234   : > { %v3314_v19 = vsel %vm3250_vm5, %v3218_v48, %v3282_v30  ;;  %v1785_v44 = vsel %vm700_vm4, %v5393_v26, %v4072_v57  ;;  %v2080_v51 = vsel %vm700_vm4, %v1876_v53, %v4071_v62  ;;  %v2433_v60 = vadd.f32 %v2432_v18, %v2259_v29 }
 0x235   : > { %v3346_v14 = vadd.f32 %v4162_v13, %v3314_v19  ;;  %v2968_v38 = vsel %vm466_vm2, %v2936_v55, %v4067_v40  ;;  %v2967_v17 = vsel %vm466_vm2, %v2935_v22, %v4066_v20  ;;  %v2112_v26 = vsel %vm466_vm2, %v2080_v51, %v4076_v56  ;;  %v4105_v22 = vpop.permute.xlu2 %4104 }
 0x236   : > { %v2987_v32 = vpack.c.bf16 %v2968_v38, %v2967_v17  ;;  %v3183_v10 = vadd.f32 %v3113_v45, %v2433_v60  ;;  %v2113_v11 = vsel %vm466_vm2, %v1785_v44, %v4077_v54  ;;  %v1784_v15 = vsel %vm700_vm4, %v1400_v4, %v4071_v62  ;;  %v4164_v60 = vld [vmem:[%s4319_s19 + $0x40] sm:$0xff] }
 0x237   : > { %3378 = vst.msk [vmem:[%s4319_s19 + $0x30] sm:$0xff] %vm466_vm2, %v3346_v14  ;;  %v2132_v59 = vpack.c.bf16 %v2113_v11, %v2112_v26  ;;  %v4091_v53 = vunpack.i.l.bf16 %v4090_v52  ;;  %v1878_v51 = vsel %vm5451_vm6, %v5429_v42, 0.0  ;;  %v1402_v56 = vsel %vm5482_vm8, %v5429_v42, 0.0 }
 0x238   : > { %3673 = vmatmul.msk.bf16.gmra.mxu3 %vm2184_vm15, %v2987_v32  ;;  %v3219_v1 = vadd.f32 %v5295_v25, %v3183_v10  ;;  %v4107_v11 = vunpack.i.h.bf16 %v4105_v22 }
 0x239   : > { %v4085_v2 = vpop.permute.xlu1 %4084  ;;  %v4080_v34 = vpop.permute.xlu0 %4079 }
 0x23a   : > { %v4082_v35 = vunpack.i.h.bf16 %v4080_v34  ;;  %v4081_v7 = vunpack.i.l.bf16 %v4080_v34  ;;  %v2437_v43 = vpop.f32.mrf.mxu2  ;;  %v3116_v8 = vpop.f32.mrf.mxu3  ;;  %vm3251_vm7 = vcmp.gt.f32.partialorder %v3219_v1, 0.0  ;;  %v3283_v37 = vmul.f32 0.1, %v3219_v1 }
 0x23b   : > { %v2262_v18 = vpop.f32.mrf.mxu1  ;;  %v4087_v9 = vunpack.i.h.bf16 %v4085_v2  ;;  %v4086_v6 = vunpack.i.l.bf16 %v4085_v2 }
 0x23c   : > { %v1817_v23 = vsel %vm466_vm2, %v1785_v44, %v4082_v35  ;;  %v3315_v28 = vsel %vm3251_vm7, %v3219_v1, %v3283_v37  ;;  %v1816_v36 = vsel %vm466_vm2, %v1784_v15, %v4081_v7  ;;  %v2436_v31 = vadd.f32 %v2435_v0, %v2262_v18  ;;  %v5507_v18 = vld [vmem:[#allocation2 + $0x107] sm:$0xff] }
 0x23d   : > { %3593 = vmatmul.msk.bf16.gmra.mxu1 %vm2184_vm15, %v2132_v59  ;;  %v3347_v27 = vadd.f32 %v4163_v49, %v3315_v28  ;;  %v1835_v41 = vpack.c.bf16 %v1817_v23, %v1816_v36  ;;  %v2938_v47 = vsel %vm700_vm4, %v5470_v39, %v4087_v9  ;;  %v2937_v48 = vsel %vm700_vm4, %v2553_v63, %v4086_v6  ;;  %v4165_v6 = vld [vmem:[%s4319_s19 + $0x48] sm:$0xff]  ;;  %v4120_v36 = vpop.permute.xlu2 %4119 }
 0x23e   : > { %v3184_v12 = vadd.f32 %v3116_v8, %v2436_v31  ;;  %v2969_v20 = vsel %vm466_vm2, %v2937_v48, %v4091_v53  ;;  %v2970_v29 = vsel %vm466_vm2, %v2938_v47, %v4092_v21  ;;  %v4106_v1 = vunpack.i.l.bf16 %v4105_v22 }
 0x23f   : > { %3379 = vst.msk [vmem:[%s4319_s19 + $0x38] sm:$0xff] %vm466_vm2, %v3347_v27  ;;  %3634 = vmatmul.msk.bf16.gmra.mxu2 %vm2184_vm15, %v1835_v41  ;;  %v2988_v10 = vpack.c.bf16 %v2970_v29, %v2969_v20  ;;  %v764_v28 = vadd.s32 240, %v4457_v5  ;;  %v5514_v41 = vld [vmem:[#allocation2 + $0x10f] sm:$0xff]  ;;  %v2555_v63 = vsel %vm5482_vm8, %v5507_v18, 0.0 }
 0x240   : > { %v3220_v16 = vadd.f32 %v5295_v25, %v3184_v12 }
 0x241   : > { %v4100_v58 = vpop.permute.xlu1 %4099  ;;  %v4095_v30 = vpop.permute.xlu0 %4094  ;;  %v980_v21 = vand.u32 15, %v764_v28 }
 0x242   : > { %v4097_v62 = vunpack.i.h.bf16 %v4095_v30  ;;  %v4096_v0 = vunpack.i.l.bf16 %v4095_v30  ;;  %v2440_v45 = vpop.f32.mrf.mxu2  ;;  %v3118_v33 = vpop.f32.mrf.mxu3  ;;  %vm3252_vm9 = vcmp.gt.f32.partialorder %v3220_v16, 0.0  ;;  %v3284_v55 = vmul.f32 0.1, %v3220_v16 }
 0x243   : > { %v2264_v40 = vpop.f32.mrf.mxu1  ;;  %v4102_v19 = vunpack.i.h.bf16 %v4100_v58  ;;  %v4101_v44 = vunpack.i.l.bf16 %v4100_v58  ;;  %v4122_v58 = vunpack.i.h.bf16 %v4120_v36  ;;  %v4121_v30 = vunpack.i.l.bf16 %v4120_v36 }
 0x244   : > { %v2438_v13 = vadd.f32 %v2437_v43, %v2264_v40  ;;  %v3316_v14 = vsel %vm3252_vm9, %v3220_v16, %v3284_v55  ;;  %v1787_v38 = vsel %vm700_vm4, %v5435_v46, %v4097_v62  ;;  %v2082_v17 = vsel %vm700_vm4, %v1878_v51, %v4096_v0 }
 0x245   : > { %v3348_v54 = vadd.f32 %v4164_v60, %v3316_v14  ;;  %v1786_v52 = vsel %vm700_vm4, %v1402_v56, %v4096_v0  ;;  %v2114_v46 = vsel %vm466_vm2, %v2082_v17, %v4101_v44  ;;  %v2115_v26 = vsel %vm466_vm2, %v1787_v38, %v4102_v19  ;;  %v4166_v19 = vld [vmem:[%s4319_s19 + $0x50] sm:$0xff] }
 0x246   : > { %v3185_v32 = vadd.f32 %v3118_v33, %v2438_v13  ;;  %v2133_v43 = vpack.c.bf16 %v2115_v26, %v2114_v46  ;;  %v1818_v8 = vsel %vm466_vm2, %v1786_v52, %v4106_v1  ;;  %v1819_v4 = vsel %vm466_vm2, %v1787_v38, %v4107_v11 }
 0x247   : > { %3380 = vst.msk [vmem:[%s4319_s19 + $0x40] sm:$0xff] %vm466_vm2, %v3348_v54  ;;  %v1836_v49 = vpack.c.bf16 %v1819_v4, %v1818_v8  ;;  %vm5527_vm12 = vcmp.gt.s32.totalorder %v980_v21, 0  ;;  %v1880_v13 = vsel %vm5482_vm8, %v5464_v61, 0.0  ;;  %v1789_v17 = vsel %vm700_vm4, %v5470_v39, %v4122_v58  ;;  %v2526_v8 = vld [vmem:[#allocation2 + $0x11f] sm:$0xff] }
 0x248   : > { %v3221_v3 = vadd.f32 %v5295_v25, %v3185_v32  ;;  %3674 = vmatmul.msk.bf16.gmra.mxu3 %vm2184_vm15, %v2988_v10  ;;  %v2084_v60 = vsel %vm700_vm4, %v1880_v13, %v4121_v30  ;;  %v4135_v32 = vpop.permute.xlu2 %4134  ;;  %v1404_v39 = vsel %vm5527_vm12, %v5464_v61, 0.0  ;;  %v4167_v4 = vld [vmem:[%s4319_s19 + $0x58] sm:$0xff]  ;;  %v1882_v58 = vsel %vm5527_vm12, %v5507_v18, 0.0 }
 0x249   : > { %v4110_v2 = vpop.permute.xlu0 %4109  ;;  %v4115_v34 = vpop.permute.xlu1 %4114  ;;  %v1788_v57 = vsel %vm700_vm4, %v1404_v39, %v4121_v30 }
 0x24a   : > { %vm3253_vm10 = vcmp.gt.f32.partialorder %v3221_v3, 0.0  ;;  %v3285_v42 = vmul.f32 0.1, %v3221_v3  ;;  %v2442_v24 = vpop.f32.mrf.mxu2  ;;  %v4112_v59 = vunpack.i.h.bf16 %v4110_v2  ;;  %v4111_v15 = vunpack.i.l.bf16 %v4110_v2 }
 0x24b   : > { %v3121_v35 = vpop.f32.mrf.mxu3  ;;  %v2267_v7 = vpop.f32.mrf.mxu1  ;;  %v4117_v27 = vunpack.i.h.bf16 %v4115_v34  ;;  %v4116_v50 = vunpack.i.l.bf16 %v4115_v34 }
 0x24c   : > { %v3317_v37 = vsel %vm3253_vm10, %v3221_v3, %v3285_v42  ;;  %v2441_v9 = vadd.f32 %v2440_v45, %v2267_v7  ;;  %v2940_v12 = vsel %vm700_vm4, %v5514_v41, %v4112_v59  ;;  %v2939_v47 = vsel %vm700_vm4, %v2555_v63, %v4111_v15 }
 0x24d   : > { %v3349_v23 = vadd.f32 %v4165_v6, %v3317_v37  ;;  %3594 = vmatmul.msk.bf16.gmra.mxu1 %vm2184_vm15, %v2133_v43  ;;  %v2971_v45 = vsel %vm466_vm2, %v2939_v47, %v4116_v50  ;;  %v2972_v33 = vsel %vm466_vm2, %v2940_v12, %v4117_v27  ;;  %v2525_v37 = vld [vmem:[#allocation2 + $0x117] sm:$0xff]  ;;  %v4136_v59 = vunpack.i.l.bf16 %v4135_v32 }
 0x24e   : > { %v3186_v31 = vadd.f32 %v3121_v35, %v2441_v9  ;;  %v2989_v38 = vpack.c.bf16 %v2972_v33, %v2971_v45  ;;  %v4168_v33 = vld [vmem:[%s4319_s19 + $0x60] sm:$0xff] }
 0x24f   : > { %3381 = vst.msk [vmem:[%s4319_s19 + $0x48] sm:$0xff] %vm466_vm2, %v3349_v23  ;;  %3635 = vmatmul.msk.bf16.gmra.mxu2 %vm2184_vm15, %v1836_v49  ;;  %v2557_v49 = vsel %vm5527_vm12, %v2525_v37, 0.0 }
 0x250   : > { %v3222_v5 = vadd.f32 %v5295_v25, %v3186_v31  ;;  %v2941_v63 = vsel %vm700_vm4, %v2557_v49, %v4136_v59  ;;  %v4150_v12 = vpop.permute.xlu2 %4149 }
 0x251   : > { %v4125_v48 = vpop.permute.xlu0 %4124  ;;  %v4130_v40 = vpop.permute.xlu1 %4129 }
 0x252   : > { %vm3254_vm11 = vcmp.gt.f32.partialorder %v3222_v5, 0.0  ;;  %v3286_v53 = vmul.f32 0.1, %v3222_v5  ;;  %v2445_v16 = vpop.f32.mrf.mxu2  ;;  %v4127_v20 = vunpack.i.h.bf16 %v4125_v48  ;;  %v4126_v29 = vunpack.i.l.bf16 %v4125_v48 }
 0x253   : > { %v3123_v62 = vpop.f32.mrf.mxu3  ;;  %v2269_v0 = vpop.f32.mrf.mxu1  ;;  %v4132_v54 = vunpack.i.h.bf16 %v4130_v40  ;;  %v4131_v56 = vunpack.i.l.bf16 %v4130_v40  ;;  %v4152_v40 = vunpack.i.h.bf16 %v4150_v12 }
 0x254   : > { %v3318_v55 = vsel %vm3254_vm11, %v3222_v5, %v3286_v53  ;;  %v2443_v22 = vadd.f32 %v2442_v24, %v2269_v0  ;;  %v2117_v10 = vsel %vm466_vm2, %v1789_v17, %v4127_v20  ;;  %v2116_v52 = vsel %vm466_vm2, %v2084_v60, %v4126_v29 }
 0x255   : > { %v3350_v44 = vadd.f32 %v4166_v19, %v3318_v55  ;;  %v1821_v11 = vsel %vm466_vm2, %v1789_v17, %v4132_v54  ;;  %v1820_v1 = vsel %vm466_vm2, %v1788_v57, %v4131_v56  ;;  %v2134_v2 = vpack.c.bf16 %v2117_v10, %v2116_v52  ;;  %v4169_v54 = vld [vmem:[%s4319_s19 + $0x68] sm:$0xff] }
 0x256   : > { %v3187_v14 = vadd.f32 %v3123_v62, %v2443_v22  ;;  %v4137_v24 = vunpack.i.h.bf16 %v4135_v32  ;;  %v1837_v15 = vpack.c.bf16 %v1821_v11, %v1820_v1  ;;  %v4151_v20 = vunpack.i.l.bf16 %v4150_v12  ;;  %v4170_v11 = vld [vmem:[%s4319_s19 + $0x70] sm:$0xff] }
 0x257   : > { %3382 = vst.msk [vmem:[%s4319_s19 + $0x50] sm:$0xff] %vm466_vm2, %v3350_v44 }
 0x258   : > { %v3223_v3 = vadd.f32 %v5295_v25, %v3187_v14  ;;  %3675 = vmatmul.msk.bf16.gmra.mxu3 %vm2184_vm15, %v2989_v38  ;;  %v2942_v36 = vsel %vm700_vm4, %v2526_v8, %v4137_v24 }
 0x259   : > { %v4140_v7 = vpop.permute.xlu0 %4139  ;;  %v4145_v9 = vpop.permute.xlu1 %4144 }
 0x25a   : > { %vm3255_vm13 = vcmp.gt.f32.partialorder %v3223_v3, 0.0  ;;  %v3287_v46 = vmul.f32 0.1, %v3223_v3  ;;  %v2447_v26 = vpop.f32.mrf.mxu2  ;;  %v4142_v23 = vunpack.i.h.bf16 %v4140_v7  ;;  %v4141_v28 = vunpack.i.l.bf16 %v4140_v7 }
 0x25b   : > { %v3126_v42 = vpop.f32.mrf.mxu3  ;;  %v2272_v34 = vpop.f32.mrf.mxu1  ;;  %v4147_v27 = vunpack.i.h.bf16 %v4145_v9  ;;  %v4146_v50 = vunpack.i.l.bf16 %v4145_v9 }
 0x25c   : > { %v3319_v35 = vsel %vm3255_vm13, %v3223_v3, %v3287_v46  ;;  %v2446_v43 = vadd.f32 %v2445_v16, %v2272_v34  ;;  %v2974_v48 = vsel %vm466_vm2, %v2942_v36, %v4142_v23  ;;  %v2973_v21 = vsel %vm466_vm2, %v2941_v63, %v4141_v28 }
 0x25d   : > { %v3351_v61 = vadd.f32 %v4167_v4, %v3319_v35  ;;  %3595 = vmatmul.msk.bf16.gmra.mxu1 %vm2184_vm15, %v2134_v2  ;;  %v2087_v0 = vsel %vm700_vm4, %v5514_v41, %v4147_v27  ;;  %v2086_v45 = vsel %vm700_vm4, %v1882_v58, %v4146_v50  ;;  %v2990_v29 = vpack.c.bf16 %v2974_v48, %v2973_v21  ;;  %v4171_v4 = vld [vmem:[%s4319_s19 + $0x78] sm:$0xff] }
 0x25e   : > { %v3188_v6 = vadd.f32 %v3126_v42, %v2446_v43  ;;  %v2119_v19 = vsel %vm466_vm2, %v2087_v0, %v4152_v40  ;;  %v2118_v18 = vsel %vm466_vm2, %v2086_v45, %v4151_v20  ;;  %v4174_v20 = vld [vmem:[%s4319_s19 + $0x90] sm:$0xff] }
 0x25f   : > { %3383 = vst.msk [vmem:[%s4319_s19 + $0x58] sm:$0xff] %vm466_vm2, %v3351_v61  ;;  %3636 = vmatmul.msk.bf16.gmra.mxu2 %vm2184_vm15, %v1837_v15  ;;  %v2135_v38 = vpack.c.bf16 %v2119_v19, %v2118_v18 }
 0x260   : > { %v3224_v31 = vadd.f32 %v5295_v25, %v3188_v6 }
 0x262   : > { %vm3256_vm14 = vcmp.gt.f32.partialorder %v3224_v31, 0.0  ;;  %v3288_v47 = vmul.f32 0.1, %v3224_v31  ;;  %v2450_v5 = vpop.f32.mrf.mxu2 }
 0x263   : > { %v3128_v53 = vpop.f32.mrf.mxu3  ;;  %v2274_v16 = vpop.f32.mrf.mxu1 }
 0x264   : > { %v3320_v30 = vsel %vm3256_vm14, %v3224_v31, %v3288_v47  ;;  %v2448_v62 = vadd.f32 %v2447_v26, %v2274_v16  ;;  %v4172_v31 = vld [vmem:[%s4319_s19 + $0x80] sm:$0xff] }
 0x265   : > { %v3352_v55 = vadd.f32 %v4168_v33, %v3320_v30 }
 0x266   : > { %v3189_v22 = vadd.f32 %v3128_v53, %v2448_v62  ;;  %v4173_v53 = vld [vmem:[%s4319_s19 + $0x88] sm:$0xff] }
 0x267   : > { %3384 = vst.msk [vmem:[%s4319_s19 + $0x60] sm:$0xff] %vm466_vm2, %v3352_v55 }
 0x268   : > { %v3225_v44 = vadd.f32 %v5295_v25, %v3189_v22  ;;  %3676 = vmatmul.msk.bf16.gmra.mxu3 %vm2184_vm15, %v2990_v29 }
 0x26a   : > { %vm3257_vm0 = vcmp.gt.f32.partialorder %v3225_v44, 0.0  ;;  %v3289_v41 = vmul.f32 0.1, %v3225_v44  ;;  %v2452_v51 = vpop.f32.mrf.mxu2 }
 0x26b   : > { %v3131_v13 = vpop.f32.mrf.mxu3  ;;  %v2277_v14 = vpop.f32.mrf.mxu1 }
 0x26c   : > { %v3321_v17 = vsel %vm3257_vm0, %v3225_v44, %v3289_v41  ;;  %v2451_v60 = vadd.f32 %v2450_v5, %v2277_v14 }
 0x26d   : > { %v3353_v56 = vadd.f32 %v4169_v54, %v3321_v17  ;;  %3596 = vmatmul.msk.bf16.gmra.mxu1 %vm2184_vm15, %v2135_v38  ;;  %v4175_v38 = vld [vmem:[%s4319_s19 + $0x98] sm:$0xff] }
 0x26e   : > { %v3190_v32 = vadd.f32 %v3131_v13, %v2451_v60 }
 0x26f   : > { %3385 = vst.msk [vmem:[%s4319_s19 + $0x68] sm:$0xff] %vm466_vm2, %v3353_v56 }
 0x270   : > { %v3226_v10 = vadd.f32 %v5295_v25, %v3190_v32 }
 0x272   : > { %vm3258_vm4 = vcmp.gt.f32.partialorder %v3226_v10, 0.0  ;;  %v3290_v52 = vmul.f32 0.1, %v3226_v10  ;;  %v2455_v3 = vpop.f32.mrf.mxu2 }
 0x273   : > { %v3133_v39 = vpop.f32.mrf.mxu3  ;;  %v2279_v57 = vpop.f32.mrf.mxu1 }
 0x274   : > { %v3322_v46 = vsel %vm3258_vm4, %v3226_v10, %v3290_v52  ;;  %v2453_v26 = vadd.f32 %v2452_v51, %v2279_v57  ;;  %v4176_v57 = vld [vmem:[%s4319_s19 + $0xa0] sm:$0xff] }
 0x275   : > { %v3354_v1 = vadd.f32 %v4170_v11, %v3322_v46 }
 0x276   : > { %v3191_v2 = vadd.f32 %v3133_v39, %v2453_v26 }
 0x277   : > { %3386 = vst.msk [vmem:[%s4319_s19 + $0x70] sm:$0xff] %vm466_vm2, %v3354_v1 }
 0x278   : > { %v3227_v42 = vadd.f32 %v5295_v25, %v3191_v2 }
 0x27a   : > { %vm3259_vm15 = vcmp.gt.f32.partialorder %v3227_v42, 0.0  ;;  %v3291_v34 = vmul.f32 0.1, %v3227_v42  ;;  %v2457_v24 = vpop.f32.mrf.mxu2 }
 0x27b   : > { %v3136_v35 = vpop.f32.mrf.mxu3  ;;  %v2282_v7 = vpop.f32.mrf.mxu1 }
 0x27c   : > { %v3323_v43 = vsel %vm3259_vm15, %v3227_v42, %v3291_v34  ;;  %v2456_v8 = vadd.f32 %v2455_v3, %v2282_v7  ;;  %v4177_v7 = vld [vmem:[%s4319_s19 + $0xa8] sm:$0xff] }
 0x27d   : > { %v3355_v61 = vadd.f32 %v4171_v4, %v3323_v43  ;;  %v5611_v4 = vld [vmem:[%s4314_s15] ss:$0 sm:$0xff] }
 0x27e   : > { %v3192_v37 = vadd.f32 %v3136_v35, %v2456_v8 }
 0x27f   : > { %3387 = vst.msk [vmem:[%s4319_s19 + $0x78] sm:$0xff] %vm466_vm2, %v3355_v61 }
 0x280   : > { %v3228_v59 = vadd.f32 %v5295_v25, %v3192_v37 }
 0x282   : > { %vm3260_vm1 = vcmp.gt.f32.partialorder %v3228_v59, 0.0  ;;  %v3292_v15 = vmul.f32 0.1, %v3228_v59  ;;  %v2460_v9 = vpop.f32.mrf.mxu2 }
 0x283   : > { %v3138_v6 = vpop.f32.mrf.mxu3  ;;  %v2284_v23 = vpop.f32.mrf.mxu1 }
 0x284   : > { %v3324_v28 = vsel %vm3260_vm1, %v3228_v59, %v3292_v15  ;;  %v2458_v36 = vadd.f32 %v2457_v24, %v2284_v23  ;;  %v4179_v23 = vld [vmem:[%s4319_s19 + $0xb0] sm:$0xff] }
 0x285   : > { %v3356_v49 = vadd.f32 %v4172_v31, %v3324_v28 }
 0x286   : > { %v3193_v27 = vadd.f32 %v3138_v6, %v2458_v36 }
 0x287   : > { %3388 = vst.msk [vmem:[%s4319_s19 + $0x80] sm:$0xff] %vm466_vm2, %v3356_v49 }
 0x288   : > { %v3229_v50 = vadd.f32 %v5295_v25, %v3193_v27 }
 0x28a   : > { %vm3261_vm3 = vcmp.gt.f32.partialorder %v3229_v50, 0.0  ;;  %v3293_v63 = vmul.f32 0.1, %v3229_v50  ;;  %v2462_v12 = vpop.f32.mrf.mxu2 }
 0x28b   : > { %v3141_v47 = vpop.f32.mrf.mxu3  ;;  %v2287_v5 = vpop.f32.mrf.mxu1 }
 0x28c   : > { %v3325_v48 = vsel %vm3261_vm3, %v3229_v50, %v3293_v63  ;;  %v2461_v21 = vadd.f32 %v2460_v9, %v2287_v5  ;;  %v4180_v5 = vld [vmem:[%s4319_s19 + $0xb8] sm:$0xff] }
 0x28d   : > { %v3357_v16 = vadd.f32 %v4173_v53, %v3325_v48 }
 0x28e   : > { %v3194_v58 = vadd.f32 %v3141_v47, %v2461_v21 }
 0x28f   : > { %3389 = vst.msk [vmem:[%s4319_s19 + $0x88] sm:$0xff] %vm466_vm2, %v3357_v16 }
 0x290   : > { %v3230_v30 = vadd.f32 %v5295_v25, %v3194_v58 }
 0x292   : > { %vm3262_vm5 = vcmp.gt.f32.partialorder %v3230_v30, 0.0  ;;  %v3294_v62 = vmul.f32 0.1, %v3230_v30  ;;  %v2465_v0 = vpop.f32.mrf.mxu2 }
 0x293   : > { %v3143_v45 = vpop.f32.mrf.mxu3  ;;  %v2289_v33 = vpop.f32.mrf.mxu1 }
 0x294   : > { %v3326_v55 = vsel %vm3262_vm5, %v3230_v30, %v3294_v62  ;;  %v2463_v40 = vadd.f32 %v2462_v12, %v2289_v33 }
 0x295   : > { %v3358_v29 = vadd.f32 %v4174_v20, %v3326_v55 }
 0x296   : > { %v3195_v22 = vadd.f32 %v3143_v45, %v2463_v40  ;;  %v4181_v45 = vld [vmem:[%s4319_s19 + $0xc0] sm:$0xff] }
 0x297   : > { %3390 = vst.msk [vmem:[%s4319_s19 + $0x90] sm:$0xff] %vm466_vm2, %v3358_v29 }
 0x298   : > { %v3231_v19 = vadd.f32 %v5295_v25, %v3195_v22 }
 0x29a   : > { %vm3263_vm6 = vcmp.gt.f32.partialorder %v3231_v19, 0.0  ;;  %v3295_v18 = vmul.f32 0.1, %v3231_v19  ;;  %v2467_v44 = vpop.f32.mrf.mxu2 }
 0x29b   : > { %v3146_v41 = vpop.f32.mrf.mxu3  ;;  %v2292_v51 = vpop.f32.mrf.mxu1 }
 0x29c   : > { %v3327_v13 = vsel %vm3263_vm6, %v3231_v19, %v3295_v18  ;;  %v2466_v14 = vadd.f32 %v2465_v0, %v2292_v51  ;;  %v4182_v51 = vld [vmem:[%s4319_s19 + $0xc8] sm:$0xff] }
 0x29d   : > { %v3359_v17 = vadd.f32 %v4175_v38, %v3327_v13 }
 0x29e   : > { %v3196_v60 = vadd.f32 %v3146_v41, %v2466_v14 }
 0x29f   : > { %3391 = vst.msk [vmem:[%s4319_s19 + $0x98] sm:$0xff] %vm466_vm2, %v3359_v17 }
 0x2a0   : > { %v3232_v54 = vadd.f32 %v5295_v25, %v3196_v60 }
 0x2a2   : > { %vm3264_vm7 = vcmp.gt.f32.partialorder %v3232_v54, 0.0  ;;  %v3296_v56 = vmul.f32 0.1, %v3232_v54  ;;  %v2470_v32 = vpop.f32.mrf.mxu2 }
 0x2a3   : > { %v3148_v10 = vpop.f32.mrf.mxu3  ;;  %v2294_v52 = vpop.f32.mrf.mxu1 }
 0x2a4   : > { %v3328_v3 = vsel %vm3264_vm7, %v3232_v54, %v3296_v56  ;;  %v2468_v39 = vadd.f32 %v2467_v44, %v2294_v52 }
 0x2a5   : > { %v3360_v46 = vadd.f32 %v4176_v57, %v3328_v3 }
 0x2a6   : > { %v3197_v26 = vadd.f32 %v3148_v10, %v2468_v39  ;;  %v4183_v10 = vld [vmem:[%s4319_s19 + $0xd0] sm:$0xff] }
 0x2a7   : > { %3392 = vst.msk [vmem:[%s4319_s19 + $0xa0] sm:$0xff] %vm466_vm2, %v3360_v46 }
 0x2a8   : > { %v3233_v11 = vadd.f32 %v5295_v25, %v3197_v26 }
 0x2aa   : > { %vm3265_vm8 = vcmp.gt.f32.partialorder %v3233_v11, 0.0  ;;  %v3297_v1 = vmul.f32 0.1, %v3233_v11  ;;  %v2472_v2 = vpop.f32.mrf.mxu2 }
 0x2ab   : > { %v3151_v42 = vpop.f32.mrf.mxu3  ;;  %v2297_v34 = vpop.f32.mrf.mxu1 }
 0x2ac   : > { %v3329_v24 = vsel %vm3265_vm8, %v3233_v11, %v3297_v1  ;;  %v2471_v35 = vadd.f32 %v2470_v32, %v2297_v34 }
 0x2ad   : > { %v3361_v43 = vadd.f32 %v4177_v7, %v3329_v24 }
 0x2ae   : > { %v3198_v8 = vadd.f32 %v3151_v42, %v2471_v35  ;;  %v4184_v42 = vld [vmem:[%s4319_s19 + $0xd8] sm:$0xff] }
 0x2af   : > { %3393 = vst.msk [vmem:[%s4319_s19 + $0xa8] sm:$0xff] %vm466_vm2, %v3361_v43 }
 0x2b0   : > { %v3234_v61 = vadd.f32 %v5611_v4, %v3198_v8 }
 0x2b2   : > { %vm3266_vm9 = vcmp.gt.f32.partialorder %v3234_v61, 0.0  ;;  %v3298_v25 = vmul.f32 0.1, %v3234_v61  ;;  %v2475_v37 = vpop.f32.mrf.mxu2 }
 0x2b3   : > { %v3153_v59 = vpop.f32.mrf.mxu3  ;;  %v2299_v15 = vpop.f32.mrf.mxu1 }
 0x2b4   : > { %v3330_v9 = vsel %vm3266_vm9, %v3234_v61, %v3298_v25  ;;  %v2473_v6 = vadd.f32 %v2472_v2, %v2299_v15 }
 0x2b5   : > { %v3362_v28 = vadd.f32 %v4179_v23, %v3330_v9 }
 0x2b6   : > { %v3199_v36 = vadd.f32 %v3153_v59, %v2473_v6  ;;  %v4185_v59 = vld [vmem:[%s4319_s19 + $0xe0] sm:$0xff] }
 0x2b7   : > { %3394 = vst.msk [vmem:[%s4319_s19 + $0xb0] sm:$0xff] %vm466_vm2, %v3362_v28 }
 0x2b8   : > { %v3235_v31 = vadd.f32 %v5611_v4, %v3199_v36 }
 0x2ba   : > { %vm3267_vm10 = vcmp.gt.f32.partialorder %v3235_v31, 0.0  ;;  %v3299_v49 = vmul.f32 0.1, %v3235_v31  ;;  %v2477_v27 = vpop.f32.mrf.mxu2 }
 0x2bb   : > { %v3156_v50 = vpop.f32.mrf.mxu3  ;;  %v2302_v63 = vpop.f32.mrf.mxu1 }
 0x2bc   : > { %v3331_v12 = vsel %vm3267_vm10, %v3235_v31, %v3299_v49  ;;  %v2476_v47 = vadd.f32 %v2475_v37, %v2302_v63 }
 0x2bd   : > { %v3363_v48 = vadd.f32 %v4180_v5, %v3331_v12 }
 0x2be   : > { %v3200_v21 = vadd.f32 %v3156_v50, %v2476_v47  ;;  %v4186_v50 = vld [vmem:[%s4319_s19 + $0xe8] sm:$0xff] }
 0x2bf   : > { %3395 = vst.msk [vmem:[%s4319_s19 + $0xb8] sm:$0xff] %vm466_vm2, %v3363_v48 }
 0x2c0   : > { %v3236_v53 = vadd.f32 %v5611_v4, %v3200_v21 }
 0x2c2   : > { %vm3268_vm11 = vcmp.gt.f32.partialorder %v3236_v53, 0.0  ;;  %v3300_v16 = vmul.f32 0.1, %v3236_v53  ;;  %v2480_v58 = vpop.f32.mrf.mxu2 }
 0x2c3   : > { %v3158_v30 = vpop.f32.mrf.mxu3  ;;  %v2304_v0 = vpop.f32.mrf.mxu1 }
 0x2c4   : > { %v3332_v62 = vsel %vm3268_vm11, %v3236_v53, %v3300_v16  ;;  %v2478_v55 = vadd.f32 %v2477_v27, %v2304_v0 }
 0x2c5   : > { %v3364_v33 = vadd.f32 %v4181_v45, %v3332_v62 }
 0x2c6   : > { %v3201_v40 = vadd.f32 %v3158_v30, %v2478_v55 }
 0x2c7   : > { %3396 = vst.msk [vmem:[%s4319_s19 + $0xc0] sm:$0xff] %vm466_vm2, %v3364_v33 }
 0x2c8   : > { %v3237_v20 = vadd.f32 %v5611_v4, %v3201_v40  ;;  %v4188_v40 = vld [vmem:[%s4319_s19 + $0xf8] sm:$0xff] }
 0x2ca   : > { %vm3269_vm12 = vcmp.gt.f32.partialorder %v3237_v20, 0.0  ;;  %v3301_v29 = vmul.f32 0.1, %v3237_v20  ;;  %v2482_v19 = vpop.f32.mrf.mxu2 }
 0x2cb   : > { %v3161_v22 = vpop.f32.mrf.mxu3  ;;  %v2307_v18 = vpop.f32.mrf.mxu1 }
 0x2cc   : > { %v3333_v44 = vsel %vm3269_vm12, %v3237_v20, %v3301_v29  ;;  %v2481_v41 = vadd.f32 %v2480_v58, %v2307_v18  ;;  %v4187_v58 = vld [vmem:[%s4319_s19 + $0xf0] sm:$0xff] }
 0x2cd   : > { %v3365_v13 = vadd.f32 %v4182_v51, %v3333_v44 }
 0x2ce   : > { %v3202_v14 = vadd.f32 %v3161_v22, %v2481_v41 }
 0x2cf   : > { %3397 = vst.msk [vmem:[%s4319_s19 + $0xc8] sm:$0xff] %vm466_vm2, %v3365_v13 }
 0x2d0   : > { %v3238_v38 = vadd.f32 %v5611_v4, %v3202_v14 }
 0x2d2   : > { %vm3270_vm13 = vcmp.gt.f32.partialorder %v3238_v38, 0.0  ;;  %v3302_v17 = vmul.f32 0.1, %v3238_v38  ;;  %v2485_v3 = vpop.f32.mrf.mxu2 }
 0x2d3   : > { %v3163_v60 = vpop.f32.mrf.mxu3  ;;  %v2309_v54 = vpop.f32.mrf.mxu1 }
 0x2d4   : > { %v3334_v56 = vsel %vm3270_vm13, %v3238_v38, %v3302_v17  ;;  %v2483_v32 = vadd.f32 %v2482_v19, %v2309_v54 }
 0x2d5   : > { %v3366_v52 = vadd.f32 %v4183_v10, %v3334_v56 }
 0x2d6   : > { %v3203_v39 = vadd.f32 %v3163_v60, %v2483_v32 }
 0x2d7   : > { %3398 = vst.msk [vmem:[%s4319_s19 + $0xd0] sm:$0xff] %vm466_vm2, %v3366_v52 }
 0x2d8   : > { %v3239_v57 = vadd.f32 %v5611_v4, %v3203_v39 }
 0x2da   : > { %vm3271_vm14 = vcmp.gt.f32.partialorder %v3239_v57, 0.0  ;;  %v3303_v46 = vmul.f32 0.1, %v3239_v57  ;;  %v2487_v35 = vpop.f32.mrf.mxu2 }
 0x2db   : > { %v3166_v26 = vpop.f32.mrf.mxu3  ;;  %v2312_v11 = vpop.f32.mrf.mxu1 }
 0x2dc   : > { %v3335_v1 = vsel %vm3271_vm14, %v3239_v57, %v3303_v46  ;;  %v2486_v2 = vadd.f32 %v2485_v3, %v2312_v11 }
 0x2dd   : > { %v3367_v34 = vadd.f32 %v4184_v42, %v3335_v1 }
 0x2de   : > { %v3204_v24 = vadd.f32 %v3166_v26, %v2486_v2 }
 0x2df   : > { %3399 = vst.msk [vmem:[%s4319_s19 + $0xd8] sm:$0xff] %vm466_vm2, %v3367_v34 }
 0x2e0   : > { %v3240_v7 = vadd.f32 %v5611_v4, %v3204_v24 }
 0x2e2   : > { %vm3272_vm0 = vcmp.gt.f32.partialorder %v3240_v7, 0.0  ;;  %v3304_v43 = vmul.f32 0.1, %v3240_v7  ;;  %v2490_v23 = vpop.f32.mrf.mxu2 }
 0x2e3   : > { %v3168_v8 = vpop.f32.mrf.mxu3  ;;  %v2314_v61 = vpop.f32.mrf.mxu1 }
 0x2e4   : > { %v3336_v25 = vsel %vm3272_vm0, %v3240_v7, %v3304_v43  ;;  %v2488_v37 = vadd.f32 %v2487_v35, %v2314_v61 }
 0x2e5   : > { %v3368_v15 = vadd.f32 %v4185_v59, %v3336_v25 }
 0x2e6   : > { %v3205_v9 = vadd.f32 %v3168_v8, %v2488_v37 }
 0x2e7   : > { %3400 = vst.msk [vmem:[%s4319_s19 + $0xe0] sm:$0xff] %vm466_vm2, %v3368_v15 }
 0x2e8   : > { %v3241_v6 = vadd.f32 %v5611_v4, %v3205_v9 }
 0x2ea   : > { %vm3273_vm4 = vcmp.gt.f32.partialorder %v3241_v6, 0.0  ;;  %v3305_v28 = vmul.f32 0.1, %v3241_v6  ;;  %v2492_v48 = vpop.f32.mrf.mxu2 }
 0x2eb   : > { %v3171_v36 = vpop.f32.mrf.mxu3  ;;  %v2317_v31 = vpop.f32.mrf.mxu1 }
 0x2ec   : > { %v3337_v49 = vsel %vm3273_vm4, %v3241_v6, %v3305_v28  ;;  %v2491_v27 = vadd.f32 %v2490_v23, %v2317_v31 }
 0x2ed   : > { %v3369_v63 = vadd.f32 %v4186_v50, %v3337_v49 }
 0x2ee   : > { %v3206_v12 = vadd.f32 %v3171_v36, %v2491_v27 }
 0x2ef   : > { %3401 = vst.msk [vmem:[%s4319_s19 + $0xe8] sm:$0xff] %vm466_vm2, %v3369_v63 }
 0x2f0   : > { %v3242_v47 = vadd.f32 %v5611_v4, %v3206_v12 }
 0x2f2   : > { %vm3274_vm15 = vcmp.gt.f32.partialorder %v3242_v47, 0.0  ;;  %v3306_v5 = vmul.f32 0.1, %v3242_v47 }
 0x2f3   : > { %v2319_v21 = vpop.f32.mrf.mxu1  ;;  %v3173_v62 = vpop.f32.mrf.mxu3 }
 0x2f4   : > { %v3338_v53 = vsel %vm3274_vm15, %v3242_v47, %v3306_v5  ;;  %v2493_v16 = vadd.f32 %v2492_v48, %v2319_v21 }
 0x2f5   : > { %v3370_v30 = vadd.f32 %v4187_v58, %v3338_v53 }
 0x2f6   : > { %v3207_v0 = vadd.f32 %v3173_v62, %v2493_v16 }
 0x2f7   : > { %3402 = vst.msk [vmem:[%s4319_s19 + $0xf0] sm:$0xff] %vm466_vm2, %v3370_v30 }
 0x2f8   : > { %v3243_v45 = vadd.f32 %v5611_v4, %v3207_v0 }
 0x2fa   : > { %vm3275_vm1 = vcmp.gt.f32.partialorder %v3243_v45, 0.0  ;;  %v3307_v33 = vmul.f32 0.1, %v3243_v45 }
 0x2fc   : > { %v3339_v55 = vsel %vm3275_vm1, %v3243_v45, %v3307_v33 }
 0x2fd   : > { %v3371_v20 = vadd.f32 %v4188_v40, %v3339_v55 }
 0x2ff   : > { %3403 = vst.msk [vmem:[%s4319_s19 + $0xf8] sm:$0xff] %vm466_vm2, %v3371_v20 }
 0x300 PF: > { %s15_s22 = sadd.s32 1, %s4227_s22   ;;  %s5738_s18 = smov %s4219_s20 }
 0x301   : > { %p12_p8 = scmp.ge.s32.totalorder %s15_s22, 6   ;;  %s5739_s19 = smov %s4223_s21 }
 0x302   : > { %s5740_s20 = smov %s5743_s23  ;;  %s5741_s21 = smov %s5747_s24 }
 0x303   :  { %14 = sbr.rel (!%p12_p8) target bundleno = 3 (0x3), region = 86 }

</bundles_post_ra>
